<compile_context>
chip_gen: v7x
topology: tpu7x:2x2x1
jax: 0.10.0
libtpu: 0.0.40
codegen_flags: <defaults>
</compile_context>

<pallas_src>
import functools

import jax
import jax.numpy as jnp
from jax.experimental import pallas as pl
from jax.experimental.pallas import tpu as pltpu


# LayerNorm eps: HF / NVlabs SegFormer use 1e-6 (torch nn.LayerNorm default would be 1e-5).
_LN_EPS = 1e-6
_INV_SQRT2 = 0.7071067811865476


def _tpu_defaults():
    """(vmem_limit_bytes, tm_target, tk_target) derived from the chip generation."""
    try:
        cap = getattr(pltpu.get_tpu_info(), "vmem_capacity_bytes", None)
    except Exception:
        cap = None
    if cap is None:
        return 32 * 1024 * 1024, 512, 512            # conservative fallback
    if cap <= 64 * 1024 * 1024:                       # v7x-class: 64 MiB physical VMEM
        return 48 * 1024 * 1024, 256, 256
    return 96 * 1024 * 1024, 1024, 512                # v5e / v6e: 128 MiB physical VMEM


_VMEM_LIMIT_BYTES, _TM_TARGET, _TK_TARGET = _tpu_defaults()


def _sublane_align(dtype):
    """Row alignment matching the dtype's sublane packing: 8 (4B), 16 (2B), 32 (1B)."""
    return 8 * max(1, 4 // jnp.dtype(dtype).itemsize)


def _pick_tile(dim, target, align):
    """Largest multiple of `align` that divides `dim` and is <= target, else the full dim."""
    if dim <= target:
        return dim
    t = (target // align) * align
    while t >= align:
        if dim % t == 0:
            return t
        t -= align
    return dim


# ------------------------------------------------------------------ fused tiled matmul kernel

def _fused_mm_kernel(*refs, nk, has_ln, has_res, eps):
    """y = [LN(x)] @ W + b [+ residual]; K accumulated over grid axis 2 when nk > 1."""
    it = iter(refs)
    x_ref, w_ref, b_ref = next(it), next(it), next(it)
    g_ref = bt_ref = r_ref = None
    if has_ln:
        g_ref, bt_ref = next(it), next(it)
    if has_res:
        r_ref = next(it)
    o_ref = next(it)
    acc_ref = next(it, None)                     # only allocated when nk > 1

    x = x_ref[...]
    if has_ln:
        # LN statistics in f32 over the full K (tk == K enforced by the wrapper), then cast
        # back to the stored dtype so the MXU sees its native (e.g. bf16) operands.
        xf = x.astype(jnp.float32)
        mu = jnp.mean(xf, axis=-1, keepdims=True)
        var = jnp.mean(jnp.square(xf - mu), axis=-1, keepdims=True)
        xf = (xf - mu) * jax.lax.rsqrt(var + eps)
        xf = xf * g_ref[...].astype(jnp.float32) + bt_ref[...].astype(jnp.float32)
        x = xf.astype(x_ref.dtype)
    # NOTE: with nn > 1 the LN prologue is recomputed per output tile; only worth caching if a
    # bundle dump shows the VPU/EUP slot (not the MXU) is saturated.

    part = jnp.dot(x, w_ref[...], preferred_element_type=jnp.float32)

    def _epilogue(y):
        y = y + b_ref[...].astype(jnp.float32)
        if has_res:
            y = y + r_ref[...].astype(jnp.float32)
        o_ref[...] = y.astype(o_ref.dtype)

    if nk == 1:
        _epilogue(part)                          # no f32 scratch / extra VMEM copy needed
    else:
        k = pl.program_id(2)

        @pl.when(k == 0)
        def _init():
            acc_ref[...] = jnp.zeros_like(acc_ref)

        acc_ref[...] += part

        @pl.when(k == nk - 1)
        def _finalize():
            _epilogue(acc_ref[...])


def fused_linear(x2d, w, b, *, ln=None, residual=None, eps=_LN_EPS,
                 tm_target=None, tn_target=256, tk_target=None):
    """y = [LN(x)] @ w + b [+ residual].  x2d: (M, K), w: (K, N), b: (N,), residual: (M, N)."""
    M, K = x2d.shape
    N = w.shape[1]
    has_ln = ln is not None
    has_res = residual is not None
    tm_target = _TM_TARGET if tm_target is None else tm_target
    tk_target = _TK_TARGET if tk_target is None else tk_target

    tm = _pick_tile(M, tm_target, _sublane_align(x2d.dtype))
    tn = _pick_tile(N, tn_target, 128)
    tk = K if has_ln else _pick_tile(K, tk_target, 128)
    if has_ln:
        assert tk == K, "LayerNorm prologue requires the full K in one tile"
    nm, nn, nk = M // tm, N // tn, K // tk

    args = [x2d, w, b.reshape(1, N)]
    in_specs = [
        pl.BlockSpec((tm, tk), lambda i, j, k: (i, k)),
        pl.BlockSpec((tk, tn), lambda i, j, k: (k, j)),
        pl.BlockSpec((1, tn), lambda i, j, k: (0, j)),
    ]
    if has_ln:
        g, bt = ln
        args += [g.reshape(1, K), bt.reshape(1, K)]
        in_specs += [pl.BlockSpec((1, tk), lambda i, j, k: (0, k)),
                     pl.BlockSpec((1, tk), lambda i, j, k: (0, k))]
    if has_res:
        args.append(residual)
        in_specs.append(pl.BlockSpec((tm, tn), lambda i, j, k: (i, j)))

    scratch = [] if nk == 1 else [pltpu.VMEM((tm, tn), jnp.float32)]
    kernel = functools.partial(_fused_mm_kernel, nk=nk, has_ln=has_ln,
                               has_res=has_res, eps=eps)
    return pl.pallas_call(
        kernel,
        out_shape=jax.ShapeDtypeStruct((M, N), x2d.dtype),
        grid=(nm, nn, nk),
        in_specs=in_specs,
        out_specs=pl.BlockSpec((tm, tn), lambda i, j, k: (i, j)),
        scratch_shapes=scratch,
        compiler_params=pltpu.CompilerParams(
            dimension_semantics=("parallel", "parallel", "arbitrary"),
            vmem_limit_bytes=_VMEM_LIMIT_BYTES),
    )(*args)


# ------------------------------------------------------------------ row-tiled LayerNorm

def _layernorm_kernel(x_ref, g_ref, b_ref, o_ref, *, eps):
    x = x_ref[...].astype(jnp.float32)
    mu = jnp.mean(x, axis=-1, keepdims=True)
    var = jnp.mean(jnp.square(x - mu), axis=-1, keepdims=True)
    y = (x - mu) * jax.lax.rsqrt(var + eps)
    y = y * g_ref[...].astype(jnp.float32) + b_ref[...].astype(jnp.float32)
    o_ref[...] = y.astype(o_ref.dtype)


def layernorm(x2d, gamma, beta, eps=_LN_EPS, tm_target=None):
    """Row-wise LayerNorm over the last dim of a (M, C) slab, tiled over rows."""
    M, C = x2d.shape
    tm_target = _TM_TARGET if tm_target is None else tm_target
    tm = _pick_tile(M, tm_target, _sublane_align(x2d.dtype))
    return pl.pallas_call(
        functools.partial(_layernorm_kernel, eps=eps),
        out_shape=jax.ShapeDtypeStruct((M, C), x2d.dtype),
        grid=(M // tm,),
        in_specs=[
            pl.BlockSpec((tm, C), lambda i: (i, 0)),
            pl.BlockSpec((1, C), lambda i: (0, 0)),
            pl.BlockSpec((1, C), lambda i: (0, 0)),
        ],
        out_specs=pl.BlockSpec((tm, C), lambda i: (i, 0)),
        compiler_params=pltpu.CompilerParams(
            dimension_semantics=("parallel",),
            vmem_limit_bytes=_VMEM_LIMIT_BYTES),
    )(x2d, gamma.reshape(1, C), beta.reshape(1, C))


# ------------------------------------------------------------------ attention (transpose-free)

def _attn_kernel(q_ref, kv_ref, o_ref, *, num_heads, dh):
    # q block: (1, tq, C); kv block: (1, Nk, 2C).  Heads are static channel slices; the
    # attention scale is pre-folded into the q projection weights.
    # TODO(synk): head-major kv layout (or dh padding) would avoid unaligned-lane head slices
    #             on v6e/v7x; left as-is since the concat keeps the final store lane-dense.
    q_all = q_ref[0]
    kv = kv_ref[0]
    C = num_heads * dh
    outs = []
    for h in range(num_heads):
        q = q_all[:, h * dh:(h + 1) * dh]
        k = kv[:, h * dh:(h + 1) * dh]
        v = kv[:, C + h * dh:C + (h + 1) * dh]
        # Contract the last dim of both operands (no materialized k.T); native-dtype MXU feed,
        # f32 accumulation via preferred_element_type.
        s = jax.lax.dot_general(q, k, (((1,), (1,)), ((), ())),
                                preferred_element_type=jnp.float32)
        s = s - jnp.max(s, axis=-1, keepdims=True)
        p = jnp.exp(s)
        inv_l = pl.reciprocal(jnp.sum(p, axis=-1, keepdims=True), approx=True)
        o_h = jnp.dot(p.astype(v.dtype), v, preferred_element_type=jnp.float32)
        outs.append(o_h * inv_l)
    # Single lane-dense store of all heads.
    o_ref[0] = jnp.concatenate(outs, axis=-1).astype(o_ref.dtype)


def attention_core(q_bnc, kv_bn2c, num_heads, tq_target=256):
    """q: (B, N, C), kv: (B, Nk, 2C) -> (B, N, C). Grid over (batch, Nq-tiles), both parallel."""
    B, N, C = q_bnc.shape
    _, Nk, C2 = kv_bn2c.shape
    dh = C // num_heads
    tq = _pick_tile(N, tq_target, _sublane_align(q_bnc.dtype))
    return pl.pallas_call(
        functools.partial(_attn_kernel, num_heads=num_heads, dh=dh),
        out_shape=jax.ShapeDtypeStruct((B, N, C), q_bnc.dtype),
        grid=(B, N // tq),
        in_specs=[
            pl.BlockSpec((1, tq, C), lambda b, i: (b, i, 0)),
            pl.BlockSpec((1, Nk, C2), lambda b, i: (b, 0, 0)),
        ],
        out_specs=pl.BlockSpec((1, tq, C), lambda b, i: (b, i, 0)),
        compiler_params=pltpu.CompilerParams(
            dimension_semantics=("parallel", "parallel"),
            vmem_limit_bytes=_VMEM_LIMIT_BYTES),
    )(q_bnc, kv_bn2c)


# ------------------------------------------------------------------ depthwise 3x3 conv (+bias+GELU)

def _probe_erf_in_kernel():
    """Check that lax.erf lowers inside Mosaic so exact-erf GELU can be fused in-kernel."""
    try:
        def _k(x_ref, o_ref):
            o_ref[...] = jax.lax.erf(x_ref[...])
        y = pl.pallas_call(_k, out_shape=jax.ShapeDtypeStruct((8, 128), jnp.float32))(
            jnp.zeros((8, 128), jnp.float32))
        jax.block_until_ready(y)
        return True
    except Exception:
        return False


_FUSE_GELU_IN_DWCONV = _probe_erf_in_kernel()


def _dwconv3x3_kernel(x_ref, w_ref, b_ref, o_ref, *, H, W, fuse_gelu):
    # x block: (1, H+2, W+2, tc) (already zero-padded); w: (3, 3, tc); b: (1, 1, tc)
    x = x_ref[0]
    w = w_ref[...].astype(jnp.float32)
    acc = jnp.zeros(o_ref.shape[1:], jnp.float32)
    for dy in range(3):
        for dx in range(3):
            acc = acc + x[dy:dy + H, dx:dx + W, :].astype(jnp.float32) * w[dy, dx]
    acc = acc + b_ref[...].astype(jnp.float32)
    if fuse_gelu:
        # Exact-erf GELU fused as epilogue (matches torch nn.GELU()); erf runs on the EUP slot.
        acc = 0.5 * acc * (1.0 + jax.lax.erf(acc * _INV_SQRT2))
    o_ref[0] = acc.astype(o_ref.dtype)


def dwconv3x3(x_nhwc, w, b, *, fuse_gelu, tc_target=128):
    """Depthwise 3x3 conv, stride 1, pad 1, bias (+ exact-erf GELU) fused; channel-tiled.

    Channels are independent, so tiling over C needs no halo and keeps each double-buffered
    block small enough for v7x's 64 MiB VMEM at real SegFormer resolutions.
    """
    # TODO(synk): for very large H*W additionally row-tile with a 2-row halo (manual DMA) and
    #             drop the jnp.pad pass by masking border rows/cols in-kernel.
    B, H, W, C = x_nhwc.shape
    xp = jnp.pad(x_nhwc, ((0, 0), (1, 1), (1, 1), (0, 0)))
    tc = _pick_tile(C, tc_target, 128)
    nc = C // tc
    return pl.pallas_call(
        functools.partial(_dwconv3x3_kernel, H=H, W=W, fuse_gelu=fuse_gelu),
        out_shape=jax.ShapeDtypeStruct((B, H, W, C), x_nhwc.dtype),
        grid=(B, nc),
        in_specs=[
            pl.BlockSpec((1, H + 2, W + 2, tc), lambda i, c: (i, 0, 0, c)),
            pl.BlockSpec((3, 3, tc), lambda i, c: (0, 0, c)),
            pl.BlockSpec((1, 1, tc), lambda i, c: (0, 0, c)),
        ],
        out_specs=pl.BlockSpec((1, H, W, tc), lambda i, c: (i, 0, 0, c)),
        compiler_params=pltpu.CompilerParams(
            dimension_semantics=("parallel", "parallel"),
            vmem_limit_bytes=_VMEM_LIMIT_BYTES),
    )(xp, w, b.reshape(1, 1, C))


# ------------------------------------------------------------------ JAX glue

def im2col(x_nhwc, k, stride, pad):
    """Overlapping k x k patches -> (B, Ho*Wo, k*k*C).  (Patch-embed conv only.)"""
    # TODO(synk): fold overlapping stride-2 patch extraction into the matmul kernel (tap-
    #             accumulated K-steps) to avoid the k^2-inflated HBM intermediate; the stride-2
    #             spatial gather is not expressible with a plain BlockSpec, so it stays in JAX.
    B, H, W, C = x_nhwc.shape
    xp = jnp.pad(x_nhwc, ((0, 0), (pad, pad), (pad, pad), (0, 0)))
    Ho = (H + 2 * pad - k) // stride + 1
    Wo = (W + 2 * pad - k) // stride + 1
    cols = []
    for dy in range(k):
        for dx in range(k):
            cols.append(xp[:, dy:dy + Ho * stride:stride, dx:dx + Wo * stride:stride, :])
    patches = jnp.stack(cols, axis=3)                 # (B, Ho, Wo, k*k, C)
    return patches.reshape(B, Ho * Wo, k * k * C), Ho, Wo


def space_to_depth(x_nhwc, r):
    """Non-overlapping r x r patchify (SR conv input): (B, H, W, C) -> (B, Hs*Ws, r*r*C)."""
    B, H, W, C = x_nhwc.shape
    Hs, Ws = H // r, W // r
    x = x_nhwc.reshape(B, Hs, r, Ws, r, C)
    x = jnp.transpose(x, (0, 1, 3, 2, 4, 5))          # (B, Hs, Ws, r, r, C) -> (dy, dx, C) order
    return x.reshape(B, Hs * Ws, r * r * C), Hs, Ws


def block_forward(x2d, bp, B, H, W, num_heads, sr):
    """SegFormer block on a (B*N, C) slab: x = x + Attn(LN1(x)); x = x + MixFFN(LN2(x))."""
    N = H * W
    C = x2d.shape[-1]
    dh = C // num_heads
    scale = float(dh) ** -0.5
    # Fold the attention scale into the q projection (free inside the kernels).
    q_w = (bp["q_w"] * scale).astype(bp["q_w"].dtype)
    q_b = (bp["q_b"] * scale).astype(bp["q_b"].dtype)

    # ---- efficient self-attention (spatial-reduction ratio `sr`) ----
    if sr > 1:
        # LN1 has two consumers (q and SR path): materialize it once.
        xn = layernorm(x2d, bp["ln1_g"], bp["ln1_b"])
        q = fused_linear(xn, q_w, q_b)
        cols, Hs, Ws = space_to_depth(xn.reshape(B, H, W, C), sr)
        Nk = Hs * Ws
        xr = fused_linear(cols.reshape(B * Nk, sr * sr * C), bp["sr_w"], bp["sr_b"])
        kv = fused_linear(xr, bp["kv_w"], bp["kv_b"],
                          ln=(bp["sr_ln_g"], bp["sr_ln_b"]))            # sr_ln fused as prologue
    else:
        # LN1 fused directly into both consumers (recompute is cheaper than a materialized pass).
        Nk = N
        q = fused_linear(x2d, q_w, q_b, ln=(bp["ln1_g"], bp["ln1_b"]))
        kv = fused_linear(x2d, bp["kv_w"], bp["kv_b"], ln=(bp["ln1_g"], bp["ln1_b"]))

    o = attention_core(q.reshape(B, N, C), kv.reshape(B, Nk, 2 * C), num_heads)
    x2d = fused_linear(o.reshape(B * N, C), bp["proj_w"], bp["proj_b"],
                       residual=x2d)                                     # residual fused

    # ---- Mix-FFN: fc1 -> DWConv3x3 (+bias+GELU fused) -> fc2 ----
    h = fused_linear(x2d, bp["fc1_w"], bp["fc1_b"],
                     ln=(bp["ln2_g"], bp["ln2_b"]))                      # ln2 fused as prologue
    hid = h.shape[-1]
    h = dwconv3x3(h.reshape(B, H, W, hid), bp["dw_w"], bp["dw_b"],
                  fuse_gelu=_FUSE_GELU_IN_DWCONV).reshape(B * N, hid)
    if not _FUSE_GELU_IN_DWCONV:
        h = jax.nn.gelu(h, approximate=False)    # fallback only if erf doesn't lower in Mosaic
    x2d = fused_linear(h, bp["fc2_w"], bp["fc2_b"], residual=x2d)        # residual fused
    return x2d


def mix_transformer_stage_forward(x_nchw, params, *, num_heads, sr_ratio,
                                  patch_k=3, patch_stride=2, patch_pad=1):
    """Forward of one MiT stage. Input NCHW, output NCHW (b c h' w')."""
    B = x_nchw.shape[0]
    dim = params["pe_w"].shape[1]

    # OverlapPatchEmbed: Conv2d(k, stride, pad) via im2col + tiled matmul, then LayerNorm.
    x_nhwc = jnp.transpose(x_nchw, (0, 2, 3, 1))
    cols, Hp, Wp = im2col(x_nhwc, patch_k, patch_stride, patch_pad)
    N = Hp * Wp
    x = fused_linear(cols.reshape(B * N, -1), params["pe_w"], params["pe_b"])
    x = layernorm(x, params["pe_ln_g"], params["pe_ln_b"])

    for bp in params["blocks"]:
        x = block_forward(x, bp, B, Hp, Wp, num_heads, sr_ratio)

    x = layernorm(x, params["norm_g"], params["norm_b"])
    # rearrange 'b (h w) c -> b c h w'
    x = x.reshape(B, Hp, Wp, dim)
    return jnp.transpose(x, (0, 3, 1, 2))


# ------------------------------------------------------------------ params

def _w(key, shape):
    return 0.02 * jax.random.normal(key, shape, jnp.float32)


def init_params(key, in_chans, dim, sr, mlp_ratio, depth, patch_k=3):
    hidden = dim * mlp_ratio
    keys = iter(jax.random.split(key, 8 * depth + 8))
    p = {
        # Conv weights pre-flattened with (dy, dx, cin) minor-to-major == torch
        # (cout,cin,kh,kw).permute(2,3,1,0).reshape(-1, cout).  Same convention for pe_w and sr_w.
        "pe_w": _w(next(keys), (patch_k * patch_k * in_chans, dim)),
        "pe_b": jnp.zeros((dim,), jnp.float32),
        "pe_ln_g": jnp.ones((dim,), jnp.float32),
        "pe_ln_b": jnp.zeros((dim,), jnp.float32),
        "norm_g": jnp.ones((dim,), jnp.float32),
        "norm_b": jnp.zeros((dim,), jnp.float32),
        "blocks": [],
    }
    for _ in range(depth):
        p["blocks"].append({
            "ln1_g": jnp.ones((dim,), jnp.float32), "ln1_b": jnp.zeros((dim,), jnp.float32),
            "q_w": _w(next(keys), (dim, dim)), "q_b": jnp.zeros((dim,), jnp.float32),
            "sr_w": _w(next(keys), (sr * sr * dim, dim)), "sr_b": jnp.zeros((dim,), jnp.float32),
            "sr_ln_g": jnp.ones((dim,), jnp.float32), "sr_ln_b": jnp.zeros((dim,), jnp.float32),
            "kv_w": _w(next(keys), (dim, 2 * dim)), "kv_b": jnp.zeros((2 * dim,), jnp.float32),
            "proj_w": _w(next(keys), (dim, dim)), "proj_b": jnp.zeros((dim,), jnp.float32),
            "ln2_g": jnp.ones((dim,), jnp.float32), "ln2_b": jnp.zeros((dim,), jnp.float32),
            "fc1_w": _w(next(keys), (dim, hidden)), "fc1_b": jnp.zeros((hidden,), jnp.float32),
            "dw_w": _w(next(keys), (3, 3, hidden)), "dw_b": jnp.zeros((hidden,), jnp.float32),
            "fc2_w": _w(next(keys), (hidden, dim)), "fc2_b": jnp.zeros((dim,), jnp.float32),
        })
    return p


# ------------------------------------------------------------------ main

if __name__ == "__main__":
    key = jax.random.PRNGKey(0)
    k_param, k_x = jax.random.split(key)

    # Small stage config: in_chans=4, embed_dim=32, 2 heads, sr_ratio=2, mlp_ratio=2, depth=2,
    # overlap patch embed: kernel 3 / stride 2 / pad 1 (16x16 -> 8x8 tokens).
    B, Cin, H, W = 2, 4, 16, 16
    dim, num_heads, sr_ratio, mlp_ratio, depth = 32, 2, 2, 2, 2

    params = init_params(k_param, Cin, dim, sr_ratio, mlp_ratio, depth, patch_k=3)
    x = jax.random.normal(k_x, (B, Cin, H, W), jnp.float32)   # NCHW, like PyTorch

    fwd = jax.jit(functools.partial(
        mix_transformer_stage_forward, num_heads=num_heads, sr_ratio=sr_ratio,
        patch_k=3, patch_stride=2, patch_pad=1))
    y = fwd(x, params)
    jax.block_until_ready(y)

    assert y.shape == (B, dim, H // 2, W // 2), y.shape
    assert jnp.all(jnp.isfinite(y))
    print("KERNEL_OK")
</pallas_src>

<mosaic_0001>
module attributes {stable_mosaic.version = 11 : i64} {
  func.func @_k(%arg0: memref<8x128xf32, #tpu.memory_space<vmem>>, %arg1: memref<8x128xf32, #tpu.memory_space<vmem>>) attributes {dimension_semantics = [], scalar_prefetch = 0 : i64, scratch_operands = 0 : i64, tpu.core_type = #tpu.core_type<tc>} {
    %c0 = arith.constant 0 : index
    %c0_0 = arith.constant 0 : index
    %0 = vector.load %arg0[%c0, %c0_0] : memref<8x128xf32, #tpu.memory_space<vmem>>, vector<8x128xf32>
    %1 = math.erf %0 : vector<8x128xf32>
    %c0_1 = arith.constant 0 : index
    %c0_2 = arith.constant 0 : index
    %2 = vector.load %arg1[%c0_1, %c0_2] : memref<8x128xf32, #tpu.memory_space<vmem>>, vector<8x128xf32>
    tpu.vector_store %arg1[%c0_1, %c0_2], %1 {strides = array<i32>} : memref<8x128xf32, #tpu.memory_space<vmem>>, vector<8x128xf32>,
    return
  }
}

module attributes {stable_mosaic.version = 11 : i64} {
  func.func @_layernorm_kernel(%arg0: i32, %arg1: memref<128x32xf32, #tpu.memory_space<vmem>>, %arg2: memref<1x32xf32, #tpu.memory_space<vmem>>, %arg3: memref<1x32xf32, #tpu.memory_space<vmem>>, %arg4: memref<128x32xf32, #tpu.memory_space<vmem>>) attributes {dimension_semantics = [#tpu.dimension_semantics<parallel>], iteration_bounds = array<i64: 1>, scalar_prefetch = 0 : i64, scratch_operands = 0 : i64, tpu.core_type = #tpu.core_type<tc>, window_params = [{transform_indices = @transform_0, window_bounds = array<i64: 128, 32>}, {pipeline_mode = #tpu.pipeline_mode<synchronous>, transform_indices = @transform_1, window_bounds = array<i64: 1, 32>}, {pipeline_mode = #tpu.pipeline_mode<synchronous>, transform_indices = @transform_2, window_bounds = array<i64: 1, 32>}, {transform_indices = @transform_3, window_bounds = array<i64: 128, 32>}]} {
    %c0 = arith.constant 0 : index
    %c0_0 = arith.constant 0 : index
    %0 = vector.load %arg1[%c0, %c0_0] : memref<128x32xf32, #tpu.memory_space<vmem>>, vector<128x32xf32>
    %cst = arith.constant dense<0.000000e+00> : vector<128xf32>
    %1 = vector.multi_reduction <add>, %0, %cst [1] : vector<128x32xf32> to vector<128xf32>
    %2 = vector.shape_cast %1 : vector<128xf32> to vector<128x1xf32>
    %cst_1 = arith.constant 3.200000e+01 : f32
    %3 = vector.broadcast %cst_1 : f32 to vector<128x1xf32>
    %4 = arith.divf %2, %3 : vector<128x1xf32>
    %5 = vector.broadcast %4 : vector<128x1xf32> to vector<128x32xf32>
    %6 = arith.subf %0, %5 : vector<128x32xf32>
    %7 = arith.mulf %6, %6 : vector<128x32xf32>
    %cst_2 = arith.constant dense<0.000000e+00> : vector<128xf32>
    %8 = vector.multi_reduction <add>, %7, %cst_2 [1] : vector<128x32xf32> to vector<128xf32>
    %9 = vector.shape_cast %8 : vector<128xf32> to vector<128x1xf32>
    %cst_3 = arith.constant 3.200000e+01 : f32
    %10 = vector.broadcast %cst_3 : f32 to vector<128x1xf32>
    %11 = arith.divf %9, %10 : vector<128x1xf32>
    %12 = vector.broadcast %4 : vector<128x1xf32> to vector<128x32xf32>
    %13 = arith.subf %0, %12 : vector<128x32xf32>
    %cst_4 = arith.constant 9.99999997E-7 : f32
    %14 = vector.broadcast %cst_4 : f32 to vector<128x1xf32>
    %15 = arith.addf %11, %14 : vector<128x1xf32>
    %16 = math.rsqrt %15 : vector<128x1xf32>
    %17 = vector.broadcast %16 : vector<128x1xf32> to vector<128x32xf32>
    %18 = arith.mulf %13, %17 : vector<128x32xf32>
    %c0_5 = arith.constant 0 : index
    %c0_6 = arith.constant 0 : index
    %19 = vector.load %arg2[%c0_5, %c0_6] : memref<1x32xf32, #tpu.memory_space<vmem>>, vector<1x32xf32>
    %20 = vector.broadcast %19 : vector<1x32xf32> to vector<128x32xf32>
    %21 = arith.mulf %18, %20 : vector<128x32xf32>
    %c0_7 = arith.constant 0 : index
    %c0_8 = arith.constant 0 : index
    %22 = vector.load %arg3[%c0_7, %c0_8] : memref<1x32xf32, #tpu.memory_space<vmem>>, vector<1x32xf32>
    %23 = vector.broadcast %22 : vector<1x32xf32> to vector<128x32xf32>
    %24 = arith.addf %21, %23 : vector<128x32xf32>
    %c0_9 = arith.constant 0 : index
    %c0_10 = arith.constant 0 : index
    %25 = vector.load %arg4[%c0_9, %c0_10] : memref<128x32xf32, #tpu.memory_space<vmem>>, vector<128x32xf32>
    tpu.vector_store %arg4[%c0_9, %c0_10], %24 {strides = array<i32>} : memref<128x32xf32, #tpu.memory_space<vmem>>, vector<128x32xf32>,
    return
  }
  func.func @transform_0(%arg0: i32) -> (i32, i32) {
    %c0_i32 = arith.constant 0 : i32
    %c0_i32_0 = arith.constant 0 : i32
    return %arg0, %c0_i32 : i32, i32
  }
  func.func @transform_1(%arg0: i32) -> (i32, i32) {
    %c0_i32 = arith.constant 0 : i32
    %c0_i32_0 = arith.constant 0 : i32
    %c0_i32_1 = arith.constant 0 : i32
    return %c0_i32, %c0_i32_0 : i32, i32
  }
  func.func @transform_2(%arg0: i32) -> (i32, i32) {
    %c0_i32 = arith.constant 0 : i32
    %c0_i32_0 = arith.constant 0 : i32
    %c0_i32_1 = arith.constant 0 : i32
    return %c0_i32, %c0_i32_0 : i32, i32
  }
  func.func @transform_3(%arg0: i32) -> (i32, i32) {
    %c0_i32 = arith.constant 0 : i32
    %c0_i32_0 = arith.constant 0 : i32
    return %arg0, %c0_i32 : i32, i32
  }
}

module attributes {stable_mosaic.version = 11 : i64} {
  func.func @_fused_mm_kernel(%arg0: i32, %arg1: i32, %arg2: i32, %arg3: memref<128x36xf32, #tpu.memory_space<vmem>>, %arg4: memref<36x32xf32, #tpu.memory_space<vmem>>, %arg5: memref<1x32xf32, #tpu.memory_space<vmem>>, %arg6: memref<128x32xf32, #tpu.memory_space<vmem>>) attributes {dimension_semantics = [#tpu.dimension_semantics<parallel>, #tpu.dimension_semantics<parallel>, #tpu.dimension_semantics<arbitrary>], iteration_bounds = array<i64: 1, 1, 1>, scalar_prefetch = 0 : i64, scratch_operands = 0 : i64, tpu.core_type = #tpu.core_type<tc>, window_params = [{transform_indices = @transform_0, window_bounds = array<i64: 128, 36>}, {transform_indices = @transform_1, window_bounds = array<i64: 36, 32>}, {transform_indices = @transform_2, window_bounds = array<i64: 1, 32>}, {transform_indices = @transform_3, window_bounds = array<i64: 128, 32>}]} {
    %c0 = arith.constant 0 : index
    %c0_0 = arith.constant 0 : index
    %0 = vector.load %arg3[%c0, %c0_0] : memref<128x36xf32, #tpu.memory_space<vmem>>, vector<128x36xf32>
    %c0_1 = arith.constant 0 : index
    %c0_2 = arith.constant 0 : index
    %1 = vector.load %arg4[%c0_1, %c0_2] : memref<36x32xf32, #tpu.memory_space<vmem>>, vector<36x32xf32>
    %cst = arith.constant dense<0.000000e+00> : vector<128x32xf32>
    %2 = tpu.matmul %0, %1, %cst {dimension_numbers = #tpu.dot_dimension_numbers<[1], [0], [0], [1], [0, 0, 1, 1], [], []>} : vector<128x36xf32>, vector<36x32xf32>, vector<128x32xf32> -> vector<128x32xf32>
    %c0_3 = arith.constant 0 : index
    %c0_4 = arith.constant 0 : index
    %3 = vector.load %arg5[%c0_3, %c0_4] : memref<1x32xf32, #tpu.memory_space<vmem>>, vector<1x32xf32>
    %4 = vector.broadcast %3 : vector<1x32xf32> to vector<128x32xf32>
    %5 = arith.addf %2, %4 : vector<128x32xf32>
    %c0_5 = arith.constant 0 : index
    %c0_6 = arith.constant 0 : index
    %6 = vector.load %arg6[%c0_5, %c0_6] : memref<128x32xf32, #tpu.memory_space<vmem>>, vector<128x32xf32>
    tpu.vector_store %arg6[%c0_5, %c0_6], %5 {strides = array<i32>} : memref<128x32xf32, #tpu.memory_space<vmem>>, vector<128x32xf32>,
    return
  }
  func.func @transform_0(%arg0: i32, %arg1: i32, %arg2: i32) -> (i32, i32) {
    %c0_i32 = arith.constant 0 : i32
    return %arg0, %arg2 : i32, i32
  }
  func.func @transform_1(%arg0: i32, %arg1: i32, %arg2: i32) -> (i32, i32) {
    %c0_i32 = arith.constant 0 : i32
    return %arg2, %arg1 : i32, i32
  }
  func.func @transform_2(%arg0: i32, %arg1: i32, %arg2: i32) -> (i32, i32) {
    %c0_i32 = arith.constant 0 : i32
    %c0_i32_0 = arith.constant 0 : i32
    return %c0_i32, %arg1 : i32, i32
  }
  func.func @transform_3(%arg0: i32, %arg1: i32, %arg2: i32) -> (i32, i32) {
    %c0_i32 = arith.constant 0 : i32
    return %arg0, %arg1 : i32, i32
  }
}

module attributes {stable_mosaic.version = 11 : i64} {
  func.func @_fused_mm_kernel(%arg0: i32, %arg1: i32, %arg2: i32, %arg3: memref<32x128xf32, #tpu.memory_space<vmem>>, %arg4: memref<128x32xf32, #tpu.memory_space<vmem>>, %arg5: memref<1x32xf32, #tpu.memory_space<vmem>>, %arg6: memref<32x32xf32, #tpu.memory_space<vmem>>) attributes {dimension_semantics = [#tpu.dimension_semantics<parallel>, #tpu.dimension_semantics<parallel>, #tpu.dimension_semantics<arbitrary>], iteration_bounds = array<i64: 1, 1, 1>, scalar_prefetch = 0 : i64, scratch_operands = 0 : i64, tpu.core_type = #tpu.core_type<tc>, window_params = [{transform_indices = @transform_0, window_bounds = array<i64: 32, 128>}, {transform_indices = @transform_1, window_bounds = array<i64: 128, 32>}, {transform_indices = @transform_2, window_bounds = array<i64: 1, 32>}, {transform_indices = @transform_3, window_bounds = array<i64: 32, 32>}]} {
    %c0 = arith.constant 0 : index
    %c0_0 = arith.constant 0 : index
    %0 = vector.load %arg3[%c0, %c0_0] : memref<32x128xf32, #tpu.memory_space<vmem>>, vector<32x128xf32>
    %c0_1 = arith.constant 0 : index
    %c0_2 = arith.constant 0 : index
    %1 = vector.load %arg4[%c0_1, %c0_2] : memref<128x32xf32, #tpu.memory_space<vmem>>, vector<128x32xf32>
    %cst = arith.constant dense<0.000000e+00> : vector<32x32xf32>
    %2 = tpu.matmul %0, %1, %cst {dimension_numbers = #tpu.dot_dimension_numbers<[1], [0], [0], [1], [0, 0, 1, 1], [], []>} : vector<32x128xf32>, vector<128x32xf32>, vector<32x32xf32> -> vector<32x32xf32>
    %c0_3 = arith.constant 0 : index
    %c0_4 = arith.constant 0 : index
    %3 = vector.load %arg5[%c0_3, %c0_4] : memref<1x32xf32, #tpu.memory_space<vmem>>, vector<1x32xf32>
    %4 = vector.broadcast %3 : vector<1x32xf32> to vector<32x32xf32>
    %5 = arith.addf %2, %4 : vector<32x32xf32>
    %c0_5 = arith.constant 0 : index
    %c0_6 = arith.constant 0 : index
    %6 = vector.load %arg6[%c0_5, %c0_6] : memref<32x32xf32, #tpu.memory_space<vmem>>, vector<32x32xf32>
    tpu.vector_store %arg6[%c0_5, %c0_6], %5 {strides = array<i32>} : memref<32x32xf32, #tpu.memory_space<vmem>>, vector<32x32xf32>,
    return
  }
  func.func @transform_0(%arg0: i32, %arg1: i32, %arg2: i32) -> (i32, i32) {
    %c0_i32 = arith.constant 0 : i32
    return %arg0, %arg2 : i32, i32
  }
  func.func @transform_1(%arg0: i32, %arg1: i32, %arg2: i32) -> (i32, i32) {
    %c0_i32 = arith.constant 0 : i32
    return %arg2, %arg1 : i32, i32
  }
  func.func @transform_2(%arg0: i32, %arg1: i32, %arg2: i32) -> (i32, i32) {
    %c0_i32 = arith.constant 0 : i32
    %c0_i32_0 = arith.constant 0 : i32
    return %c0_i32, %arg1 : i32, i32
  }
  func.func @transform_3(%arg0: i32, %arg1: i32, %arg2: i32) -> (i32, i32) {
    %c0_i32 = arith.constant 0 : i32
    return %arg0, %arg1 : i32, i32
  }
}

module attributes {stable_mosaic.version = 11 : i64} {
  func.func @_fused_mm_kernel(%arg0: i32, %arg1: i32, %arg2: i32, %arg3: memref<32x32xf32, #tpu.memory_space<vmem>>, %arg4: memref<32x64xf32, #tpu.memory_space<vmem>>, %arg5: memref<1x64xf32, #tpu.memory_space<vmem>>, %arg6: memref<1x32xf32, #tpu.memory_space<vmem>>, %arg7: memref<1x32xf32, #tpu.memory_space<vmem>>, %arg8: memref<32x64xf32, #tpu.memory_space<vmem>>) attributes {dimension_semantics = [#tpu.dimension_semantics<parallel>, #tpu.dimension_semantics<parallel>, #tpu.dimension_semantics<arbitrary>], iteration_bounds = array<i64: 1, 1, 1>, scalar_prefetch = 0 : i64, scratch_operands = 0 : i64, tpu.core_type = #tpu.core_type<tc>, window_params = [{transform_indices = @transform_0, window_bounds = array<i64: 32, 32>}, {transform_indices = @transform_1, window_bounds = array<i64: 32, 64>}, {transform_indices = @transform_2, window_bounds = array<i64: 1, 64>}, {transform_indices = @transform_3, window_bounds = array<i64: 1, 32>}, {transform_indices = @transform_4, window_bounds = array<i64: 1, 32>}, {transform_indices = @transform_5, window_bounds = array<i64: 32, 64>}]} {
    %c0 = arith.constant 0 : index
    %c0_0 = arith.constant 0 : index
    %0 = vector.load %arg3[%c0, %c0_0] : memref<32x32xf32, #tpu.memory_space<vmem>>, vector<32x32xf32>
    %cst = arith.constant dense<0.000000e+00> : vector<32xf32>
    %1 = vector.multi_reduction <add>, %0, %cst [1] : vector<32x32xf32> to vector<32xf32>
    %2 = vector.shape_cast %1 : vector<32xf32> to vector<32x1xf32>
    %cst_1 = arith.constant 3.200000e+01 : f32
    %3 = vector.broadcast %cst_1 : f32 to vector<32x1xf32>
    %4 = arith.divf %2, %3 : vector<32x1xf32>
    %5 = vector.broadcast %4 : vector<32x1xf32> to vector<32x32xf32>
    %6 = arith.subf %0, %5 : vector<32x32xf32>
    %7 = arith.mulf %6, %6 : vector<32x32xf32>
    %cst_2 = arith.constant dense<0.000000e+00> : vector<32xf32>
    %8 = vector.multi_reduction <add>, %7, %cst_2 [1] : vector<32x32xf32> to vector<32xf32>
    %9 = vector.shape_cast %8 : vector<32xf32> to vector<32x1xf32>
    %cst_3 = arith.constant 3.200000e+01 : f32
    %10 = vector.broadcast %cst_3 : f32 to vector<32x1xf32>
    %11 = arith.divf %9, %10 : vector<32x1xf32>
    %12 = vector.broadcast %4 : vector<32x1xf32> to vector<32x32xf32>
    %13 = arith.subf %0, %12 : vector<32x32xf32>
    %cst_4 = arith.constant 9.99999997E-7 : f32
    %14 = vector.broadcast %cst_4 : f32 to vector<32x1xf32>
    %15 = arith.addf %11, %14 : vector<32x1xf32>
    %16 = math.rsqrt %15 : vector<32x1xf32>
    %17 = vector.broadcast %16 : vector<32x1xf32> to vector<32x32xf32>
    %18 = arith.mulf %13, %17 : vector<32x32xf32>
    %c0_5 = arith.constant 0 : index
    %c0_6 = arith.constant 0 : index
    %19 = vector.load %arg6[%c0_5, %c0_6] : memref<1x32xf32, #tpu.memory_space<vmem>>, vector<1x32xf32>
    %20 = vector.broadcast %19 : vector<1x32xf32> to vector<32x32xf32>
    %21 = arith.mulf %18, %20 : vector<32x32xf32>
    %c0_7 = arith.constant 0 : index
    %c0_8 = arith.constant 0 : index
    %22 = vector.load %arg7[%c0_7, %c0_8] : memref<1x32xf32, #tpu.memory_space<vmem>>, vector<1x32xf32>
    %23 = vector.broadcast %22 : vector<1x32xf32> to vector<32x32xf32>
    %24 = arith.addf %21, %23 : vector<32x32xf32>
    %c0_9 = arith.constant 0 : index
    %c0_10 = arith.constant 0 : index
    %25 = vector.load %arg4[%c0_9, %c0_10] : memref<32x64xf32, #tpu.memory_space<vmem>>, vector<32x64xf32>
    %cst_11 = arith.constant dense<0.000000e+00> : vector<32x64xf32>
    %26 = tpu.matmul %24, %25, %cst_11 {dimension_numbers = #tpu.dot_dimension_numbers<[1], [0], [0], [1], [0, 0, 1, 1], [], []>} : vector<32x32xf32>, vector<32x64xf32>, vector<32x64xf32> -> vector<32x64xf32>
    %c0_12 = arith.constant 0 : index
    %c0_13 = arith.constant 0 : index
    %27 = vector.load %arg5[%c0_12, %c0_13] : memref<1x64xf32, #tpu.memory_space<vmem>>, vector<1x64xf32>
    %28 = vector.broadcast %27 : vector<1x64xf32> to vector<32x64xf32>
    %29 = arith.addf %26, %28 : vector<32x64xf32>
    %c0_14 = arith.constant 0 : index
    %c0_15 = arith.constant 0 : index
    %30 = vector.load %arg8[%c0_14, %c0_15] : memref<32x64xf32, #tpu.memory_space<vmem>>, vector<32x64xf32>
    tpu.vector_store %arg8[%c0_14, %c0_15], %29 {strides = array<i32>} : memref<32x64xf32, #tpu.memory_space<vmem>>, vector<32x64xf32>,
    return
  }
  func.func @transform_0(%arg0: i32, %arg1: i32, %arg2: i32) -> (i32, i32) {
    %c0_i32 = arith.constant 0 : i32
    return %arg0, %arg2 : i32, i32
  }
  func.func @transform_1(%arg0: i32, %arg1: i32, %arg2: i32) -> (i32, i32) {
    %c0_i32 = arith.constant 0 : i32
    return %arg2, %arg1 : i32, i32
  }
  func.func @transform_2(%arg0: i32, %arg1: i32, %arg2: i32) -> (i32, i32) {
    %c0_i32 = arith.constant 0 : i32
    %c0_i32_0 = arith.constant 0 : i32
    return %c0_i32, %arg1 : i32, i32
  }
  func.func @transform_3(%arg0: i32, %arg1: i32, %arg2: i32) -> (i32, i32) {
    %c0_i32 = arith.constant 0 : i32
    %c0_i32_0 = arith.constant 0 : i32
    return %c0_i32, %arg2 : i32, i32
  }
  func.func @transform_4(%arg0: i32, %arg1: i32, %arg2: i32) -> (i32, i32) {
    %c0_i32 = arith.constant 0 : i32
    %c0_i32_0 = arith.constant 0 : i32
    return %c0_i32, %arg2 : i32, i32
  }
  func.func @transform_5(%arg0: i32, %arg1: i32, %arg2: i32) -> (i32, i32) {
    %c0_i32 = arith.constant 0 : i32
    return %arg0, %arg1 : i32, i32
  }
}

module attributes {stable_mosaic.version = 11 : i64} {
  func.func @_fused_mm_kernel(%arg0: i32, %arg1: i32, %arg2: i32, %arg3: memref<128x32xf32, #tpu.memory_space<vmem>>, %arg4: memref<32x32xf32, #tpu.memory_space<vmem>>, %arg5: memref<1x32xf32, #tpu.memory_space<vmem>>, %arg6: memref<128x32xf32, #tpu.memory_space<vmem>>) attributes {dimension_semantics = [#tpu.dimension_semantics<parallel>, #tpu.dimension_semantics<parallel>, #tpu.dimension_semantics<arbitrary>], iteration_bounds = array<i64: 1, 1, 1>, scalar_prefetch = 0 : i64, scratch_operands = 0 : i64, tpu.core_type = #tpu.core_type<tc>, window_params = [{transform_indices = @transform_0, window_bounds = array<i64: 128, 32>}, {transform_indices = @transform_1, window_bounds = array<i64: 32, 32>}, {transform_indices = @transform_2, window_bounds = array<i64: 1, 32>}, {transform_indices = @transform_3, window_bounds = array<i64: 128, 32>}]} {
    %c0 = arith.constant 0 : index
    %c0_0 = arith.constant 0 : index
    %0 = vector.load %arg3[%c0, %c0_0] : memref<128x32xf32, #tpu.memory_space<vmem>>, vector<128x32xf32>
    %c0_1 = arith.constant 0 : index
    %c0_2 = arith.constant 0 : index
    %1 = vector.load %arg4[%c0_1, %c0_2] : memref<32x32xf32, #tpu.memory_space<vmem>>, vector<32x32xf32>
    %cst = arith.constant dense<0.000000e+00> : vector<128x32xf32>
    %2 = tpu.matmul %0, %1, %cst {dimension_numbers = #tpu.dot_dimension_numbers<[1], [0], [0], [1], [0, 0, 1, 1], [], []>} : vector<128x32xf32>, vector<32x32xf32>, vector<128x32xf32> -> vector<128x32xf32>
    %c0_3 = arith.constant 0 : index
    %c0_4 = arith.constant 0 : index
    %3 = vector.load %arg5[%c0_3, %c0_4] : memref<1x32xf32, #tpu.memory_space<vmem>>, vector<1x32xf32>
    %4 = vector.broadcast %3 : vector<1x32xf32> to vector<128x32xf32>
    %5 = arith.addf %2, %4 : vector<128x32xf32>
    %c0_5 = arith.constant 0 : index
    %c0_6 = arith.constant 0 : index
    %6 = vector.load %arg6[%c0_5, %c0_6] : memref<128x32xf32, #tpu.memory_space<vmem>>, vector<128x32xf32>
    tpu.vector_store %arg6[%c0_5, %c0_6], %5 {strides = array<i32>} : memref<128x32xf32, #tpu.memory_space<vmem>>, vector<128x32xf32>,
    return
  }
  func.func @transform_0(%arg0: i32, %arg1: i32, %arg2: i32) -> (i32, i32) {
    %c0_i32 = arith.constant 0 : i32
    return %arg0, %arg2 : i32, i32
  }
  func.func @transform_1(%arg0: i32, %arg1: i32, %arg2: i32) -> (i32, i32) {
    %c0_i32 = arith.constant 0 : i32
    return %arg2, %arg1 : i32, i32
  }
  func.func @transform_2(%arg0: i32, %arg1: i32, %arg2: i32) -> (i32, i32) {
    %c0_i32 = arith.constant 0 : i32
    %c0_i32_0 = arith.constant 0 : i32
    return %c0_i32, %arg1 : i32, i32
  }
  func.func @transform_3(%arg0: i32, %arg1: i32, %arg2: i32) -> (i32, i32) {
    %c0_i32 = arith.constant 0 : i32
    return %arg0, %arg1 : i32, i32
  }
}

module attributes {stable_mosaic.version = 11 : i64} {
  func.func @_fused_mm_kernel(%arg0: i32, %arg1: i32, %arg2: i32, %arg3: memref<128x32xf32, #tpu.memory_space<vmem>>, %arg4: memref<32x32xf32, #tpu.memory_space<vmem>>, %arg5: memref<1x32xf32, #tpu.memory_space<vmem>>, %arg6: memref<128x32xf32, #tpu.memory_space<vmem>>, %arg7: memref<128x32xf32, #tpu.memory_space<vmem>>) attributes {dimension_semantics = [#tpu.dimension_semantics<parallel>, #tpu.dimension_semantics<parallel>, #tpu.dimension_semantics<arbitrary>], iteration_bounds = array<i64: 1, 1, 1>, scalar_prefetch = 0 : i64, scratch_operands = 0 : i64, tpu.core_type = #tpu.core_type<tc>, window_params = [{transform_indices = @transform_0, window_bounds = array<i64: 128, 32>}, {transform_indices = @transform_1, window_bounds = array<i64: 32, 32>}, {transform_indices = @transform_2, window_bounds = array<i64: 1, 32>}, {transform_indices = @transform_3, window_bounds = array<i64: 128, 32>}, {transform_indices = @transform_4, window_bounds = array<i64: 128, 32>}]} {
    %c0 = arith.constant 0 : index
    %c0_0 = arith.constant 0 : index
    %0 = vector.load %arg3[%c0, %c0_0] : memref<128x32xf32, #tpu.memory_space<vmem>>, vector<128x32xf32>
    %c0_1 = arith.constant 0 : index
    %c0_2 = arith.constant 0 : index
    %1 = vector.load %arg4[%c0_1, %c0_2] : memref<32x32xf32, #tpu.memory_space<vmem>>, vector<32x32xf32>
    %cst = arith.constant dense<0.000000e+00> : vector<128x32xf32>
    %2 = tpu.matmul %0, %1, %cst {dimension_numbers = #tpu.dot_dimension_numbers<[1], [0], [0], [1], [0, 0, 1, 1], [], []>} : vector<128x32xf32>, vector<32x32xf32>, vector<128x32xf32> -> vector<128x32xf32>
    %c0_3 = arith.constant 0 : index
    %c0_4 = arith.constant 0 : index
    %3 = vector.load %arg5[%c0_3, %c0_4] : memref<1x32xf32, #tpu.memory_space<vmem>>, vector<1x32xf32>
    %4 = vector.broadcast %3 : vector<1x32xf32> to vector<128x32xf32>
    %5 = arith.addf %2, %4 : vector<128x32xf32>
    %c0_5 = arith.constant 0 : index
    %c0_6 = arith.constant 0 : index
    %6 = vector.load %arg6[%c0_5, %c0_6] : memref<128x32xf32, #tpu.memory_space<vmem>>, vector<128x32xf32>
    %7 = arith.addf %5, %6 : vector<128x32xf32>
    %c0_7 = arith.constant 0 : index
    %c0_8 = arith.constant 0 : index
    %8 = vector.load %arg7[%c0_7, %c0_8] : memref<128x32xf32, #tpu.memory_space<vmem>>, vector<128x32xf32>
    tpu.vector_store %arg7[%c0_7, %c0_8], %7 {strides = array<i32>} : memref<128x32xf32, #tpu.memory_space<vmem>>, vector<128x32xf32>,
    return
  }
  func.func @transform_0(%arg0: i32, %arg1: i32, %arg2: i32) -> (i32, i32) {
    %c0_i32 = arith.constant 0 : i32
    return %arg0, %arg2 : i32, i32
  }
  func.func @transform_1(%arg0: i32, %arg1: i32, %arg2: i32) -> (i32, i32) {
    %c0_i32 = arith.constant 0 : i32
    return %arg2, %arg1 : i32, i32
  }
  func.func @transform_2(%arg0: i32, %arg1: i32, %arg2: i32) -> (i32, i32) {
    %c0_i32 = arith.constant 0 : i32
    %c0_i32_0 = arith.constant 0 : i32
    return %c0_i32, %arg1 : i32, i32
  }
  func.func @transform_3(%arg0: i32, %arg1: i32, %arg2: i32) -> (i32, i32) {
    %c0_i32 = arith.constant 0 : i32
    return %arg0, %arg1 : i32, i32
  }
  func.func @transform_4(%arg0: i32, %arg1: i32, %arg2: i32) -> (i32, i32) {
    %c0_i32 = arith.constant 0 : i32
    return %arg0, %arg1 : i32, i32
  }
}

module attributes {stable_mosaic.version = 11 : i64} {
  func.func @_attn_kernel(%arg0: i32, %arg1: i32, %arg2: memref<1x64x32xf32, #tpu.memory_space<vmem>>, %arg3: memref<1x16x64xf32, #tpu.memory_space<vmem>>, %arg4: memref<1x64x32xf32, #tpu.memory_space<vmem>>) attributes {dimension_semantics = [#tpu.dimension_semantics<parallel>, #tpu.dimension_semantics<parallel>], iteration_bounds = array<i64: 2, 1>, scalar_prefetch = 0 : i64, scratch_operands = 0 : i64, tpu.core_type = #tpu.core_type<tc>, window_params = [{transform_indices = @transform_0, window_bounds = array<i64: 1, 64, 32>}, {transform_indices = @transform_1, window_bounds = array<i64: 1, 16, 64>}, {transform_indices = @transform_2, window_bounds = array<i64: 1, 64, 32>}]} {
    %c0 = arith.constant 0 : index
    %c0_0 = arith.constant 0 : index
    %c0_1 = arith.constant 0 : index
    %0 = vector.load %arg2[%c0, %c0_0, %c0_1] : memref<1x64x32xf32, #tpu.memory_space<vmem>>, vector<1x64x32xf32>
    %1 = vector.shape_cast %0 : vector<1x64x32xf32> to vector<64x32xf32>
    %c0_2 = arith.constant 0 : index
    %c0_3 = arith.constant 0 : index
    %c0_4 = arith.constant 0 : index
    %2 = vector.load %arg3[%c0_2, %c0_3, %c0_4] : memref<1x16x64xf32, #tpu.memory_space<vmem>>, vector<1x16x64xf32>
    %3 = vector.shape_cast %2 : vector<1x16x64xf32> to vector<16x64xf32>
    %4 = vector.extract_strided_slice %1 {offsets = [0, 0], sizes = [64, 16], strides = [1, 1]} : vector<64x32xf32> to vector<64x16xf32>
    %5 = vector.extract_strided_slice %3 {offsets = [0, 0], sizes = [16, 16], strides = [1, 1]} : vector<16x64xf32> to vector<16x16xf32>
    %6 = vector.extract_strided_slice %3 {offsets = [0, 32], sizes = [16, 16], strides = [1, 1]} : vector<16x64xf32> to vector<16x16xf32>
    %cst = arith.constant dense<0.000000e+00> : vector<64x16xf32>
    %7 = tpu.matmul %4, %5, %cst {dimension_numbers = #tpu.dot_dimension_numbers<[1], [1], [0], [0], [0, 0, 1, 0], [], []>} : vector<64x16xf32>, vector<16x16xf32>, vector<64x16xf32> -> vector<64x16xf32>
    %cst_5 = arith.constant dense<0xFF800000> : vector<64xf32>
    %8 = vector.multi_reduction <maximumf>, %7, %cst_5 [1] : vector<64x16xf32> to vector<64xf32>
    %9 = vector.shape_cast %8 : vector<64xf32> to vector<64x1xf32>
    %10 = vector.broadcast %9 : vector<64x1xf32> to vector<64x16xf32>
    %11 = arith.subf %7, %10 : vector<64x16xf32>
    %12 = math.exp %11 : vector<64x16xf32>
    %cst_6 = arith.constant dense<0.000000e+00> : vector<64xf32>
    %13 = vector.multi_reduction <add>, %12, %cst_6 [1] : vector<64x16xf32> to vector<64xf32>
    %14 = vector.shape_cast %13 : vector<64xf32> to vector<64x1xf32>
    %15 = tpu.reciprocal %14 {approx = true} : vector<64x1xf32> -> vector<64x1xf32>
    %cst_7 = arith.constant dense<0.000000e+00> : vector<64x16xf32>
    %16 = tpu.matmul %12, %6, %cst_7 {dimension_numbers = #tpu.dot_dimension_numbers<[1], [0], [0], [1], [0, 0, 1, 1], [], []>} : vector<64x16xf32>, vector<16x16xf32>, vector<64x16xf32> -> vector<64x16xf32>
    %17 = vector.broadcast %15 : vector<64x1xf32> to vector<64x16xf32>
    %18 = arith.mulf %16, %17 : vector<64x16xf32>
    %19 = vector.extract_strided_slice %1 {offsets = [0, 16], sizes = [64, 16], strides = [1, 1]} : vector<64x32xf32> to vector<64x16xf32>
    %20 = vector.extract_strided_slice %3 {offsets = [0, 16], sizes = [16, 16], strides = [1, 1]} : vector<16x64xf32> to vector<16x16xf32>
    %21 = vector.extract_strided_slice %3 {offsets = [0, 48], sizes = [16, 16], strides = [1, 1]} : vector<16x64xf32> to vector<16x16xf32>
    %cst_8 = arith.constant dense<0.000000e+00> : vector<64x16xf32>
    %22 = tpu.matmul %19, %20, %cst_8 {dimension_numbers = #tpu.dot_dimension_numbers<[1], [1], [0], [0], [0, 0, 1, 0], [], []>} : vector<64x16xf32>, vector<16x16xf32>, vector<64x16xf32> -> vector<64x16xf32>
    %cst_9 = arith.constant dense<0xFF800000> : vector<64xf32>
    %23 = vector.multi_reduction <maximumf>, %22, %cst_9 [1] : vector<64x16xf32> to vector<64xf32>
    %24 = vector.shape_cast %23 : vector<64xf32> to vector<64x1xf32>
    %25 = vector.broadcast %24 : vector<64x1xf32> to vector<64x16xf32>
    %26 = arith.subf %22, %25 : vector<64x16xf32>
    %27 = math.exp %26 : vector<64x16xf32>
    %cst_10 = arith.constant dense<0.000000e+00> : vector<64xf32>
    %28 = vector.multi_reduction <add>, %27, %cst_10 [1] : vector<64x16xf32> to vector<64xf32>
    %29 = vector.shape_cast %28 : vector<64xf32> to vector<64x1xf32>
    %30 = tpu.reciprocal %29 {approx = true} : vector<64x1xf32> -> vector<64x1xf32>
    %cst_11 = arith.constant dense<0.000000e+00> : vector<64x16xf32>
    %31 = tpu.matmul %27, %21, %cst_11 {dimension_numbers = #tpu.dot_dimension_numbers<[1], [0], [0], [1], [0, 0, 1, 1], [], []>} : vector<64x16xf32>, vector<16x16xf32>, vector<64x16xf32> -> vector<64x16xf32>
    %32 = vector.broadcast %30 : vector<64x1xf32> to vector<64x16xf32>
    %33 = arith.mulf %31, %32 : vector<64x16xf32>
    %34 = tpu.concatenate %18, %33 in 1 : vector<64x16xf32>, vector<64x16xf32> -> vector<64x32xf32>
    %c0_12 = arith.constant 0 : index
    %c0_13 = arith.constant 0 : index
    %c0_14 = arith.constant 0 : index
    %35 = vector.load %arg4[%c0_12, %c0_13, %c0_14] : memref<1x64x32xf32, #tpu.memory_space<vmem>>, vector<1x64x32xf32>
    %36 = vector.shape_cast %35 : vector<1x64x32xf32> to vector<64x32xf32>
    %37 = vector.shape_cast %34 : vector<64x32xf32> to vector<1x64x32xf32>
    tpu.vector_store %arg4[%c0_12, %c0_13, %c0_14], %37 {strides = array<i32>} : memref<1x64x32xf32, #tpu.memory_space<vmem>>, vector<1x64x32xf32>,
    return
  }
  func.func @transform_0(%arg0: i32, %arg1: i32) -> (i32, i32, i32) {
    %c0_i32 = arith.constant 0 : i32
    %c0_i32_0 = arith.constant 0 : i32
    return %arg0, %arg1, %c0_i32 : i32, i32, i32
  }
  func.func @transform_1(%arg0: i32, %arg1: i32) -> (i32, i32, i32) {
    %c0_i32 = arith.constant 0 : i32
    %c0_i32_0 = arith.constant 0 : i32
    %c0_i32_1 = arith.constant 0 : i32
    return %arg0, %c0_i32, %c0_i32_0 : i32, i32, i32
  }
  func.func @transform_2(%arg0: i32, %arg1: i32) -> (i32, i32, i32) {
    %c0_i32 = arith.constant 0 : i32
    %c0_i32_0 = arith.constant 0 : i32
    return %arg0, %arg1, %c0_i32 : i32, i32, i32
  }
}

module attributes {stable_mosaic.version = 11 : i64} {
  func.func @_fused_mm_kernel(%arg0: i32, %arg1: i32, %arg2: i32, %arg3: memref<128x32xf32, #tpu.memory_space<vmem>>, %arg4: memref<32x64xf32, #tpu.memory_space<vmem>>, %arg5: memref<1x64xf32, #tpu.memory_space<vmem>>, %arg6: memref<1x32xf32, #tpu.memory_space<vmem>>, %arg7: memref<1x32xf32, #tpu.memory_space<vmem>>, %arg8: memref<128x64xf32, #tpu.memory_space<vmem>>) attributes {dimension_semantics = [#tpu.dimension_semantics<parallel>, #tpu.dimension_semantics<parallel>, #tpu.dimension_semantics<arbitrary>], iteration_bounds = array<i64: 1, 1, 1>, scalar_prefetch = 0 : i64, scratch_operands = 0 : i64, tpu.core_type = #tpu.core_type<tc>, window_params = [{transform_indices = @transform_0, window_bounds = array<i64: 128, 32>}, {transform_indices = @transform_1, window_bounds = array<i64: 32, 64>}, {transform_indices = @transform_2, window_bounds = array<i64: 1, 64>}, {transform_indices = @transform_3, window_bounds = array<i64: 1, 32>}, {transform_indices = @transform_4, window_bounds = array<i64: 1, 32>}, {transform_indices = @transform_5, window_bounds = array<i64: 128, 64>}]} {
    %c0 = arith.constant 0 : index
    %c0_0 = arith.constant 0 : index
    %0 = vector.load %arg3[%c0, %c0_0] : memref<128x32xf32, #tpu.memory_space<vmem>>, vector<128x32xf32>
    %cst = arith.constant dense<0.000000e+00> : vector<128xf32>
    %1 = vector.multi_reduction <add>, %0, %cst [1] : vector<128x32xf32> to vector<128xf32>
    %2 = vector.shape_cast %1 : vector<128xf32> to vector<128x1xf32>
    %cst_1 = arith.constant 3.200000e+01 : f32
    %3 = vector.broadcast %cst_1 : f32 to vector<128x1xf32>
    %4 = arith.divf %2, %3 : vector<128x1xf32>
    %5 = vector.broadcast %4 : vector<128x1xf32> to vector<128x32xf32>
    %6 = arith.subf %0, %5 : vector<128x32xf32>
    %7 = arith.mulf %6, %6 : vector<128x32xf32>
    %cst_2 = arith.constant dense<0.000000e+00> : vector<128xf32>
    %8 = vector.multi_reduction <add>, %7, %cst_2 [1] : vector<128x32xf32> to vector<128xf32>
    %9 = vector.shape_cast %8 : vector<128xf32> to vector<128x1xf32>
    %cst_3 = arith.constant 3.200000e+01 : f32
    %10 = vector.broadcast %cst_3 : f32 to vector<128x1xf32>
    %11 = arith.divf %9, %10 : vector<128x1xf32>
    %12 = vector.broadcast %4 : vector<128x1xf32> to vector<128x32xf32>
    %13 = arith.subf %0, %12 : vector<128x32xf32>
    %cst_4 = arith.constant 9.99999997E-7 : f32
    %14 = vector.broadcast %cst_4 : f32 to vector<128x1xf32>
    %15 = arith.addf %11, %14 : vector<128x1xf32>
    %16 = math.rsqrt %15 : vector<128x1xf32>
    %17 = vector.broadcast %16 : vector<128x1xf32> to vector<128x32xf32>
    %18 = arith.mulf %13, %17 : vector<128x32xf32>
    %c0_5 = arith.constant 0 : index
    %c0_6 = arith.constant 0 : index
    %19 = vector.load %arg6[%c0_5, %c0_6] : memref<1x32xf32, #tpu.memory_space<vmem>>, vector<1x32xf32>
    %20 = vector.broadcast %19 : vector<1x32xf32> to vector<128x32xf32>
    %21 = arith.mulf %18, %20 : vector<128x32xf32>
    %c0_7 = arith.constant 0 : index
    %c0_8 = arith.constant 0 : index
    %22 = vector.load %arg7[%c0_7, %c0_8] : memref<1x32xf32, #tpu.memory_space<vmem>>, vector<1x32xf32>
    %23 = vector.broadcast %22 : vector<1x32xf32> to vector<128x32xf32>
    %24 = arith.addf %21, %23 : vector<128x32xf32>
    %c0_9 = arith.constant 0 : index
    %c0_10 = arith.constant 0 : index
    %25 = vector.load %arg4[%c0_9, %c0_10] : memref<32x64xf32, #tpu.memory_space<vmem>>, vector<32x64xf32>
    %cst_11 = arith.constant dense<0.000000e+00> : vector<128x64xf32>
    %26 = tpu.matmul %24, %25, %cst_11 {dimension_numbers = #tpu.dot_dimension_numbers<[1], [0], [0], [1], [0, 0, 1, 1], [], []>} : vector<128x32xf32>, vector<32x64xf32>, vector<128x64xf32> -> vector<128x64xf32>
    %c0_12 = arith.constant 0 : index
    %c0_13 = arith.constant 0 : index
    %27 = vector.load %arg5[%c0_12, %c0_13] : memref<1x64xf32, #tpu.memory_space<vmem>>, vector<1x64xf32>
    %28 = vector.broadcast %27 : vector<1x64xf32> to vector<128x64xf32>
    %29 = arith.addf %26, %28 : vector<128x64xf32>
    %c0_14 = arith.constant 0 : index
    %c0_15 = arith.constant 0 : index
    %30 = vector.load %arg8[%c0_14, %c0_15] : memref<128x64xf32, #tpu.memory_space<vmem>>, vector<128x64xf32>
    tpu.vector_store %arg8[%c0_14, %c0_15], %29 {strides = array<i32>} : memref<128x64xf32, #tpu.memory_space<vmem>>, vector<128x64xf32>,
    return
  }
  func.func @transform_0(%arg0: i32, %arg1: i32, %arg2: i32) -> (i32, i32) {
    %c0_i32 = arith.constant 0 : i32
    return %arg0, %arg2 : i32, i32
  }
  func.func @transform_1(%arg0: i32, %arg1: i32, %arg2: i32) -> (i32, i32) {
    %c0_i32 = arith.constant 0 : i32
    return %arg2, %arg1 : i32, i32
  }
  func.func @transform_2(%arg0: i32, %arg1: i32, %arg2: i32) -> (i32, i32) {
    %c0_i32 = arith.constant 0 : i32
    %c0_i32_0 = arith.constant 0 : i32
    return %c0_i32, %arg1 : i32, i32
  }
  func.func @transform_3(%arg0: i32, %arg1: i32, %arg2: i32) -> (i32, i32) {
    %c0_i32 = arith.constant 0 : i32
    %c0_i32_0 = arith.constant 0 : i32
    return %c0_i32, %arg2 : i32, i32
  }
  func.func @transform_4(%arg0: i32, %arg1: i32, %arg2: i32) -> (i32, i32) {
    %c0_i32 = arith.constant 0 : i32
    %c0_i32_0 = arith.constant 0 : i32
    return %c0_i32, %arg2 : i32, i32
  }
  func.func @transform_5(%arg0: i32, %arg1: i32, %arg2: i32) -> (i32, i32) {
    %c0_i32 = arith.constant 0 : i32
    return %arg0, %arg1 : i32, i32
  }
}

module attributes {stable_mosaic.version = 11 : i64} {
  func.func @_dwconv3x3_kernel(%arg0: i32, %arg1: i32, %arg2: memref<1x10x10x64xf32, #tpu.memory_space<vmem>>, %arg3: memref<3x3x64xf32, #tpu.memory_space<vmem>>, %arg4: memref<1x1x64xf32, #tpu.memory_space<vmem>>, %arg5: memref<1x8x8x64xf32, #tpu.memory_space<vmem>>) attributes {dimension_semantics = [#tpu.dimension_semantics<parallel>, #tpu.dimension_semantics<parallel>], iteration_bounds = array<i64: 2, 1>, scalar_prefetch = 0 : i64, scratch_operands = 0 : i64, tpu.core_type = #tpu.core_type<tc>, window_params = [{transform_indices = @transform_0, window_bounds = array<i64: 1, 10, 10, 64>}, {transform_indices = @transform_1, window_bounds = array<i64: 3, 3, 64>}, {transform_indices = @transform_2, window_bounds = array<i64: 1, 1, 64>}, {transform_indices = @transform_3, window_bounds = array<i64: 1, 8, 8, 64>}]} {
    %c0 = arith.constant 0 : index
    %c0_0 = arith.constant 0 : index
    %c0_1 = arith.constant 0 : index
    %c0_2 = arith.constant 0 : index
    %0 = vector.load %arg2[%c0, %c0_0, %c0_1, %c0_2] : memref<1x10x10x64xf32, #tpu.memory_space<vmem>>, vector<1x10x10x64xf32>
    %1 = vector.shape_cast %0 : vector<1x10x10x64xf32> to vector<10x10x64xf32>
    %c0_3 = arith.constant 0 : index
    %c0_4 = arith.constant 0 : index
    %c0_5 = arith.constant 0 : index
    %2 = vector.load %arg3[%c0_3, %c0_4, %c0_5] : memref<3x3x64xf32, #tpu.memory_space<vmem>>, vector<3x3x64xf32>
    %cst = arith.constant 0.000000e+00 : f32
    %3 = vector.broadcast %cst : f32 to vector<8x8x64xf32>
    %4 = vector.extract_strided_slice %1 {offsets = [0, 0, 0], sizes = [8, 8, 64], strides = [1, 1, 1]} : vector<10x10x64xf32> to vector<8x8x64xf32>
    %5 = vector.extract_strided_slice %2 {offsets = [0, 0, 0], sizes = [1, 1, 64], strides = [1, 1, 1]} : vector<3x3x64xf32> to vector<1x1x64xf32>
    %6 = vector.shape_cast %5 : vector<1x1x64xf32> to vector<64xf32>
    %7 = vector.shape_cast %6 : vector<64xf32> to vector<1x1x64xf32>
    %8 = vector.broadcast %7 : vector<1x1x64xf32> to vector<8x8x64xf32>
    %9 = arith.mulf %4, %8 : vector<8x8x64xf32>
    %10 = arith.addf %3, %9 : vector<8x8x64xf32>
    %11 = vector.extract_strided_slice %1 {offsets = [0, 1, 0], sizes = [8, 8, 64], strides = [1, 1, 1]} : vector<10x10x64xf32> to vector<8x8x64xf32>
    %12 = vector.extract_strided_slice %2 {offsets = [0, 1, 0], sizes = [1, 1, 64], strides = [1, 1, 1]} : vector<3x3x64xf32> to vector<1x1x64xf32>
    %13 = vector.shape_cast %12 : vector<1x1x64xf32> to vector<64xf32>
    %14 = vector.shape_cast %13 : vector<64xf32> to vector<1x1x64xf32>
    %15 = vector.broadcast %14 : vector<1x1x64xf32> to vector<8x8x64xf32>
    %16 = arith.mulf %11, %15 : vector<8x8x64xf32>
    %17 = arith.addf %10, %16 : vector<8x8x64xf32>
    %18 = vector.extract_strided_slice %1 {offsets = [0, 2, 0], sizes = [8, 8, 64], strides = [1, 1, 1]} : vector<10x10x64xf32> to vector<8x8x64xf32>
    %19 = vector.extract_strided_slice %2 {offsets = [0, 2, 0], sizes = [1, 1, 64], strides = [1, 1, 1]} : vector<3x3x64xf32> to vector<1x1x64xf32>
    %20 = vector.shape_cast %19 : vector<1x1x64xf32> to vector<64xf32>
    %21 = vector.shape_cast %20 : vector<64xf32> to vector<1x1x64xf32>
    %22 = vector.broadcast %21 : vector<1x1x64xf32> to vector<8x8x64xf32>
    %23 = arith.mulf %18, %22 : vector<8x8x64xf32>
    %24 = arith.addf %17, %23 : vector<8x8x64xf32>
    %25 = vector.extract_strided_slice %1 {offsets = [1, 0, 0], sizes = [8, 8, 64], strides = [1, 1, 1]} : vector<10x10x64xf32> to vector<8x8x64xf32>
    %26 = vector.extract_strided_slice %2 {offsets = [1, 0, 0], sizes = [1, 1, 64], strides = [1, 1, 1]} : vector<3x3x64xf32> to vector<1x1x64xf32>
    %27 = vector.shape_cast %26 : vector<1x1x64xf32> to vector<64xf32>
    %28 = vector.shape_cast %27 : vector<64xf32> to vector<1x1x64xf32>
    %29 = vector.broadcast %28 : vector<1x1x64xf32> to vector<8x8x64xf32>
    %30 = arith.mulf %25, %29 : vector<8x8x64xf32>
    %31 = arith.addf %24, %30 : vector<8x8x64xf32>
    %32 = vector.extract_strided_slice %1 {offsets = [1, 1, 0], sizes = [8, 8, 64], strides = [1, 1, 1]} : vector<10x10x64xf32> to vector<8x8x64xf32>
    %33 = vector.extract_strided_slice %2 {offsets = [1, 1, 0], sizes = [1, 1, 64], strides = [1, 1, 1]} : vector<3x3x64xf32> to vector<1x1x64xf32>
    %34 = vector.shape_cast %33 : vector<1x1x64xf32> to vector<64xf32>
    %35 = vector.shape_cast %34 : vector<64xf32> to vector<1x1x64xf32>
    %36 = vector.broadcast %35 : vector<1x1x64xf32> to vector<8x8x64xf32>
    %37 = arith.mulf %32, %36 : vector<8x8x64xf32>
    %38 = arith.addf %31, %37 : vector<8x8x64xf32>
    %39 = vector.extract_strided_slice %1 {offsets = [1, 2, 0], sizes = [8, 8, 64], strides = [1, 1, 1]} : vector<10x10x64xf32> to vector<8x8x64xf32>
    %40 = vector.extract_strided_slice %2 {offsets = [1, 2, 0], sizes = [1, 1, 64], strides = [1, 1, 1]} : vector<3x3x64xf32> to vector<1x1x64xf32>
    %41 = vector.shape_cast %40 : vector<1x1x64xf32> to vector<64xf32>
    %42 = vector.shape_cast %41 : vector<64xf32> to vector<1x1x64xf32>
    %43 = vector.broadcast %42 : vector<1x1x64xf32> to vector<8x8x64xf32>
    %44 = arith.mulf %39, %43 : vector<8x8x64xf32>
    %45 = arith.addf %38, %44 : vector<8x8x64xf32>
    %46 = vector.extract_strided_slice %1 {offsets = [2, 0, 0], sizes = [8, 8, 64], strides = [1, 1, 1]} : vector<10x10x64xf32> to vector<8x8x64xf32>
    %47 = vector.extract_strided_slice %2 {offsets = [2, 0, 0], sizes = [1, 1, 64], strides = [1, 1, 1]} : vector<3x3x64xf32> to vector<1x1x64xf32>
    %48 = vector.shape_cast %47 : vector<1x1x64xf32> to vector<64xf32>
    %49 = vector.shape_cast %48 : vector<64xf32> to vector<1x1x64xf32>
    %50 = vector.broadcast %49 : vector<1x1x64xf32> to vector<8x8x64xf32>
    %51 = arith.mulf %46, %50 : vector<8x8x64xf32>
    %52 = arith.addf %45, %51 : vector<8x8x64xf32>
    %53 = vector.extract_strided_slice %1 {offsets = [2, 1, 0], sizes = [8, 8, 64], strides = [1, 1, 1]} : vector<10x10x64xf32> to vector<8x8x64xf32>
    %54 = vector.extract_strided_slice %2 {offsets = [2, 1, 0], sizes = [1, 1, 64], strides = [1, 1, 1]} : vector<3x3x64xf32> to vector<1x1x64xf32>
    %55 = vector.shape_cast %54 : vector<1x1x64xf32> to vector<64xf32>
    %56 = vector.shape_cast %55 : vector<64xf32> to vector<1x1x64xf32>
    %57 = vector.broadcast %56 : vector<1x1x64xf32> to vector<8x8x64xf32>
    %58 = arith.mulf %53, %57 : vector<8x8x64xf32>
    %59 = arith.addf %52, %58 : vector<8x8x64xf32>
    %60 = vector.extract_strided_slice %1 {offsets = [2, 2, 0], sizes = [8, 8, 64], strides = [1, 1, 1]} : vector<10x10x64xf32> to vector<8x8x64xf32>
    %61 = vector.extract_strided_slice %2 {offsets = [2, 2, 0], sizes = [1, 1, 64], strides = [1, 1, 1]} : vector<3x3x64xf32> to vector<1x1x64xf32>
    %62 = vector.shape_cast %61 : vector<1x1x64xf32> to vector<64xf32>
    %63 = vector.shape_cast %62 : vector<64xf32> to vector<1x1x64xf32>
    %64 = vector.broadcast %63 : vector<1x1x64xf32> to vector<8x8x64xf32>
    %65 = arith.mulf %60, %64 : vector<8x8x64xf32>
    %66 = arith.addf %59, %65 : vector<8x8x64xf32>
    %c0_6 = arith.constant 0 : index
    %c0_7 = arith.constant 0 : index
    %c0_8 = arith.constant 0 : index
    %67 = vector.load %arg4[%c0_6, %c0_7, %c0_8] : memref<1x1x64xf32, #tpu.memory_space<vmem>>, vector<1x1x64xf32>
    %68 = vector.broadcast %67 : vector<1x1x64xf32> to vector<8x8x64xf32>
    %69 = arith.addf %66, %68 : vector<8x8x64xf32>
    %c0_9 = arith.constant 0 : index
    %c0_10 = arith.constant 0 : index
    %c0_11 = arith.constant 0 : index
    %c0_12 = arith.constant 0 : index
    %70 = vector.load %arg5[%c0_9, %c0_10, %c0_11, %c0_12] : memref<1x8x8x64xf32, #tpu.memory_space<vmem>>, vector<1x8x8x64xf32>
    %71 = vector.shape_cast %70 : vector<1x8x8x64xf32> to vector<8x8x64xf32>
    %72 = vector.shape_cast %69 : vector<8x8x64xf32> to vector<1x8x8x64xf32>
    tpu.vector_store %arg5[%c0_9, %c0_10, %c0_11, %c0_12], %72 {strides = array<i32>} : memref<1x8x8x64xf32, #tpu.memory_space<vmem>>, vector<1x8x8x64xf32>,
    return
  }
  func.func @transform_0(%arg0: i32, %arg1: i32) -> (i32, i32, i32, i32) {
    %c0_i32 = arith.constant 0 : i32
    %c0_i32_0 = arith.constant 0 : i32
    %c0_i32_1 = arith.constant 0 : i32
    return %arg0, %c0_i32, %c0_i32_0, %arg1 : i32, i32, i32, i32
  }
  func.func @transform_1(%arg0: i32, %arg1: i32) -> (i32, i32, i32) {
    %c0_i32 = arith.constant 0 : i32
    %c0_i32_0 = arith.constant 0 : i32
    %c0_i32_1 = arith.constant 0 : i32
    return %c0_i32, %c0_i32_0, %arg1 : i32, i32, i32
  }
  func.func @transform_2(%arg0: i32, %arg1: i32) -> (i32, i32, i32) {
    %c0_i32 = arith.constant 0 : i32
    %c0_i32_0 = arith.constant 0 : i32
    %c0_i32_1 = arith.constant 0 : i32
    return %c0_i32, %c0_i32_0, %arg1 : i32, i32, i32
  }
  func.func @transform_3(%arg0: i32, %arg1: i32) -> (i32, i32, i32, i32) {
    %c0_i32 = arith.constant 0 : i32
    %c0_i32_0 = arith.constant 0 : i32
    %c0_i32_1 = arith.constant 0 : i32
    return %arg0, %c0_i32, %c0_i32_0, %arg1 : i32, i32, i32, i32
  }
}

module attributes {stable_mosaic.version = 11 : i64} {
  func.func @_fused_mm_kernel(%arg0: i32, %arg1: i32, %arg2: i32, %arg3: memref<128x64xf32, #tpu.memory_space<vmem>>, %arg4: memref<64x32xf32, #tpu.memory_space<vmem>>, %arg5: memref<1x32xf32, #tpu.memory_space<vmem>>, %arg6: memref<128x32xf32, #tpu.memory_space<vmem>>, %arg7: memref<128x32xf32, #tpu.memory_space<vmem>>) attributes {dimension_semantics = [#tpu.dimension_semantics<parallel>, #tpu.dimension_semantics<parallel>, #tpu.dimension_semantics<arbitrary>], iteration_bounds = array<i64: 1, 1, 1>, scalar_prefetch = 0 : i64, scratch_operands = 0 : i64, tpu.core_type = #tpu.core_type<tc>, window_params = [{transform_indices = @transform_0, window_bounds = array<i64: 128, 64>}, {transform_indices = @transform_1, window_bounds = array<i64: 64, 32>}, {transform_indices = @transform_2, window_bounds = array<i64: 1, 32>}, {transform_indices = @transform_3, window_bounds = array<i64: 128, 32>}, {transform_indices = @transform_4, window_bounds = array<i64: 128, 32>}]} {
    %c0 = arith.constant 0 : index
    %c0_0 = arith.constant 0 : index
    %0 = vector.load %arg3[%c0, %c0_0] : memref<128x64xf32, #tpu.memory_space<vmem>>, vector<128x64xf32>
    %c0_1 = arith.constant 0 : index
    %c0_2 = arith.constant 0 : index
    %1 = vector.load %arg4[%c0_1, %c0_2] : memref<64x32xf32, #tpu.memory_space<vmem>>, vector<64x32xf32>
    %cst = arith.constant dense<0.000000e+00> : vector<128x32xf32>
    %2 = tpu.matmul %0, %1, %cst {dimension_numbers = #tpu.dot_dimension_numbers<[1], [0], [0], [1], [0, 0, 1, 1], [], []>} : vector<128x64xf32>, vector<64x32xf32>, vector<128x32xf32> -> vector<128x32xf32>
    %c0_3 = arith.constant 0 : index
    %c0_4 = arith.constant 0 : index
    %3 = vector.load %arg5[%c0_3, %c0_4] : memref<1x32xf32, #tpu.memory_space<vmem>>, vector<1x32xf32>
    %4 = vector.broadcast %3 : vector<1x32xf32> to vector<128x32xf32>
    %5 = arith.addf %2, %4 : vector<128x32xf32>
    %c0_5 = arith.constant 0 : index
    %c0_6 = arith.constant 0 : index
    %6 = vector.load %arg6[%c0_5, %c0_6] : memref<128x32xf32, #tpu.memory_space<vmem>>, vector<128x32xf32>
    %7 = arith.addf %5, %6 : vector<128x32xf32>
    %c0_7 = arith.constant 0 : index
    %c0_8 = arith.constant 0 : index
    %8 = vector.load %arg7[%c0_7, %c0_8] : memref<128x32xf32, #tpu.memory_space<vmem>>, vector<128x32xf32>
    tpu.vector_store %arg7[%c0_7, %c0_8], %7 {strides = array<i32>} : memref<128x32xf32, #tpu.memory_space<vmem>>, vector<128x32xf32>,
    return
  }
  func.func @transform_0(%arg0: i32, %arg1: i32, %arg2: i32) -> (i32, i32) {
    %c0_i32 = arith.constant 0 : i32
    return %arg0, %arg2 : i32, i32
  }
  func.func @transform_1(%arg0: i32, %arg1: i32, %arg2: i32) -> (i32, i32) {
    %c0_i32 = arith.constant 0 : i32
    return %arg2, %arg1 : i32, i32
  }
  func.func @transform_2(%arg0: i32, %arg1: i32, %arg2: i32) -> (i32, i32) {
    %c0_i32 = arith.constant 0 : i32
    %c0_i32_0 = arith.constant 0 : i32
    return %c0_i32, %arg1 : i32, i32
  }
  func.func @transform_3(%arg0: i32, %arg1: i32, %arg2: i32) -> (i32, i32) {
    %c0_i32 = arith.constant 0 : i32
    return %arg0, %arg1 : i32, i32
  }
  func.func @transform_4(%arg0: i32, %arg1: i32, %arg2: i32) -> (i32, i32) {
    %c0_i32 = arith.constant 0 : i32
    return %arg0, %arg1 : i32, i32
  }
}

module attributes {stable_mosaic.version = 11 : i64} {
  func.func @_layernorm_kernel(%arg0: i32, %arg1: memref<128x32xf32, #tpu.memory_space<vmem>>, %arg2: memref<1x32xf32, #tpu.memory_space<vmem>>, %arg3: memref<1x32xf32, #tpu.memory_space<vmem>>, %arg4: memref<128x32xf32, #tpu.memory_space<vmem>>) attributes {dimension_semantics = [#tpu.dimension_semantics<parallel>], iteration_bounds = array<i64: 1>, scalar_prefetch = 0 : i64, scratch_operands = 0 : i64, tpu.core_type = #tpu.core_type<tc>, window_params = [{transform_indices = @transform_0, window_bounds = array<i64: 128, 32>}, {pipeline_mode = #tpu.pipeline_mode<synchronous>, transform_indices = @transform_1, window_bounds = array<i64: 1, 32>}, {pipeline_mode = #tpu.pipeline_mode<synchronous>, transform_indices = @transform_2, window_bounds = array<i64: 1, 32>}, {transform_indices = @transform_3, window_bounds = array<i64: 128, 32>}]} {
    %c0 = arith.constant 0 : index
    %c0_0 = arith.constant 0 : index
    %0 = vector.load %arg1[%c0, %c0_0] : memref<128x32xf32, #tpu.memory_space<vmem>>, vector<128x32xf32>
    %cst = arith.constant dense<0.000000e+00> : vector<128xf32>
    %1 = vector.multi_reduction <add>, %0, %cst [1] : vector<128x32xf32> to vector<128xf32>
    %2 = vector.shape_cast %1 : vector<128xf32> to vector<128x1xf32>
    %cst_1 = arith.constant 3.200000e+01 : f32
    %3 = vector.broadcast %cst_1 : f32 to vector<128x1xf32>
    %4 = arith.divf %2, %3 : vector<128x1xf32>
    %5 = vector.broadcast %4 : vector<128x1xf32> to vector<128x32xf32>
    %6 = arith.subf %0, %5 : vector<128x32xf32>
    %7 = arith.mulf %6, %6 : vector<128x32xf32>
    %cst_2 = arith.constant dense<0.000000e+00> : vector<128xf32>
    %8 = vector.multi_reduction <add>, %7, %cst_2 [1] : vector<128x32xf32> to vector<128xf32>
    %9 = vector.shape_cast %8 : vector<128xf32> to vector<128x1xf32>
    %cst_3 = arith.constant 3.200000e+01 : f32
    %10 = vector.broadcast %cst_3 : f32 to vector<128x1xf32>
    %11 = arith.divf %9, %10 : vector<128x1xf32>
    %12 = vector.broadcast %4 : vector<128x1xf32> to vector<128x32xf32>
    %13 = arith.subf %0, %12 : vector<128x32xf32>
    %cst_4 = arith.constant 9.99999997E-7 : f32
    %14 = vector.broadcast %cst_4 : f32 to vector<128x1xf32>
    %15 = arith.addf %11, %14 : vector<128x1xf32>
    %16 = math.rsqrt %15 : vector<128x1xf32>
    %17 = vector.broadcast %16 : vector<128x1xf32> to vector<128x32xf32>
    %18 = arith.mulf %13, %17 : vector<128x32xf32>
    %c0_5 = arith.constant 0 : index
    %c0_6 = arith.constant 0 : index
    %19 = vector.load %arg2[%c0_5, %c0_6] : memref<1x32xf32, #tpu.memory_space<vmem>>, vector<1x32xf32>
    %20 = vector.broadcast %19 : vector<1x32xf32> to vector<128x32xf32>
    %21 = arith.mulf %18, %20 : vector<128x32xf32>
    %c0_7 = arith.constant 0 : index
    %c0_8 = arith.constant 0 : index
    %22 = vector.load %arg3[%c0_7, %c0_8] : memref<1x32xf32, #tpu.memory_space<vmem>>, vector<1x32xf32>
    %23 = vector.broadcast %22 : vector<1x32xf32> to vector<128x32xf32>
    %24 = arith.addf %21, %23 : vector<128x32xf32>
    %c0_9 = arith.constant 0 : index
    %c0_10 = arith.constant 0 : index
    %25 = vector.load %arg4[%c0_9, %c0_10] : memref<128x32xf32, #tpu.memory_space<vmem>>, vector<128x32xf32>
    tpu.vector_store %arg4[%c0_9, %c0_10], %24 {strides = array<i32>} : memref<128x32xf32, #tpu.memory_space<vmem>>, vector<128x32xf32>,
    return
  }
  func.func @transform_0(%arg0: i32) -> (i32, i32) {
    %c0_i32 = arith.constant 0 : i32
    %c0_i32_0 = arith.constant 0 : i32
    return %arg0, %c0_i32 : i32, i32
  }
  func.func @transform_1(%arg0: i32) -> (i32, i32) {
    %c0_i32 = arith.constant 0 : i32
    %c0_i32_0 = arith.constant 0 : i32
    %c0_i32_1 = arith.constant 0 : i32
    return %c0_i32, %c0_i32_0 : i32, i32
  }
  func.func @transform_2(%arg0: i32) -> (i32, i32) {
    %c0_i32 = arith.constant 0 : i32
    %c0_i32_0 = arith.constant 0 : i32
    %c0_i32_1 = arith.constant 0 : i32
    return %c0_i32, %c0_i32_0 : i32, i32
  }
  func.func @transform_3(%arg0: i32) -> (i32, i32) {
    %c0_i32 = arith.constant 0 : i32
    %c0_i32_0 = arith.constant 0 : i32
    return %arg0, %c0_i32 : i32, i32
  }
}

</mosaic_0001>

<bundles_post_ra>
// kernel: tpu_custom_call.1
= control target key start
LH: loop header
LB: loop body
LE: loop exit
PB: predicated region body
PF: predicated region fallthrough
CT: control target
= control target key end

     0   :  { %6 = vsyncpa [#allocation3], 0  ;;  %s127_s0 = inlined_call_operand.hbm [shape: f32[8,128], index: 0, kind: input, shape index: {}]   ;;  %s128_s1 = inlined_call_operand.hbm [shape: f32[8,128], index: 1, kind: output, shape index: {}]  }
   0x1   :  { %7 = vsyncpa [#allocation4], 0  ;;  %s91_s6 = smov [#allocation2]   ;;  %s43_s10 = scalar_lea.hbm %s127_s0, 128 }
   0x2   :  { %s14_s7 = sshll.u32 %s91_s6, 4  ;;  %p44_p0 = scmp.ne.s32.totalorder %s127_s0, %s43_s10  ;;  %s15_s7 = int_to_ptr.vmem [resolvable:$true] %s14_s7 }
   0x3   :  { %p47_p1 = scmp.lt.u32.totalorder %s43_s10, %s127_s0 }
   0x5   :  { %p49_p2 = pnand %p47_p1, %p44_p0 }
   0x7   :  { %52 = shalt.err (!%p49_p2)
}
   0x8   :  { %s53_s15 = scalar_lea.vmem %s15_s7, 128  ;;  %p58_p4 = scmp.lt.s32.totalorder %s15_s7, %s15_s7 }
   0x9   :  { %p54_p3 = scmp.ne.s32.totalorder %s15_s7, %s53_s15  ;;  %p59_p5 = scmp.lt.s32.totalorder %s53_s15, %s53_s15 }
   0xb   :  { %p60_p6 = por %p59_p5, %p58_p4 }
   0xd   :  { %p61_p7 = pnand %p60_p6, %p54_p3 }
   0xf   :  { %64 = shalt.err (!%p61_p7)
}
  0x10   :  { %17 = dma.hbm_to_vmem [thread:$0]  %s127_s0, 128, %s15_s7, [#allocation3]  }
  0x11   :  { %87 = dma.done.wait [#allocation3], 128  }
  0x12   :  { %88 = vsyncadd [#allocation3], 4294967168  ;;  %v21_v0 = vld [vmem:[#allocation2] sm:$0xff]  ;;  %s92_s18 = smov [#allocation5]  }
  0x13   :  { %41 = verf.f32 %v21_v0  ;;  %s30_s19 = sshll.u32 %s92_s18, 4  ;;  %s31_s19 = int_to_ptr.vmem [resolvable:$true] %s30_s19 }
  0x14   :  { %s65_s20 = scalar_lea.vmem %s31_s19, 128  ;;  %p70_p9 = scmp.lt.s32.totalorder %s31_s19, %s31_s19 }
  0x15   :  { %p66_p8 = scmp.ne.s32.totalorder %s31_s19, %s65_s20  ;;  %p71_p10 = scmp.lt.s32.totalorder %s65_s20, %s65_s20 }
  0x17   :  { %p72_p11 = por %p71_p10, %p70_p9 }
  0x19   :  { %p73_p12 = pnand %p72_p11, %p66_p8 }
  0x1d   :  { %v42_v1 = vpop.eup %41 }
  0x1e   :  { %23 = vst [vmem:[#allocation5] sm:$0xff] %v42_v1 }
  0x1f   :  { %76 = shalt.err (!%p73_p12)
}
  0x20   :  { %s77_s0 = scalar_lea.hbm %s128_s1, 128 }
  0x21   :  { %p78_p13 = scmp.ne.s32.totalorder %s128_s1, %s77_s0  ;;  %p81_p0 = scmp.lt.u32.totalorder %s77_s0, %s128_s1 }
  0x23   :  { %p83_p1 = pnand %p81_p0, %p78_p13 }
  0x25   :  { %86 = shalt.err (!%p83_p1)
}
  0x26   :  { %33 = dma.vmem_to_hbm [thread:$0]  %s31_s19, 128, %s128_s1, [#allocation4]  }
  0x27   :  { %89 = dma.done.wait [#allocation4], 128  }
  0x28   :  { %90 = vsyncadd [#allocation4], 4294967168 }
  0x29   :  { %37 = vsyncpa [#allocation3], 1 }
  0x2a   :  { %38 = vsyncpa [#allocation4], 1 }

// kernel: mix_transformer_stage_forward.22
= control target key start
LH: loop header
LB: loop body
LE: loop exit
PB: predicated region body
PF: predicated region fallthrough
CT: control target
= control target key end

     0   :  { %vm30_vm0 = vcmask 261120   ;;  %s666_s0 = inlined_call_operand.vmem [shape: f32[128,32], index: 0, kind: input, shape index: {}]   ;;  %s667_s1 = inlined_call_operand.vmem [shape: f32[1,32], index: 1, kind: input, shape index: {}]   ;;  %s668_s2 = inlined_call_operand.vmem [shape: f32[1,32], index: 2, kind: input, shape index: {}]   ;;  %s669_s3 = inlined_call_operand.vmem [shape: f32[128,32], index: 3, kind: output, shape index: {}]  }
   0x1   :  { %v14_v0 = vld [vmem:[%s666_s0] sm:$0xff]  ;;  %v16_v1 = vld [vmem:[%s666_s0 + $0x10] sm:$0xff]  ;;  %v15_v2 = vld [vmem:[%s666_s0 + $0x8] sm:$0xff] }
   0x2   :  { %v31_v3 = vsel %vm30_vm0, %v14_v0, 0.0  ;;  %v37_v4 = vsel %vm30_vm0, %v16_v1, 0.0  ;;  %v17_v5 = vld [vmem:[%s666_s0 + $0x18] sm:$0xff]  ;;  %v34_v6 = vsel %vm30_vm0, %v15_v2, 0.0  ;;  %v18_v8 = vld [vmem:[%s666_s0 + $0x20] sm:$0xff]  ;;  %v19_v9 = vld [vmem:[%s666_s0 + $0x28] sm:$0xff] }
   0x3   :  { %32 = vadd.xlane.f32.xlu0 %v31_v3  ;;  %38 = vadd.xlane.f32.xlu1 %v37_v4  ;;  %v40_v7 = vsel %vm30_vm0, %v17_v5, 0.0  ;;  %v43_v10 = vsel %vm30_vm0, %v18_v8, 0.0  ;;  %v46_v11 = vsel %vm30_vm0, %v19_v9, 0.0  ;;  %v387_v12 = vld [vmem:[%s666_s0 + $0x30] sm:$0xff]  ;;  %v392_v13 = vld [vmem:[%s666_s0 + $0x38] sm:$0xff]  ;;  %v401_v16 = vld [vmem:[%s666_s0 + $0x40] sm:$0xff] }
   0x4   :  { %v49_v14 = vsel %vm30_vm0, %v387_v12, 0.0  ;;  %v52_v15 = vsel %vm30_vm0, %v392_v13, 0.0  ;;  %v406_v17 = vld [vmem:[%s666_s0 + $0x48] sm:$0xff]  ;;  %v55_v18 = vsel %vm30_vm0, %v401_v16, 0.0  ;;  %v415_v20 = vld [vmem:[%s666_s0 + $0x50] sm:$0xff]  ;;  %v420_v21 = vld [vmem:[%s666_s0 + $0x58] sm:$0xff] }
   0x5   :  { %v58_v19 = vsel %vm30_vm0, %v406_v17, 0.0  ;;  %v61_v22 = vsel %vm30_vm0, %v415_v20, 0.0  ;;  %v64_v23 = vsel %vm30_vm0, %v420_v21, 0.0  ;;  %v429_v24 = vld [vmem:[%s666_s0 + $0x60] sm:$0xff]  ;;  %v434_v25 = vld [vmem:[%s666_s0 + $0x68] sm:$0xff]  ;;  %v443_v28 = vld [vmem:[%s666_s0 + $0x70] sm:$0xff] }
   0x6   :  { %v67_v26 = vsel %vm30_vm0, %v429_v24, 0.0  ;;  %v70_v27 = vsel %vm30_vm0, %v434_v25, 0.0  ;;  %v448_v29 = vld [vmem:[%s666_s0 + $0x78] sm:$0xff]  ;;  %v73_v30 = vsel %vm30_vm0, %v443_v28, 0.0 }
   0x7   :  { %35 = vadd.xlane.f32.xlu0 %v34_v6  ;;  %41 = vadd.xlane.f32.xlu1 %v40_v7  ;;  %v76_v31 = vsel %vm30_vm0, %v448_v29, 0.0 }
   0xb   :  { %44 = vadd.xlane.f32.xlu0 %v43_v10  ;;  %47 = vadd.xlane.f32.xlu1 %v46_v11 }
   0xf   :  { %50 = vadd.xlane.f32.xlu0 %v49_v14  ;;  %53 = vadd.xlane.f32.xlu1 %v52_v15 }
  0x13   :  { %56 = vadd.xlane.f32.xlu0 %v55_v18  ;;  %59 = vadd.xlane.f32.xlu1 %v58_v19 }
  0x17   :  { %62 = vadd.xlane.f32.xlu0 %v61_v22  ;;  %65 = vadd.xlane.f32.xlu1 %v64_v23 }
  0x1b   :  { %68 = vadd.xlane.f32.xlu0 %v67_v26  ;;  %71 = vadd.xlane.f32.xlu1 %v70_v27 }
  0x1f   :  { %74 = vadd.xlane.f32.xlu0 %v73_v30  ;;  %77 = vadd.xlane.f32.xlu1 %v76_v31 }
  0x90   :  { %v33_v32 = vpop.xlane.xlu0 %32  ;;  %v39_v33 = vpop.xlane.xlu1 %38 }
  0x91   :  { %v80_v34 = vmul.f32 0.03125, %v33_v32  ;;  %v82_v35 = vmul.f32 0.03125, %v39_v33 }
  0x93   :  { %v454_v36 = vsub.f32 %v14_v0, %v80_v34  ;;  %v456_v37 = vsub.f32 %v16_v1, %v82_v35 }
  0x94   :  { %v36_v38 = vpop.xlane.xlu0 %35  ;;  %v42_v39 = vpop.xlane.xlu1 %41 }
  0x95   :  { %v81_v40 = vmul.f32 0.03125, %v36_v38  ;;  %v83_v41 = vmul.f32 0.03125, %v42_v39  ;;  %v112_v42 = vmul.f32 %v454_v36, %v454_v36  ;;  %v114_v43 = vmul.f32 %v456_v37, %v456_v37 }
  0x97   :  { %v462_v44 = vsub.f32 %v15_v2, %v81_v40  ;;  %v464_v45 = vsub.f32 %v17_v5, %v83_v41  ;;  %v128_v46 = vsel %vm30_vm0, %v112_v42, 0.0  ;;  %v134_v49 = vsel %vm30_vm0, %v114_v43, 0.0 }
  0x98   :  { %129 = vadd.xlane.f32.xlu0 %v128_v46  ;;  %v45_v47 = vpop.xlane.xlu0 %44  ;;  %v48_v48 = vpop.xlane.xlu1 %47 }
  0x99   :  { %v84_v50 = vmul.f32 0.03125, %v45_v47  ;;  %v85_v51 = vmul.f32 0.03125, %v48_v48  ;;  %v113_v52 = vmul.f32 %v462_v44, %v462_v44  ;;  %v115_v53 = vmul.f32 %v464_v45, %v464_v45 }
  0x9b   :  { %v472_v54 = vsub.f32 %v18_v8, %v84_v50  ;;  %v474_v55 = vsub.f32 %v19_v9, %v85_v51  ;;  %v131_v56 = vsel %vm30_vm0, %v113_v52, 0.0  ;;  %v137_v59 = vsel %vm30_vm0, %v115_v53, 0.0 }
  0x9c   :  { %135 = vadd.xlane.f32.xlu0 %v134_v49  ;;  %132 = vadd.xlane.f32.xlu1 %v131_v56  ;;  %v51_v57 = vpop.xlane.xlu0 %50  ;;  %v54_v58 = vpop.xlane.xlu1 %53 }
  0x9d   :  { %v86_v60 = vmul.f32 0.03125, %v51_v57  ;;  %v87_v61 = vmul.f32 0.03125, %v54_v58  ;;  %v116_v62 = vmul.f32 %v472_v54, %v472_v54  ;;  %v117_v63 = vmul.f32 %v474_v55, %v474_v55 }
  0x9f   :  { %v483_v0 = vsub.f32 %v387_v12, %v86_v60  ;;  %v486_v1 = vsub.f32 %v392_v13, %v87_v61  ;;  %v140_v2 = vsel %vm30_vm0, %v116_v62, 0.0  ;;  %v143_v5 = vsel %vm30_vm0, %v117_v63, 0.0 }
  0xa0   :  { %138 = vadd.xlane.f32.xlu1 %v137_v59  ;;  %141 = vadd.xlane.f32.xlu0 %v140_v2  ;;  %v57_v3 = vpop.xlane.xlu0 %56  ;;  %v60_v4 = vpop.xlane.xlu1 %59 }
  0xa1   :  { %v88_v6 = vmul.f32 0.03125, %v57_v3  ;;  %v89_v7 = vmul.f32 0.03125, %v60_v4  ;;  %v118_v8 = vmul.f32 %v483_v0, %v483_v0  ;;  %v119_v9 = vmul.f32 %v486_v1, %v486_v1 }
  0xa3   :  { %v495_v10 = vsub.f32 %v401_v16, %v88_v6  ;;  %v498_v11 = vsub.f32 %v406_v17, %v89_v7  ;;  %v146_v12 = vsel %vm30_vm0, %v118_v8, 0.0  ;;  %v149_v15 = vsel %vm30_vm0, %v119_v9, 0.0 }
  0xa4   :  { %144 = vadd.xlane.f32.xlu1 %v143_v5  ;;  %147 = vadd.xlane.f32.xlu0 %v146_v12  ;;  %v63_v13 = vpop.xlane.xlu0 %62  ;;  %v66_v14 = vpop.xlane.xlu1 %65 }
  0xa5   :  { %v90_v18 = vmul.f32 0.03125, %v63_v13  ;;  %v91_v19 = vmul.f32 0.03125, %v66_v14  ;;  %v120_v22 = vmul.f32 %v495_v10, %v495_v10  ;;  %v121_v16 = vmul.f32 %v498_v11, %v498_v11  ;;  %v547_v14 = vld [vmem:[%s667_s1] ss:$0 sm:$0xff] }
  0xa7   :  { %v507_v23 = vsub.f32 %v415_v20, %v90_v18  ;;  %v510_v17 = vsub.f32 %v420_v21, %v91_v19  ;;  %v152_v26 = vsel %vm30_vm0, %v120_v22, 0.0  ;;  %v155_v31 = vsel %vm30_vm0, %v121_v16, 0.0 }
  0xa8   :  { %150 = vadd.xlane.f32.xlu1 %v149_v15  ;;  %153 = vadd.xlane.f32.xlu0 %v152_v26  ;;  %v69_v27 = vpop.xlane.xlu0 %68  ;;  %v72_v30 = vpop.xlane.xlu1 %71  ;;  %v553_v26 = vld [vmem:[%s668_s2] ss:$0 sm:$0xff] }
  0xa9   :  { %v92_v32 = vmul.f32 0.03125, %v69_v27  ;;  %v93_v33 = vmul.f32 0.03125, %v72_v30  ;;  %v122_v34 = vmul.f32 %v507_v23, %v507_v23  ;;  %v123_v20 = vmul.f32 %v510_v17, %v510_v17 }
  0xab   :  { %v519_v35 = vsub.f32 %v429_v24, %v92_v32  ;;  %v522_v21 = vsub.f32 %v434_v25, %v93_v33  ;;  %v158_v38 = vsel %vm30_vm0, %v122_v34, 0.0  ;;  %v161_v41 = vsel %vm30_vm0, %v123_v20, 0.0 }
  0xac   :  { %156 = vadd.xlane.f32.xlu1 %v155_v31  ;;  %159 = vadd.xlane.f32.xlu0 %v158_v38  ;;  %v75_v39 = vpop.xlane.xlu0 %74  ;;  %v78_v40 = vpop.xlane.xlu1 %77 }
  0xad   :  { %v94_v42 = vmul.f32 0.03125, %v75_v39  ;;  %v95_v43 = vmul.f32 0.03125, %v78_v40  ;;  %v124_v46 = vmul.f32 %v519_v35, %v519_v35  ;;  %v125_v24 = vmul.f32 %v522_v21, %v522_v21 }
  0xaf   :  { %v531_v47 = vsub.f32 %v443_v28, %v94_v42  ;;  %v534_v25 = vsub.f32 %v448_v29, %v95_v43  ;;  %v164_v48 = vsel %vm30_vm0, %v124_v46, 0.0  ;;  %v167_v49 = vsel %vm30_vm0, %v125_v24, 0.0 }
  0xb0   :  { %162 = vadd.xlane.f32.xlu1 %v161_v41  ;;  %165 = vadd.xlane.f32.xlu0 %v164_v48 }
  0xb1   :  { %v126_v50 = vmul.f32 %v531_v47, %v531_v47  ;;  %v127_v51 = vmul.f32 %v534_v25, %v534_v25 }
  0xb3   :  { %v170_v52 = vsel %vm30_vm0, %v126_v50, 0.0  ;;  %v173_v28 = vsel %vm30_vm0, %v127_v51, 0.0 }
  0xb4   :  { %168 = vadd.xlane.f32.xlu1 %v167_v49  ;;  %171 = vadd.xlane.f32.xlu0 %v170_v52 }
  0xb8   :  { %174 = vadd.xlane.f32.xlu1 %v173_v28 }
 0x125   :  { %v130_v29 = vpop.xlane.xlu0 %129 }
 0x126   :  { %v176_v53 = vmul.f32 0.03125, %v130_v29 }
 0x128   :  { %v192_v56 = vadd.f32 1e-06, %v176_v53 }
 0x129   :  { %v133_v57 = vpop.xlane.xlu1 %132  ;;  %v136_v58 = vpop.xlane.xlu0 %135 }
 0x12a   :  { %308 = vrsqrt.f32 %v192_v56  ;;  %v177_v59 = vmul.f32 0.03125, %v133_v57  ;;  %v178_v60 = vmul.f32 0.03125, %v136_v58 }
 0x12c   :  { %v193_v61 = vadd.f32 1e-06, %v177_v59  ;;  %v194_v62 = vadd.f32 1e-06, %v178_v60 }
 0x12d   :  { %v139_v63 = vpop.xlane.xlu1 %138  ;;  %v142_v2 = vpop.xlane.xlu0 %141 }
 0x12e   :  { %310 = vrsqrt.f32 %v193_v61  ;;  %v179_v3 = vmul.f32 0.03125, %v139_v63  ;;  %v180_v4 = vmul.f32 0.03125, %v142_v2 }
 0x12f   :  { %312 = vrsqrt.f32 %v194_v62 }
 0x130   :  { %v195_v5 = vadd.f32 1e-06, %v179_v3  ;;  %v196_v6 = vadd.f32 1e-06, %v180_v4 }
 0x131   :  { %v145_v7 = vpop.xlane.xlu1 %144  ;;  %v148_v8 = vpop.xlane.xlu0 %147 }
 0x132   :  { %314 = vrsqrt.f32 %v195_v5  ;;  %v181_v9 = vmul.f32 0.03125, %v145_v7  ;;  %v182_v12 = vmul.f32 0.03125, %v148_v8 }
 0x133   :  { %316 = vrsqrt.f32 %v196_v6 }
 0x134   :  { %v309_v13 = vpop.eup %308  ;;  %v197_v15 = vadd.f32 1e-06, %v181_v9  ;;  %v198_v18 = vadd.f32 1e-06, %v182_v12 }
 0x135   :  { %v224_v19 = vmul.f32 %v309_v13, %v454_v36  ;;  %v151_v22 = vpop.xlane.xlu1 %150  ;;  %v154_v16 = vpop.xlane.xlu0 %153 }
 0x136   :  { %318 = vrsqrt.f32 %v197_v15  ;;  %v183_v27 = vmul.f32 0.03125, %v151_v22  ;;  %v184_v30 = vmul.f32 0.03125, %v154_v16 }
 0x137   :  { %v247_v31 = vmul.f32 %v547_v14, %v224_v19  ;;  %320 = vrsqrt.f32 %v198_v18 }
 0x138   :  { %v311_v32 = vpop.eup %310  ;;  %v199_v33 = vadd.f32 1e-06, %v183_v27  ;;  %v200_v34 = vadd.f32 1e-06, %v184_v30 }
 0x139   :  { %v313_v20 = vpop.eup %312  ;;  %v270_v38 = vadd.f32 %v553_v26, %v247_v31  ;;  %v225_v36 = vmul.f32 %v311_v32, %v462_v44  ;;  %v157_v39 = vpop.xlane.xlu1 %156 }
 0x13a   :  { %v160_v40 = vpop.xlane.xlu0 %159  ;;  %v226_v41 = vmul.f32 %v313_v20, %v456_v37  ;;  %322 = vrsqrt.f32 %v199_v33  ;;  %v185_v42 = vmul.f32 0.03125, %v157_v39 }
 0x13b   :  { %v186_v43 = vmul.f32 0.03125, %v160_v40  ;;  %286 = vst.msk [vmem:[%s669_s3] sm:$0xff] %vm30_vm0, %v270_v38  ;;  %v248_v46 = vmul.f32 %v547_v14, %v225_v36  ;;  %324 = vrsqrt.f32 %v200_v34 }
 0x13c   :  { %v315_v24 = vpop.eup %314  ;;  %v249_v48 = vmul.f32 %v547_v14, %v226_v41  ;;  %v201_v49 = vadd.f32 1e-06, %v185_v42 }
 0x13d   :  { %v202_v44 = vadd.f32 1e-06, %v186_v43  ;;  %v317_v50 = vpop.eup %316  ;;  %v271_v51 = vadd.f32 %v553_v26, %v248_v46  ;;  %v227_v37 = vmul.f32 %v315_v24, %v464_v45  ;;  %v163_v52 = vpop.xlane.xlu1 %162 }
 0x13e   :  { %v166_v28 = vpop.xlane.xlu0 %165  ;;  %v272_v29 = vadd.f32 %v553_v26, %v249_v48  ;;  %v228_v53 = vmul.f32 %v317_v50, %v472_v54  ;;  %326 = vrsqrt.f32 %v201_v49  ;;  %v187_v56 = vmul.f32 0.03125, %v163_v52 }
 0x13f   :  { %287 = vst.msk [vmem:[%s669_s3 + $0x8] sm:$0xff] %vm30_vm0, %v271_v51  ;;  %v250_v57 = vmul.f32 %v547_v14, %v227_v37  ;;  %328 = vrsqrt.f32 %v202_v44  ;;  %v188_v58 = vmul.f32 0.03125, %v166_v28 }
 0x140   :  { %v319_v59 = vpop.eup %318  ;;  %288 = vst.msk [vmem:[%s669_s3 + $0x10] sm:$0xff] %vm30_vm0, %v272_v29  ;;  %v251_v45 = vmul.f32 %v547_v14, %v228_v53  ;;  %v203_v54 = vadd.f32 1e-06, %v187_v56 }
 0x141   :  { %v321_v60 = vpop.eup %320  ;;  %v273_v61 = vadd.f32 %v553_v26, %v250_v57  ;;  %v229_v62 = vmul.f32 %v319_v59, %v474_v55  ;;  %v204_v63 = vadd.f32 1e-06, %v188_v58  ;;  %v169_v2 = vpop.xlane.xlu1 %168 }
 0x142   :  { %v172_v3 = vpop.xlane.xlu0 %171  ;;  %v274_v4 = vadd.f32 %v553_v26, %v251_v45  ;;  %v230_v5 = vmul.f32 %v321_v60, %v483_v0  ;;  %330 = vrsqrt.f32 %v203_v54  ;;  %v189_v6 = vmul.f32 0.03125, %v169_v2 }
 0x143   :  { %289 = vst.msk [vmem:[%s669_s3 + $0x18] sm:$0xff] %vm30_vm0, %v273_v61  ;;  %v252_v7 = vmul.f32 %v547_v14, %v229_v62  ;;  %332 = vrsqrt.f32 %v204_v63  ;;  %v190_v8 = vmul.f32 0.03125, %v172_v3 }
 0x144   :  { %v323_v9 = vpop.eup %322  ;;  %290 = vst.msk [vmem:[%s669_s3 + $0x20] sm:$0xff] %vm30_vm0, %v274_v4  ;;  %v253_v55 = vmul.f32 %v547_v14, %v230_v5  ;;  %v205_v0 = vadd.f32 1e-06, %v189_v6 }
 0x145   :  { %v325_v12 = vpop.eup %324  ;;  %v275_v13 = vadd.f32 %v553_v26, %v252_v7  ;;  %v231_v15 = vmul.f32 %v323_v9, %v486_v1  ;;  %v206_v18 = vadd.f32 1e-06, %v190_v8  ;;  %v175_v19 = vpop.xlane.xlu1 %174 }
 0x146   :  { %v276_v22 = vadd.f32 %v553_v26, %v253_v55  ;;  %v232_v16 = vmul.f32 %v325_v12, %v495_v10  ;;  %334 = vrsqrt.f32 %v205_v0  ;;  %v191_v27 = vmul.f32 0.03125, %v175_v19 }
 0x147   :  { %291 = vst.msk [vmem:[%s669_s3 + $0x28] sm:$0xff] %vm30_vm0, %v275_v13  ;;  %v254_v30 = vmul.f32 %v547_v14, %v231_v15  ;;  %336 = vrsqrt.f32 %v206_v18 }
 0x148   :  { %v327_v31 = vpop.eup %326  ;;  %292 = vst.msk [vmem:[%s669_s3 + $0x30] sm:$0xff] %vm30_vm0, %v276_v22  ;;  %v255_v1 = vmul.f32 %v547_v14, %v232_v16  ;;  %v207_v32 = vadd.f32 1e-06, %v191_v27 }
 0x149   :  { %v329_v10 = vpop.eup %328  ;;  %v277_v33 = vadd.f32 %v553_v26, %v254_v30  ;;  %v233_v34 = vmul.f32 %v327_v31, %v498_v11 }
 0x14a   :  { %v278_v20 = vadd.f32 %v553_v26, %v255_v1  ;;  %v234_v38 = vmul.f32 %v329_v10, %v507_v23  ;;  %338 = vrsqrt.f32 %v207_v32 }
 0x14b   :  { %293 = vst.msk [vmem:[%s669_s3 + $0x38] sm:$0xff] %vm30_vm0, %v277_v33  ;;  %v256_v36 = vmul.f32 %v547_v14, %v233_v34 }
 0x14c   :  { %v331_v39 = vpop.eup %330  ;;  %294 = vst.msk [vmem:[%s669_s3 + $0x40] sm:$0xff] %vm30_vm0, %v278_v20  ;;  %v257_v11 = vmul.f32 %v547_v14, %v234_v38 }
 0x14d   :  { %v333_v40 = vpop.eup %332  ;;  %v279_v41 = vadd.f32 %v553_v26, %v256_v36  ;;  %v235_v23 = vmul.f32 %v331_v39, %v510_v17 }
 0x14e   :  { %v280_v42 = vadd.f32 %v553_v26, %v257_v11  ;;  %v236_v43 = vmul.f32 %v333_v40, %v519_v35 }
 0x14f   :  { %295 = vst.msk [vmem:[%s669_s3 + $0x48] sm:$0xff] %vm30_vm0, %v279_v41  ;;  %v258_v46 = vmul.f32 %v547_v14, %v235_v23 }
 0x150   :  { %v335_v24 = vpop.eup %334  ;;  %296 = vst.msk [vmem:[%s669_s3 + $0x50] sm:$0xff] %vm30_vm0, %v280_v42  ;;  %v259_v48 = vmul.f32 %v547_v14, %v236_v43 }
 0x151   :  { %v337_v17 = vpop.eup %336  ;;  %v281_v49 = vadd.f32 %v553_v26, %v258_v46  ;;  %v237_v35 = vmul.f32 %v335_v24, %v522_v21 }
 0x152   :  { %v282_v44 = vadd.f32 %v553_v26, %v259_v48  ;;  %v238_v50 = vmul.f32 %v337_v17, %v531_v47 }
 0x153   :  { %297 = vst.msk [vmem:[%s669_s3 + $0x58] sm:$0xff] %vm30_vm0, %v281_v49  ;;  %v260_v51 = vmul.f32 %v547_v14, %v237_v35 }
 0x154   :  { %v339_v37 = vpop.eup %338  ;;  %298 = vst.msk [vmem:[%s669_s3 + $0x60] sm:$0xff] %vm30_vm0, %v282_v44  ;;  %v261_v52 = vmul.f32 %v547_v14, %v238_v50 }
 0x155   :  { %v283_v21 = vadd.f32 %v553_v26, %v260_v51  ;;  %v239_v28 = vmul.f32 %v339_v37, %v534_v25 }
 0x156   :  { %v284_v47 = vadd.f32 %v553_v26, %v261_v52 }
 0x157   :  { %299 = vst.msk [vmem:[%s669_s3 + $0x68] sm:$0xff] %vm30_vm0, %v283_v21  ;;  %v262_v29 = vmul.f32 %v547_v14, %v239_v28 }
 0x158   :  { %300 = vst.msk [vmem:[%s669_s3 + $0x70] sm:$0xff] %vm30_vm0, %v284_v47 }
 0x159   :  { %v285_v53 = vadd.f32 %v553_v26, %v262_v29 }
 0x15b   :  { %301 = vst.msk [vmem:[%s669_s3 + $0x78] sm:$0xff] %vm30_vm0, %v285_v53 }

// kernel: mix_transformer_stage_forward.21
= control target key start
LH: loop header
LB: loop body
LE: loop exit
PB: predicated region body
PF: predicated region fallthrough
CT: control target
= control target key end

     0   :  { %vm42_vm0 = vcmask 293888   ;;  %vm91_vm1 = vcmask 1043456   ;;  %vm240_vm2 = vcmask 261120   ;;  %s514_s1 = inlined_call_operand.vmem [shape: f32[36,32], index: 1, kind: input, shape index: {}]   ;;  %s515_s0 = inlined_call_operand.vmem [shape: f32[128,36], index: 0, kind: input, shape index: {}]   ;;  %s516_s2 = inlined_call_operand.vmem [shape: f32[1,32], index: 2, kind: input, shape index: {}]   ;;  %s517_s3 = inlined_call_operand.vmem [shape: f32[128,32], index: 3, kind: output, shape index: {}]  }
   0x1   :  { %v30_v0 = vld [vmem:[%s514_s1] sm:$0xff]  ;;  %v31_v1 = vld [vmem:[%s514_s1 + $0x8] sm:$0xff]  ;;  %v32_v2 = vld [vmem:[%s514_s1 + $0x10] sm:$0xff] }
   0x2   :  { %v334_v3 = vpack.c.bf16 %v31_v1, %v30_v0  ;;  %v33_v4 = vld [vmem:[%s514_s1 + $0x18] sm:$0xff]  ;;  %v14_v5 = vld [vmem:[%s515_s0] sm:$0xff]  ;;  %v15_v9 = vld [vmem:[%s515_s0 + $0x8] sm:$0xff] }
   0x3   :  { %v338_v6 = vpack.c.bf16 %v33_v4, %v32_v2  ;;  %310 = vmatprep.mubr.msk.f32.mxu0 %vm42_vm0, %v14_v5  ;;  %v22_v7 = vld [vmem:[%s515_s0 + $0x40] sm:$0xff]  ;;  %v23_v10 = vld [vmem:[%s515_s0 + $0x48] sm:$0xff]  ;;  %v16_v11 = vld [vmem:[%s515_s0 + $0x10] sm:$0xff] }
   0x4   :  { %335 = vmatprep.subr.bf16.mxu0 %v334_v3  ;;  %342 = vmatprep.subr.bf16.mxu1 %v334_v3  ;;  %v34_v8 = vld [vmem:[%s514_s1 + $0x20] sm:$0xf]  ;;  %v24_v12 = vld [vmem:[%s515_s0 + $0x50] sm:$0xff]  ;;  %v17_v13 = vld [vmem:[%s515_s0 + $0x18] sm:$0xff] }
   0x5   :  { %337 = vmatpush3.bf16.msra.mxu0 %v334_v3  ;;  %345 = vmatpush3.bf16.msra.mxu1 %v334_v3  ;;  %v25_v14 = vld [vmem:[%s515_s0 + $0x58] sm:$0xff]  ;;  %v18_v15 = vld [vmem:[%s515_s0 + $0x20] sm:$0xff]  ;;  %v19_v17 = vld [vmem:[%s515_s0 + $0x28] sm:$0xff] }
   0x6   :  { %339 = vmatprep.subr.bf16.mxu0 %v338_v6  ;;  %343 = vmatprep.subr.bf16.mxu1 %v338_v6  ;;  %v26_v16 = vld [vmem:[%s515_s0 + $0x60] sm:$0xff]  ;;  %v27_v18 = vld [vmem:[%s515_s0 + $0x68] sm:$0xff]  ;;  %v20_v19 = vld [vmem:[%s515_s0 + $0x30] sm:$0xff] }
   0x7   :  { %322 = vmatprep.mubr.msk.f32.mxu1 %vm42_vm0, %v22_v7  ;;  %v28_v20 = vld [vmem:[%s515_s0 + $0x70] sm:$0xff]  ;;  %v21_v21 = vld [vmem:[%s515_s0 + $0x38] sm:$0xff]  ;;  %v261_v23 = vld [vmem:[%s516_s2] ss:$0 sm:$0xff] }
   0x8   :  { %v29_v22 = vld [vmem:[%s515_s0 + $0x78] sm:$0xff] }
   0x9   :  { %341 = vmatpush3.bf16.msra.mxu0 %v338_v6  ;;  %346 = vmatpush3.bf16.msra.mxu1 %v338_v6 }
   0xa   :  { %308 = vmatprep.subr.msk.mxu0 %vm91_vm1, %v34_v8  ;;  %344 = vmatprep.subr.msk.mxu1 %vm91_vm1, %v34_v8 }
   0xd   :  { %309 = vmatpush3.msk.msra.mxu0 %vm91_vm1, %v34_v8  ;;  %347 = vmatpush3.msk.msra.mxu1 %vm91_vm1, %v34_v8 }
   0xe   :  { %311 = vmatmul.mubr.msk.f32.vlgmr.msra.gmra.mrb[0].mxu0 %vm42_vm0, %v15_v9  ;;  %323 = vmatmul.mubr.msk.f32.vlgmr.msra.gmra.mrb[0].mxu1 %vm42_vm0, %v23_v10 }
   0xf   :  { %313 = vmatprep.mubr.msk.f32.mxu0 %vm42_vm0, %v16_v11  ;;  %325 = vmatprep.mubr.msk.f32.mxu1 %vm42_vm0, %v24_v12 }
  0x12   :  { %314 = vmatmul.mubr.msk.f32.gmra.mrb[2].mxu0 %vm42_vm0, %v17_v13  ;;  %326 = vmatmul.mubr.msk.f32.gmra.mrb[2].mxu1 %vm42_vm0, %v25_v14 }
  0x13   :  { %316 = vmatprep.mubr.msk.f32.mxu0 %vm42_vm0, %v18_v15  ;;  %328 = vmatprep.mubr.msk.f32.mxu1 %vm42_vm0, %v26_v16 }
  0x16   :  { %317 = vmatmul.mubr.msk.f32.gmra.mrb[4].mxu0 %vm42_vm0, %v19_v17  ;;  %329 = vmatmul.mubr.msk.f32.gmra.mrb[4].mxu1 %vm42_vm0, %v27_v18 }
  0x17   :  { %319 = vmatprep.mubr.msk.f32.mxu0 %vm42_vm0, %v20_v19  ;;  %331 = vmatprep.mubr.msk.f32.mxu1 %vm42_vm0, %v28_v20 }
  0x1a   :  { %320 = vmatmul.mubr.msk.f32.gmra.mrb[6].mxu0 %vm42_vm0, %v21_v21  ;;  %332 = vmatmul.mubr.msk.f32.gmra.mrb[6].mxu1 %vm42_vm0, %v29_v22 }
  0xe1   :  { %v312_v24 = vpop.f32.mrb[0].mxu0  ;;  %v324_v25 = vpop.f32.mrb[0].mxu1 }
  0xe2   :  { %v167_v26 = vadd.f32 %v312_v24, %v261_v23  ;;  %v207_v27 = vadd.f32 %v324_v25, %v261_v23  ;;  %v161_v28 = vpop.f32.mrb[1].mxu0  ;;  %v201_v29 = vpop.f32.mrb[1].mxu1 }
  0xe3   :  { %v162_v30 = vadd.f32 %v261_v23, %v161_v28  ;;  %v202_v31 = vadd.f32 %v261_v23, %v201_v29 }
  0xe4   :  { %242 = vst.msk [vmem:[%s517_s3 + $0x8] sm:$0xff] %vm240_vm2, %v167_v26  ;;  %250 = vst.msk [vmem:[%s517_s3 + $0x48] sm:$0xff] %vm240_vm2, %v207_v27 }
  0xe5   :  { %241 = vst.msk [vmem:[%s517_s3] sm:$0xff] %vm240_vm2, %v162_v30  ;;  %249 = vst.msk [vmem:[%s517_s3 + $0x40] sm:$0xff] %vm240_vm2, %v202_v31  ;;  %v315_v32 = vpop.f32.mrb[2].mxu0  ;;  %v327_v33 = vpop.f32.mrb[2].mxu1 }
  0xe6   :  { %v177_v34 = vadd.f32 %v315_v32, %v261_v23  ;;  %v217_v35 = vadd.f32 %v327_v33, %v261_v23  ;;  %v171_v36 = vpop.f32.mrb[3].mxu0  ;;  %v211_v37 = vpop.f32.mrb[3].mxu1 }
  0xe7   :  { %v172_v38 = vadd.f32 %v261_v23, %v171_v36  ;;  %v212_v39 = vadd.f32 %v261_v23, %v211_v37 }
  0xe8   :  { %244 = vst.msk [vmem:[%s517_s3 + $0x18] sm:$0xff] %vm240_vm2, %v177_v34  ;;  %252 = vst.msk [vmem:[%s517_s3 + $0x58] sm:$0xff] %vm240_vm2, %v217_v35 }
  0xe9   :  { %243 = vst.msk [vmem:[%s517_s3 + $0x10] sm:$0xff] %vm240_vm2, %v172_v38  ;;  %251 = vst.msk [vmem:[%s517_s3 + $0x50] sm:$0xff] %vm240_vm2, %v212_v39  ;;  %v318_v40 = vpop.f32.mrb[4].mxu0  ;;  %v330_v41 = vpop.f32.mrb[4].mxu1 }
  0xea   :  { %v187_v42 = vadd.f32 %v318_v40, %v261_v23  ;;  %v227_v43 = vadd.f32 %v330_v41, %v261_v23  ;;  %v181_v44 = vpop.f32.mrb[5].mxu0  ;;  %v221_v45 = vpop.f32.mrb[5].mxu1 }
  0xeb   :  { %v182_v46 = vadd.f32 %v261_v23, %v181_v44  ;;  %v222_v47 = vadd.f32 %v261_v23, %v221_v45 }
  0xec   :  { %246 = vst.msk [vmem:[%s517_s3 + $0x28] sm:$0xff] %vm240_vm2, %v187_v42  ;;  %254 = vst.msk [vmem:[%s517_s3 + $0x68] sm:$0xff] %vm240_vm2, %v227_v43 }
  0xed   :  { %245 = vst.msk [vmem:[%s517_s3 + $0x20] sm:$0xff] %vm240_vm2, %v182_v46  ;;  %253 = vst.msk [vmem:[%s517_s3 + $0x60] sm:$0xff] %vm240_vm2, %v222_v47  ;;  %v321_v48 = vpop.f32.mrb[6].mxu0  ;;  %v333_v49 = vpop.f32.mrb[6].mxu1 }
  0xee   :  { %v197_v50 = vadd.f32 %v321_v48, %v261_v23  ;;  %v237_v51 = vadd.f32 %v333_v49, %v261_v23  ;;  %v191_v52 = vpop.f32.mrb[7].mxu0  ;;  %v231_v53 = vpop.f32.mrb[7].mxu1 }
  0xef   :  { %v192_v54 = vadd.f32 %v261_v23, %v191_v52  ;;  %v232_v55 = vadd.f32 %v261_v23, %v231_v53 }
  0xf0   :  { %248 = vst.msk [vmem:[%s517_s3 + $0x38] sm:$0xff] %vm240_vm2, %v197_v50  ;;  %256 = vst.msk [vmem:[%s517_s3 + $0x78] sm:$0xff] %vm240_vm2, %v237_v51 }
  0xf1   :  { %247 = vst.msk [vmem:[%s517_s3 + $0x30] sm:$0xff] %vm240_vm2, %v192_v54  ;;  %255 = vst.msk [vmem:[%s517_s3 + $0x70] sm:$0xff] %vm240_vm2, %v232_v55 }

// kernel: mix_transformer_stage_forward.25
= control target key start
LH: loop header
LB: loop body
LE: loop exit
PB: predicated region body
PF: predicated region fallthrough
CT: control target
= control target key end

     0   :  { %vm126_vm0 = vcmask 261120   ;;  %s337_s1 = inlined_call_operand.vmem [shape: f32[128,32], index: 1, kind: input, shape index: {}]   ;;  %s338_s0 = inlined_call_operand.vmem [shape: f32[32,128], index: 0, kind: input, shape index: {}]   ;;  %s339_s2 = inlined_call_operand.vmem [shape: f32[1,32], index: 2, kind: input, shape index: {}]   ;;  %s340_s3 = inlined_call_operand.vmem [shape: f32[32,32], index: 3, kind: output, shape index: {}]  }
   0x1   :  { %v18_v0 = vld [vmem:[%s337_s1] sm:$0xff]  ;;  %v19_v1 = vld [vmem:[%s337_s1 + $0x8] sm:$0xff]  ;;  %v20_v2 = vld [vmem:[%s337_s1 + $0x10] sm:$0xff] }
   0x2   :  { %v194_v3 = vpack.c.bf16 %v19_v1, %v18_v0  ;;  %v21_v4 = vld [vmem:[%s337_s1 + $0x18] sm:$0xff]  ;;  %v22_v6 = vld [vmem:[%s337_s1 + $0x20] sm:$0xff]  ;;  %v23_v7 = vld [vmem:[%s337_s1 + $0x28] sm:$0xff] }
   0x3   :  { %v198_v5 = vpack.c.bf16 %v21_v4, %v20_v2  ;;  %v202_v8 = vpack.c.bf16 %v23_v7, %v22_v6  ;;  %v14_v9 = vld [vmem:[%s338_s0] sm:$0xff]  ;;  %v16_v10 = vld [vmem:[%s338_s0 + $0x10] sm:$0xff]  ;;  %v25_v12 = vld [vmem:[%s337_s1 + $0x38] sm:$0xff] }
   0x4   :  { %195 = vmatprep.subr.bf16.mxu0 %v194_v3  ;;  %226 = vmatprep.subr.bf16.mxu1 %v194_v3  ;;  %v24_v11 = vld [vmem:[%s337_s1 + $0x30] sm:$0xff]  ;;  %v26_v14 = vld [vmem:[%s337_s1 + $0x40] sm:$0xff]  ;;  %v27_v15 = vld [vmem:[%s337_s1 + $0x48] sm:$0xff] }
   0x5   :  { %197 = vmatpush3.bf16.msra.mxu0 %v194_v3  ;;  %234 = vmatpush3.bf16.msra.mxu1 %v194_v3  ;;  %v206_v13 = vpack.c.bf16 %v25_v12, %v24_v11  ;;  %v210_v16 = vpack.c.bf16 %v27_v15, %v26_v14  ;;  %v28_v17 = vld [vmem:[%s337_s1 + $0x50] sm:$0xff]  ;;  %v29_v18 = vld [vmem:[%s337_s1 + $0x58] sm:$0xff]  ;;  %v30_v20 = vld [vmem:[%s337_s1 + $0x60] sm:$0xff] }
   0x6   :  { %199 = vmatprep.subr.bf16.mxu0 %v198_v5  ;;  %227 = vmatprep.subr.bf16.mxu1 %v198_v5  ;;  %v214_v19 = vpack.c.bf16 %v29_v18, %v28_v17  ;;  %v31_v21 = vld [vmem:[%s337_s1 + $0x68] sm:$0xff]  ;;  %v32_v23 = vld [vmem:[%s337_s1 + $0x70] sm:$0xff]  ;;  %v33_v24 = vld [vmem:[%s337_s1 + $0x78] sm:$0xff] }
   0x7   :  { %188 = vmatprep.mubr.f32.mxu0 %v14_v9  ;;  %191 = vmatprep.mubr.f32.mxu1 %v16_v10  ;;  %v218_v22 = vpack.c.bf16 %v31_v21, %v30_v20  ;;  %v222_v25 = vpack.c.bf16 %v33_v24, %v32_v23  ;;  %v15_v26 = vld [vmem:[%s338_s0 + $0x8] sm:$0xff]  ;;  %v17_v27 = vld [vmem:[%s338_s0 + $0x18] sm:$0xff]  ;;  %v135_v28 = vld [vmem:[%s339_s2] ss:$0 sm:$0xff] }
   0x9   :  { %201 = vmatpush3.bf16.msra.mxu0 %v198_v5  ;;  %235 = vmatpush3.bf16.msra.mxu1 %v198_v5 }
   0xa   :  { %203 = vmatprep.subr.bf16.mxu0 %v202_v8  ;;  %228 = vmatprep.subr.bf16.mxu1 %v202_v8 }
   0xd   :  { %205 = vmatpush3.bf16.msra.mxu0 %v202_v8  ;;  %236 = vmatpush3.bf16.msra.mxu1 %v202_v8 }
   0xe   :  { %207 = vmatprep.subr.bf16.mxu0 %v206_v13  ;;  %229 = vmatprep.subr.bf16.mxu1 %v206_v13 }
  0x11   :  { %209 = vmatpush3.bf16.msra.mxu0 %v206_v13  ;;  %237 = vmatpush3.bf16.msra.mxu1 %v206_v13 }
  0x12   :  { %211 = vmatprep.subr.bf16.mxu0 %v210_v16  ;;  %230 = vmatprep.subr.bf16.mxu1 %v210_v16 }
  0x15   :  { %213 = vmatpush3.bf16.msra.mxu0 %v210_v16  ;;  %238 = vmatpush3.bf16.msra.mxu1 %v210_v16 }
  0x16   :  { %215 = vmatprep.subr.bf16.mxu0 %v214_v19  ;;  %231 = vmatprep.subr.bf16.mxu1 %v214_v19 }
  0x19   :  { %217 = vmatpush3.bf16.msra.mxu0 %v214_v19  ;;  %239 = vmatpush3.bf16.msra.mxu1 %v214_v19 }
  0x1a   :  { %219 = vmatprep.subr.bf16.mxu0 %v218_v22  ;;  %232 = vmatprep.subr.bf16.mxu1 %v218_v22 }
  0x1d   :  { %221 = vmatpush3.bf16.msra.mxu0 %v218_v22  ;;  %240 = vmatpush3.bf16.msra.mxu1 %v218_v22 }
  0x1e   :  { %223 = vmatprep.subr.bf16.mxu0 %v222_v25  ;;  %233 = vmatprep.subr.bf16.mxu1 %v222_v25 }
  0x21   :  { %225 = vmatpush3.bf16.msra.mxu0 %v222_v25  ;;  %241 = vmatpush3.bf16.msra.mxu1 %v222_v25 }
  0x24   :  { %189 = vmatmul.mubr.f32.vlgmr.msra.gmra.mrb[0].mxu0 %v15_v26  ;;  %192 = vmatmul.mubr.f32.vlgmr.msra.gmra.mrb[0].mxu1 %v17_v27 }
  0xf7   :  { %v190_v29 = vpop.f32.mrb[0].mxu0  ;;  %v193_v30 = vpop.f32.mrb[0].mxu1 }
  0xf8   :  { %v113_v31 = vadd.f32 %v190_v29, %v135_v28  ;;  %v123_v32 = vadd.f32 %v193_v30, %v135_v28  ;;  %v107_v33 = vpop.f32.mrb[1].mxu0  ;;  %v117_v34 = vpop.f32.mrb[1].mxu1 }
  0xf9   :  { %v108_v35 = vadd.f32 %v135_v28, %v107_v33  ;;  %v118_v36 = vadd.f32 %v135_v28, %v117_v34 }
  0xfa   :  { %128 = vst.msk [vmem:[%s340_s3 + $0x8] sm:$0xff] %vm126_vm0, %v113_v31  ;;  %130 = vst.msk [vmem:[%s340_s3 + $0x18] sm:$0xff] %vm126_vm0, %v123_v32 }
  0xfb   :  { %127 = vst.msk [vmem:[%s340_s3] sm:$0xff] %vm126_vm0, %v108_v35  ;;  %129 = vst.msk [vmem:[%s340_s3 + $0x10] sm:$0xff] %vm126_vm0, %v118_v36 }

// kernel: mix_transformer_stage_forward.26
= control target key start
LH: loop header
LB: loop body
LE: loop exit
PB: predicated region body
PF: predicated region fallthrough
CT: control target
= control target key end

     0   :  { %vm24_vm0 = vcmask 261120   ;;  %vm208_vm1 = vcmask 523264   ;;  %s353_s0 = inlined_call_operand.vmem [shape: f32[32,32], index: 0, kind: input, shape index: {}]   ;;  %s354_s1 = inlined_call_operand.vmem [shape: f32[32,64], index: 1, kind: input, shape index: {}]   ;;  %s355_s3 = inlined_call_operand.vmem [shape: f32[1,32], index: 3, kind: input, shape index: {}]   ;;  %s356_s4 = inlined_call_operand.vmem [shape: f32[1,32], index: 4, kind: input, shape index: {}]   ;;  %s357_s2 = inlined_call_operand.vmem [shape: f32[1,64], index: 2, kind: input, shape index: {}]   ;;  %s358_s5 = inlined_call_operand.vmem [shape: f32[32,64], index: 5, kind: output, shape index: {}]  }
   0x1   :  { %v20_v0 = vld [vmem:[%s353_s0] sm:$0xff]  ;;  %v21_v1 = vld [vmem:[%s353_s0 + $0x8] sm:$0xff]  ;;  %v22_v2 = vld [vmem:[%s353_s0 + $0x10] sm:$0xff] }
   0x2   :  { %v25_v3 = vsel %vm24_vm0, %v20_v0, 0.0  ;;  %v28_v4 = vsel %vm24_vm0, %v21_v1, 0.0  ;;  %v23_v5 = vld [vmem:[%s353_s0 + $0x18] sm:$0xff]  ;;  %v31_v6 = vsel %vm24_vm0, %v22_v2, 0.0  ;;  %v100_v28 = vld [vmem:[%s354_s1] sm:$0xff]  ;;  %v101_v29 = vld [vmem:[%s354_s1 + $0x8] sm:$0xff] }
   0x3   :  { %26 = vadd.xlane.f32.xlu0 %v25_v3  ;;  %29 = vadd.xlane.f32.xlu1 %v28_v4  ;;  %v34_v7 = vsel %vm24_vm0, %v23_v5, 0.0  ;;  %v102_v30 = vld [vmem:[%s354_s1 + $0x10] sm:$0xff]  ;;  %v246_v31 = vpack.c.bf16 %v101_v29, %v100_v28  ;;  %v103_v32 = vld [vmem:[%s354_s1 + $0x18] sm:$0xff]  ;;  %v217_v47 = vld [vmem:[%s355_s3] ss:$0 sm:$0xff] }
   0x4   :  { %v250_v33 = vpack.c.bf16 %v103_v32, %v102_v30  ;;  %v218_v49 = vld [vmem:[%s356_s4] ss:$0 sm:$0xff] }
   0x5   :  { %247 = vmatprep.subr.bf16.mxu0 %v246_v31  ;;  %254 = vmatprep.subr.bf16.mxu1 %v246_v31 }
   0x6   :  { %249 = vmatpush3.bf16.msra.mxu0 %v246_v31  ;;  %256 = vmatpush3.bf16.msra.mxu1 %v246_v31 }
   0x7   :  { %32 = vadd.xlane.f32.xlu0 %v31_v6  ;;  %35 = vadd.xlane.f32.xlu1 %v34_v7 }
   0x8   :  { %251 = vmatprep.subr.bf16.mxu0 %v250_v33  ;;  %255 = vmatprep.subr.bf16.mxu1 %v250_v33 }
   0xa   :  { %253 = vmatpush3.bf16.msra.mxu0 %v250_v33  ;;  %257 = vmatpush3.bf16.msra.mxu1 %v250_v33 }
  0x90   :  { %v27_v8 = vpop.xlane.xlu0 %26  ;;  %v30_v9 = vpop.xlane.xlu1 %29 }
  0x91   :  { %v38_v10 = vmul.f32 0.03125, %v27_v8  ;;  %v39_v11 = vmul.f32 0.03125, %v30_v9 }
  0x93   :  { %v42_v12 = vsub.f32 %v20_v0, %v38_v10  ;;  %v43_v13 = vsub.f32 %v21_v1, %v39_v11  ;;  %v219_v0 = vld [vmem:[%s357_s2] ss:$0 sm:$0xff] }
  0x94   :  { %v33_v14 = vpop.xlane.xlu0 %32  ;;  %v36_v15 = vpop.xlane.xlu1 %35 }
  0x95   :  { %v40_v16 = vmul.f32 0.03125, %v33_v14  ;;  %v41_v17 = vmul.f32 0.03125, %v36_v15  ;;  %v46_v18 = vmul.f32 %v42_v12, %v42_v12  ;;  %v47_v19 = vmul.f32 %v43_v13, %v43_v13 }
  0x97   :  { %v44_v20 = vsub.f32 %v22_v2, %v40_v16  ;;  %v45_v21 = vsub.f32 %v23_v5, %v41_v17  ;;  %v50_v22 = vsel %vm24_vm0, %v46_v18, 0.0  ;;  %v53_v23 = vsel %vm24_vm0, %v47_v19, 0.0 }
  0x98   :  { %51 = vadd.xlane.f32.xlu0 %v50_v22 }
  0x99   :  { %v48_v24 = vmul.f32 %v44_v20, %v44_v20  ;;  %v49_v25 = vmul.f32 %v45_v21, %v45_v21 }
  0x9b   :  { %v56_v26 = vsel %vm24_vm0, %v48_v24, 0.0  ;;  %v59_v27 = vsel %vm24_vm0, %v49_v25, 0.0 }
  0x9c   :  { %54 = vadd.xlane.f32.xlu0 %v53_v23  ;;  %57 = vadd.xlane.f32.xlu1 %v56_v26 }
  0xa0   :  { %60 = vadd.xlane.f32.xlu1 %v59_v27 }
 0x125   :  { %v52_v34 = vpop.xlane.xlu0 %51 }
 0x126   :  { %v62_v35 = vmul.f32 0.03125, %v52_v34 }
 0x128   :  { %v66_v36 = vadd.f32 1e-06, %v62_v35 }
 0x129   :  { %v58_v37 = vpop.xlane.xlu1 %57  ;;  %v55_v38 = vpop.xlane.xlu0 %54 }
 0x12a   :  { %258 = vrsqrt.f32 %v66_v36  ;;  %v64_v39 = vmul.f32 0.03125, %v58_v37  ;;  %v63_v40 = vmul.f32 0.03125, %v55_v38 }
 0x12c   :  { %v68_v41 = vadd.f32 1e-06, %v64_v39  ;;  %v67_v42 = vadd.f32 1e-06, %v63_v40 }
 0x12d   :  { %v61_v43 = vpop.xlane.xlu1 %60 }
 0x12e   :  { %260 = vrsqrt.f32 %v68_v41  ;;  %v65_v44 = vmul.f32 0.03125, %v61_v43 }
 0x12f   :  { %262 = vrsqrt.f32 %v67_v42 }
 0x130   :  { %v69_v45 = vadd.f32 1e-06, %v65_v44 }
 0x132   :  { %264 = vrsqrt.f32 %v69_v45 }
 0x134   :  { %v259_v46 = vpop.eup %258 }
 0x135   :  { %v74_v48 = vmul.f32 %v259_v46, %v42_v12 }
 0x137   :  { %v85_v50 = vmul.f32 %v217_v47, %v74_v48 }
 0x138   :  { %v261_v51 = vpop.eup %260 }
 0x139   :  { %v263_v52 = vpop.eup %262  ;;  %v96_v53 = vadd.f32 %v218_v49, %v85_v50  ;;  %v76_v54 = vmul.f32 %v261_v51, %v44_v20 }
 0x13a   :  { %v75_v55 = vmul.f32 %v263_v52, %v43_v13 }
 0x13b   :  { %240 = vmatprep.mubr.msk.f32.mxu0 %vm24_vm0, %v96_v53  ;;  %v87_v56 = vmul.f32 %v217_v47, %v76_v54 }
 0x13c   :  { %v265_v57 = vpop.eup %264  ;;  %v86_v58 = vmul.f32 %v217_v47, %v75_v55 }
 0x13d   :  { %v98_v59 = vadd.f32 %v218_v49, %v87_v56  ;;  %v77_v60 = vmul.f32 %v265_v57, %v45_v21 }
 0x13e   :  { %v97_v61 = vadd.f32 %v218_v49, %v86_v58 }
 0x13f   :  { %243 = vmatprep.mubr.msk.f32.mxu1 %vm24_vm0, %v98_v59  ;;  %v88_v62 = vmul.f32 %v217_v47, %v77_v60 }
 0x140   :  { %241 = vmatmul.mubr.msk.f32.vlgmr.msra.gmra.mrb[0].mxu0 %vm24_vm0, %v97_v61 }
 0x141   :  { %v99_v63 = vadd.f32 %v218_v49, %v88_v62 }
 0x143   :  { %244 = vmatmul.mubr.msk.f32.vlgmr.msra.gmra.mrb[0].mxu1 %vm24_vm0, %v99_v63 }
 0x213   :  { %v242_v1 = vpop.f32.mrb[0].mxu0 }
 0x214   :  { %v195_v2 = vadd.f32 %v242_v1, %v219_v0  ;;  %v189_v3 = vpop.f32.mrb[1].mxu0 }
 0x215   :  { %v190_v4 = vadd.f32 %v219_v0, %v189_v3 }
 0x216   :  { %210 = vst.msk [vmem:[%s358_s5 + $0x8] sm:$0xff] %vm208_vm1, %v195_v2  ;;  %v245_v5 = vpop.f32.mrb[0].mxu1 }
 0x217   :  { %209 = vst.msk [vmem:[%s358_s5] sm:$0xff] %vm208_vm1, %v190_v4  ;;  %v205_v6 = vadd.f32 %v245_v5, %v219_v0  ;;  %v199_v7 = vpop.f32.mrb[1].mxu1 }
 0x218   :  { %v200_v8 = vadd.f32 %v219_v0, %v199_v7 }
 0x219   :  { %212 = vst.msk [vmem:[%s358_s5 + $0x18] sm:$0xff] %vm208_vm1, %v205_v6 }
 0x21a   :  { %211 = vst.msk [vmem:[%s358_s5 + $0x10] sm:$0xff] %vm208_vm1, %v200_v8 }

// kernel: mix_transformer_stage_forward.24
= control target key start
LH: loop header
LB: loop body
LE: loop exit
PB: predicated region body
PF: predicated region fallthrough
CT: control target
= control target key end

     0   :  { %vm41_vm0 = vcmask 261120   ;;  %s499_s1 = inlined_call_operand.vmem [shape: f32[32,32], index: 1, kind: input, shape index: {}]   ;;  %s500_s0 = inlined_call_operand.vmem [shape: f32[128,32], index: 0, kind: input, shape index: {}]   ;;  %s501_s2 = inlined_call_operand.vmem [shape: f32[1,32], index: 2, kind: input, shape index: {}]   ;;  %s502_s3 = inlined_call_operand.vmem [shape: f32[128,32], index: 3, kind: output, shape index: {}]  }
   0x1   :  { %v30_v0 = vld [vmem:[%s499_s1] sm:$0xff]  ;;  %v31_v1 = vld [vmem:[%s499_s1 + $0x8] sm:$0xff]  ;;  %v32_v2 = vld [vmem:[%s499_s1 + $0x10] sm:$0xff] }
   0x2   :  { %v324_v3 = vpack.c.bf16 %v31_v1, %v30_v0  ;;  %v33_v4 = vld [vmem:[%s499_s1 + $0x18] sm:$0xff]  ;;  %v14_v5 = vld [vmem:[%s500_s0] sm:$0xff]  ;;  %v15_v8 = vld [vmem:[%s500_s0 + $0x8] sm:$0xff] }
   0x3   :  { %v22_v6 = vld [vmem:[%s500_s0 + $0x40] sm:$0xff]  ;;  %v328_v7 = vpack.c.bf16 %v33_v4, %v32_v2  ;;  %300 = vmatprep.mubr.msk.f32.mxu0 %vm41_vm0, %v14_v5  ;;  %v23_v9 = vld [vmem:[%s500_s0 + $0x48] sm:$0xff]  ;;  %v16_v10 = vld [vmem:[%s500_s0 + $0x10] sm:$0xff] }
   0x4   :  { %312 = vmatprep.mubr.msk.f32.mxu1 %vm41_vm0, %v22_v6  ;;  %325 = vmatprep.subr.bf16.mxu0 %v324_v3  ;;  %v24_v11 = vld [vmem:[%s500_s0 + $0x50] sm:$0xff]  ;;  %v17_v12 = vld [vmem:[%s500_s0 + $0x18] sm:$0xff]  ;;  %v18_v14 = vld [vmem:[%s500_s0 + $0x20] sm:$0xff] }
   0x5   :  { %332 = vmatprep.subr.bf16.mxu1 %v324_v3  ;;  %327 = vmatpush3.bf16.msra.mxu0 %v324_v3  ;;  %v25_v13 = vld [vmem:[%s500_s0 + $0x58] sm:$0xff]  ;;  %v26_v15 = vld [vmem:[%s500_s0 + $0x60] sm:$0xff]  ;;  %v19_v16 = vld [vmem:[%s500_s0 + $0x28] sm:$0xff] }
   0x6   :  { %334 = vmatpush3.bf16.msra.mxu1 %v324_v3  ;;  %329 = vmatprep.subr.bf16.mxu0 %v328_v7  ;;  %v27_v17 = vld [vmem:[%s500_s0 + $0x68] sm:$0xff]  ;;  %v20_v18 = vld [vmem:[%s500_s0 + $0x30] sm:$0xff]  ;;  %v21_v20 = vld [vmem:[%s500_s0 + $0x38] sm:$0xff] }
   0x7   :  { %333 = vmatprep.subr.bf16.mxu1 %v328_v7  ;;  %v28_v19 = vld [vmem:[%s500_s0 + $0x70] sm:$0xff]  ;;  %v29_v21 = vld [vmem:[%s500_s0 + $0x78] sm:$0xff]  ;;  %v255_v22 = vld [vmem:[%s501_s2] ss:$0 sm:$0xff] }
   0x9   :  { %331 = vmatpush3.bf16.msra.mxu0 %v328_v7 }
   0xa   :  { %335 = vmatpush3.bf16.msra.mxu1 %v328_v7 }
   0xc   :  { %301 = vmatmul.mubr.msk.f32.vlgmr.msra.gmra.mrb[0].mxu0 %vm41_vm0, %v15_v8 }
   0xd   :  { %313 = vmatmul.mubr.msk.f32.vlgmr.msra.gmra.mrb[0].mxu1 %vm41_vm0, %v23_v9  ;;  %303 = vmatprep.mubr.msk.f32.mxu0 %vm41_vm0, %v16_v10 }
   0xe   :  { %315 = vmatprep.mubr.msk.f32.mxu1 %vm41_vm0, %v24_v11 }
  0x10   :  { %304 = vmatmul.mubr.msk.f32.gmra.mrb[2].mxu0 %vm41_vm0, %v17_v12 }
  0x11   :  { %316 = vmatmul.mubr.msk.f32.gmra.mrb[2].mxu1 %vm41_vm0, %v25_v13  ;;  %306 = vmatprep.mubr.msk.f32.mxu0 %vm41_vm0, %v18_v14 }
  0x12   :  { %318 = vmatprep.mubr.msk.f32.mxu1 %vm41_vm0, %v26_v15 }
  0x14   :  { %307 = vmatmul.mubr.msk.f32.gmra.mrb[4].mxu0 %vm41_vm0, %v19_v16 }
  0x15   :  { %319 = vmatmul.mubr.msk.f32.gmra.mrb[4].mxu1 %vm41_vm0, %v27_v17  ;;  %309 = vmatprep.mubr.msk.f32.mxu0 %vm41_vm0, %v20_v18 }
  0x16   :  { %321 = vmatprep.mubr.msk.f32.mxu1 %vm41_vm0, %v28_v19 }
  0x18   :  { %310 = vmatmul.mubr.msk.f32.gmra.mrb[6].mxu0 %vm41_vm0, %v21_v20 }
  0x19   :  { %322 = vmatmul.mubr.msk.f32.gmra.mrb[6].mxu1 %vm41_vm0, %v29_v21 }
  0xdf   :  { %v302_v23 = vpop.f32.mrb[0].mxu0 }
  0xe0   :  { %v314_v24 = vpop.f32.mrb[0].mxu1  ;;  %v162_v25 = vadd.f32 %v302_v23, %v255_v22  ;;  %v156_v27 = vpop.f32.mrb[1].mxu0 }
  0xe1   :  { %v202_v26 = vadd.f32 %v314_v24, %v255_v22  ;;  %v196_v28 = vpop.f32.mrb[1].mxu1  ;;  %v157_v29 = vadd.f32 %v255_v22, %v156_v27 }
  0xe2   :  { %v197_v30 = vadd.f32 %v255_v22, %v196_v28  ;;  %236 = vst.msk [vmem:[%s502_s3 + $0x8] sm:$0xff] %vm41_vm0, %v162_v25 }
  0xe3   :  { %244 = vst.msk [vmem:[%s502_s3 + $0x48] sm:$0xff] %vm41_vm0, %v202_v26  ;;  %235 = vst.msk [vmem:[%s502_s3] sm:$0xff] %vm41_vm0, %v157_v29  ;;  %v305_v31 = vpop.f32.mrb[2].mxu0 }
  0xe4   :  { %243 = vst.msk [vmem:[%s502_s3 + $0x40] sm:$0xff] %vm41_vm0, %v197_v30  ;;  %v317_v32 = vpop.f32.mrb[2].mxu1  ;;  %v172_v33 = vadd.f32 %v305_v31, %v255_v22  ;;  %v166_v35 = vpop.f32.mrb[3].mxu0 }
  0xe5   :  { %v212_v34 = vadd.f32 %v317_v32, %v255_v22  ;;  %v206_v36 = vpop.f32.mrb[3].mxu1  ;;  %v167_v37 = vadd.f32 %v255_v22, %v166_v35 }
  0xe6   :  { %v207_v38 = vadd.f32 %v255_v22, %v206_v36  ;;  %238 = vst.msk [vmem:[%s502_s3 + $0x18] sm:$0xff] %vm41_vm0, %v172_v33 }
  0xe7   :  { %246 = vst.msk [vmem:[%s502_s3 + $0x58] sm:$0xff] %vm41_vm0, %v212_v34  ;;  %237 = vst.msk [vmem:[%s502_s3 + $0x10] sm:$0xff] %vm41_vm0, %v167_v37  ;;  %v308_v39 = vpop.f32.mrb[4].mxu0 }
  0xe8   :  { %245 = vst.msk [vmem:[%s502_s3 + $0x50] sm:$0xff] %vm41_vm0, %v207_v38  ;;  %v320_v40 = vpop.f32.mrb[4].mxu1  ;;  %v182_v41 = vadd.f32 %v308_v39, %v255_v22  ;;  %v176_v43 = vpop.f32.mrb[5].mxu0 }
  0xe9   :  { %v222_v42 = vadd.f32 %v320_v40, %v255_v22  ;;  %v216_v44 = vpop.f32.mrb[5].mxu1  ;;  %v177_v45 = vadd.f32 %v255_v22, %v176_v43 }
  0xea   :  { %v217_v46 = vadd.f32 %v255_v22, %v216_v44  ;;  %240 = vst.msk [vmem:[%s502_s3 + $0x28] sm:$0xff] %vm41_vm0, %v182_v41 }
  0xeb   :  { %248 = vst.msk [vmem:[%s502_s3 + $0x68] sm:$0xff] %vm41_vm0, %v222_v42  ;;  %239 = vst.msk [vmem:[%s502_s3 + $0x20] sm:$0xff] %vm41_vm0, %v177_v45  ;;  %v311_v47 = vpop.f32.mrb[6].mxu0 }
  0xec   :  { %247 = vst.msk [vmem:[%s502_s3 + $0x60] sm:$0xff] %vm41_vm0, %v217_v46  ;;  %v323_v48 = vpop.f32.mrb[6].mxu1  ;;  %v192_v49 = vadd.f32 %v311_v47, %v255_v22  ;;  %v186_v51 = vpop.f32.mrb[7].mxu0 }
  0xed   :  { %v232_v50 = vadd.f32 %v323_v48, %v255_v22  ;;  %v226_v52 = vpop.f32.mrb[7].mxu1  ;;  %v187_v53 = vadd.f32 %v255_v22, %v186_v51 }
  0xee   :  { %v227_v54 = vadd.f32 %v255_v22, %v226_v52  ;;  %242 = vst.msk [vmem:[%s502_s3 + $0x38] sm:$0xff] %vm41_vm0, %v192_v49 }
  0xef   :  { %250 = vst.msk [vmem:[%s502_s3 + $0x78] sm:$0xff] %vm41_vm0, %v232_v50  ;;  %241 = vst.msk [vmem:[%s502_s3 + $0x30] sm:$0xff] %vm41_vm0, %v187_v53 }
  0xf0   :  { %249 = vst.msk [vmem:[%s502_s3 + $0x70] sm:$0xff] %vm41_vm0, %v227_v54 }

// kernel: mix_transformer_stage_forward.28
= control target key start
LH: loop header
LB: loop body
LE: loop exit
PB: predicated region body
PF: predicated region fallthrough
CT: control target
= control target key end

     0   :  { %vm44_vm0 = vcmask 261120   ;;  %s605_s1 = inlined_call_operand.vmem [shape: f32[32,32], index: 1, kind: input, shape index: {}]   ;;  %s606_s0 = inlined_call_operand.vmem [shape: f32[128,32], index: 0, kind: input, shape index: {}]   ;;  %s607_s2 = inlined_call_operand.vmem [shape: f32[1,32], index: 2, kind: input, shape index: {}]   ;;  %s608_s3 = inlined_call_operand.vmem [shape: f32[128,32], index: 3, kind: input, shape index: {}]   ;;  %s609_s4 = inlined_call_operand.vmem [shape: f32[128,32], index: 4, kind: output, shape index: {}]  }
   0x1   :  { %v33_v0 = vld [vmem:[%s605_s1] sm:$0xff]  ;;  %v34_v1 = vld [vmem:[%s605_s1 + $0x8] sm:$0xff]  ;;  %v35_v2 = vld [vmem:[%s605_s1 + $0x10] sm:$0xff] }
   0x2   :  { %v359_v3 = vpack.c.bf16 %v34_v1, %v33_v0  ;;  %v36_v4 = vld [vmem:[%s605_s1 + $0x18] sm:$0xff]  ;;  %v17_v5 = vld [vmem:[%s606_s0] sm:$0xff]  ;;  %v18_v8 = vld [vmem:[%s606_s0 + $0x8] sm:$0xff] }
   0x3   :  { %v25_v6 = vld [vmem:[%s606_s0 + $0x40] sm:$0xff]  ;;  %v363_v7 = vpack.c.bf16 %v36_v4, %v35_v2  ;;  %335 = vmatprep.mubr.msk.f32.mxu0 %vm44_vm0, %v17_v5  ;;  %v26_v9 = vld [vmem:[%s606_s0 + $0x48] sm:$0xff]  ;;  %v19_v10 = vld [vmem:[%s606_s0 + $0x10] sm:$0xff] }
   0x4   :  { %347 = vmatprep.mubr.msk.f32.mxu1 %vm44_vm0, %v25_v6  ;;  %360 = vmatprep.subr.bf16.mxu0 %v359_v3  ;;  %v27_v11 = vld [vmem:[%s606_s0 + $0x50] sm:$0xff]  ;;  %v20_v12 = vld [vmem:[%s606_s0 + $0x18] sm:$0xff]  ;;  %v21_v14 = vld [vmem:[%s606_s0 + $0x20] sm:$0xff] }
   0x5   :  { %367 = vmatprep.subr.bf16.mxu1 %v359_v3  ;;  %362 = vmatpush3.bf16.msra.mxu0 %v359_v3  ;;  %v28_v13 = vld [vmem:[%s606_s0 + $0x58] sm:$0xff]  ;;  %v29_v15 = vld [vmem:[%s606_s0 + $0x60] sm:$0xff]  ;;  %v22_v16 = vld [vmem:[%s606_s0 + $0x28] sm:$0xff] }
   0x6   :  { %369 = vmatpush3.bf16.msra.mxu1 %v359_v3  ;;  %364 = vmatprep.subr.bf16.mxu0 %v363_v7  ;;  %v30_v17 = vld [vmem:[%s606_s0 + $0x68] sm:$0xff]  ;;  %v23_v18 = vld [vmem:[%s606_s0 + $0x30] sm:$0xff]  ;;  %v24_v20 = vld [vmem:[%s606_s0 + $0x38] sm:$0xff] }
   0x7   :  { %368 = vmatprep.subr.bf16.mxu1 %v363_v7  ;;  %v31_v19 = vld [vmem:[%s606_s0 + $0x70] sm:$0xff]  ;;  %v32_v21 = vld [vmem:[%s606_s0 + $0x78] sm:$0xff]  ;;  %v475_v22 = vld [vmem:[%s607_s2] ss:$0 sm:$0xff] }
   0x8   :  { %v239_v24 = vld [vmem:[%s608_s3 + $0x8] sm:$0xff]  ;;  %v238_v30 = vld [vmem:[%s608_s3] sm:$0xff]  ;;  %v241_v40 = vld [vmem:[%s608_s3 + $0x18] sm:$0xff] }
   0x9   :  { %366 = vmatpush3.bf16.msra.mxu0 %v363_v7  ;;  %v247_v26 = vld [vmem:[%s608_s3 + $0x48] sm:$0xff]  ;;  %v246_v32 = vld [vmem:[%s608_s3 + $0x40] sm:$0xff]  ;;  %v249_v42 = vld [vmem:[%s608_s3 + $0x58] sm:$0xff] }
   0xa   :  { %370 = vmatpush3.bf16.msra.mxu1 %v363_v7  ;;  %v240_v46 = vld [vmem:[%s608_s3 + $0x10] sm:$0xff]  ;;  %v243_v56 = vld [vmem:[%s608_s3 + $0x28] sm:$0xff]  ;;  %v242_v62 = vld [vmem:[%s608_s3 + $0x20] sm:$0xff] }
   0xb   :  { %v248_v48 = vld [vmem:[%s608_s3 + $0x50] sm:$0xff]  ;;  %v251_v58 = vld [vmem:[%s608_s3 + $0x68] sm:$0xff]  ;;  %v250_v0 = vld [vmem:[%s608_s3 + $0x60] sm:$0xff] }
   0xc   :  { %336 = vmatmul.mubr.msk.f32.vlgmr.msra.gmra.mrb[0].mxu0 %vm44_vm0, %v18_v8  ;;  %v245_v8 = vld [vmem:[%s608_s3 + $0x38] sm:$0xff] }
   0xd   :  { %348 = vmatmul.mubr.msk.f32.vlgmr.msra.gmra.mrb[0].mxu1 %vm44_vm0, %v26_v9  ;;  %338 = vmatprep.mubr.msk.f32.mxu0 %vm44_vm0, %v19_v10  ;;  %v253_v10 = vld [vmem:[%s608_s3 + $0x78] sm:$0xff] }
   0xe   :  { %350 = vmatprep.mubr.msk.f32.mxu1 %vm44_vm0, %v27_v11 }
  0x10   :  { %339 = vmatmul.mubr.msk.f32.gmra.mrb[2].mxu0 %vm44_vm0, %v20_v12 }
  0x11   :  { %351 = vmatmul.mubr.msk.f32.gmra.mrb[2].mxu1 %vm44_vm0, %v28_v13  ;;  %341 = vmatprep.mubr.msk.f32.mxu0 %vm44_vm0, %v21_v14  ;;  %v244_v14 = vld [vmem:[%s608_s3 + $0x30] sm:$0xff] }
  0x12   :  { %353 = vmatprep.mubr.msk.f32.mxu1 %vm44_vm0, %v29_v15 }
  0x14   :  { %342 = vmatmul.mubr.msk.f32.gmra.mrb[4].mxu0 %vm44_vm0, %v22_v16  ;;  %v252_v16 = vld [vmem:[%s608_s3 + $0x70] sm:$0xff] }
  0x15   :  { %354 = vmatmul.mubr.msk.f32.gmra.mrb[4].mxu1 %vm44_vm0, %v30_v17  ;;  %344 = vmatprep.mubr.msk.f32.mxu0 %vm44_vm0, %v23_v18 }
  0x16   :  { %356 = vmatprep.mubr.msk.f32.mxu1 %vm44_vm0, %v31_v19 }
  0x18   :  { %345 = vmatmul.mubr.msk.f32.gmra.mrb[6].mxu0 %vm44_vm0, %v24_v20 }
  0x19   :  { %357 = vmatmul.mubr.msk.f32.gmra.mrb[6].mxu1 %vm44_vm0, %v32_v21 }
  0xdf   :  { %v337_v23 = vpop.f32.mrb[0].mxu0 }
  0xe0   :  { %v349_v25 = vpop.f32.mrb[0].mxu1  ;;  %v165_v27 = vadd.f32 %v337_v23, %v475_v22  ;;  %v159_v29 = vpop.f32.mrb[1].mxu0 }
  0xe1   :  { %v205_v28 = vadd.f32 %v349_v25, %v475_v22  ;;  %v199_v31 = vpop.f32.mrb[1].mxu1  ;;  %v160_v33 = vadd.f32 %v475_v22, %v159_v29 }
  0xe2   :  { %v200_v34 = vadd.f32 %v475_v22, %v199_v31  ;;  %v255_v35 = vadd.f32 %v239_v24, %v165_v27 }
  0xe3   :  { %v263_v36 = vadd.f32 %v247_v26, %v205_v28  ;;  %v254_v37 = vadd.f32 %v238_v30, %v160_v33  ;;  %v340_v39 = vpop.f32.mrb[2].mxu0 }
  0xe4   :  { %v262_v38 = vadd.f32 %v246_v32, %v200_v34  ;;  %v352_v41 = vpop.f32.mrb[2].mxu1  ;;  %271 = vst.msk [vmem:[%s609_s4 + $0x8] sm:$0xff] %vm44_vm0, %v255_v35  ;;  %v175_v43 = vadd.f32 %v340_v39, %v475_v22  ;;  %v169_v45 = vpop.f32.mrb[3].mxu0 }
  0xe5   :  { %279 = vst.msk [vmem:[%s609_s4 + $0x48] sm:$0xff] %vm44_vm0, %v263_v36  ;;  %v215_v44 = vadd.f32 %v352_v41, %v475_v22  ;;  %v209_v47 = vpop.f32.mrb[3].mxu1  ;;  %270 = vst.msk [vmem:[%s609_s4] sm:$0xff] %vm44_vm0, %v254_v37  ;;  %v170_v49 = vadd.f32 %v475_v22, %v169_v45 }
  0xe6   :  { %278 = vst.msk [vmem:[%s609_s4 + $0x40] sm:$0xff] %vm44_vm0, %v262_v38  ;;  %v210_v50 = vadd.f32 %v475_v22, %v209_v47  ;;  %v257_v51 = vadd.f32 %v241_v40, %v175_v43 }
  0xe7   :  { %v265_v52 = vadd.f32 %v249_v42, %v215_v44  ;;  %v256_v53 = vadd.f32 %v240_v46, %v170_v49  ;;  %v343_v55 = vpop.f32.mrb[4].mxu0 }
  0xe8   :  { %v264_v54 = vadd.f32 %v248_v48, %v210_v50  ;;  %v355_v57 = vpop.f32.mrb[4].mxu1  ;;  %273 = vst.msk [vmem:[%s609_s4 + $0x18] sm:$0xff] %vm44_vm0, %v257_v51  ;;  %v185_v59 = vadd.f32 %v343_v55, %v475_v22  ;;  %v179_v61 = vpop.f32.mrb[5].mxu0 }
  0xe9   :  { %281 = vst.msk [vmem:[%s609_s4 + $0x58] sm:$0xff] %vm44_vm0, %v265_v52  ;;  %v225_v60 = vadd.f32 %v355_v57, %v475_v22  ;;  %v219_v63 = vpop.f32.mrb[5].mxu1  ;;  %272 = vst.msk [vmem:[%s609_s4 + $0x10] sm:$0xff] %vm44_vm0, %v256_v53  ;;  %v180_v1 = vadd.f32 %v475_v22, %v179_v61 }
  0xea   :  { %280 = vst.msk [vmem:[%s609_s4 + $0x50] sm:$0xff] %vm44_vm0, %v264_v54  ;;  %v220_v2 = vadd.f32 %v475_v22, %v219_v63  ;;  %v259_v3 = vadd.f32 %v243_v56, %v185_v59 }
  0xeb   :  { %v267_v4 = vadd.f32 %v251_v58, %v225_v60  ;;  %v258_v5 = vadd.f32 %v242_v62, %v180_v1  ;;  %v346_v7 = vpop.f32.mrb[6].mxu0 }
  0xec   :  { %v266_v6 = vadd.f32 %v250_v0, %v220_v2  ;;  %v358_v9 = vpop.f32.mrb[6].mxu1  ;;  %275 = vst.msk [vmem:[%s609_s4 + $0x28] sm:$0xff] %vm44_vm0, %v259_v3  ;;  %v195_v11 = vadd.f32 %v346_v7, %v475_v22  ;;  %v189_v13 = vpop.f32.mrb[7].mxu0 }
  0xed   :  { %283 = vst.msk [vmem:[%s609_s4 + $0x68] sm:$0xff] %vm44_vm0, %v267_v4  ;;  %v235_v12 = vadd.f32 %v358_v9, %v475_v22  ;;  %v229_v15 = vpop.f32.mrb[7].mxu1  ;;  %274 = vst.msk [vmem:[%s609_s4 + $0x20] sm:$0xff] %vm44_vm0, %v258_v5  ;;  %v190_v17 = vadd.f32 %v475_v22, %v189_v13 }
  0xee   :  { %282 = vst.msk [vmem:[%s609_s4 + $0x60] sm:$0xff] %vm44_vm0, %v266_v6  ;;  %v230_v18 = vadd.f32 %v475_v22, %v229_v15  ;;  %v261_v19 = vadd.f32 %v245_v8, %v195_v11 }
  0xef   :  { %v269_v20 = vadd.f32 %v253_v10, %v235_v12  ;;  %v260_v21 = vadd.f32 %v244_v14, %v190_v17 }
  0xf0   :  { %v268_v23 = vadd.f32 %v252_v16, %v230_v18  ;;  %277 = vst.msk [vmem:[%s609_s4 + $0x38] sm:$0xff] %vm44_vm0, %v261_v19 }
  0xf1   :  { %285 = vst.msk [vmem:[%s609_s4 + $0x78] sm:$0xff] %vm44_vm0, %v269_v20  ;;  %276 = vst.msk [vmem:[%s609_s4 + $0x30] sm:$0xff] %vm44_vm0, %v260_v21 }
  0xf2   :  { %284 = vst.msk [vmem:[%s609_s4 + $0x70] sm:$0xff] %vm44_vm0, %v268_v23 }

// kernel: mix_transformer_stage_forward.27
= control target key start
LH: loop header
LB: loop body
LE: loop exit
PB: predicated region body
PF: predicated region fallthrough
CT: control target
= control target key end

     0   :  { %s1414_s9 = smov 0   ;;  %s1416_s10 = smov 0   ;;  %s1623_s0 = inlined_call_operand.vmem [shape: f32[2,64,32], index: 0, kind: input, shape index: {}]   ;;  %s1624_s1 = inlined_call_operand.vmem [shape: f32[2,16,64], index: 1, kind: input, shape index: {}]   ;;  %s1625_s2 = inlined_call_operand.vmem [shape: f32[2,64,32], index: 2, kind: output, shape index: {}]  }
   0x1   :  { %s1418_s11 = smov 0  }
   0x2 LB: > { %s24_s12 = sadd.s32 1, %s1389_s10  ;;  %p1092_p0 = scmp.ge.s32.totalorder %s1393_s11, 1  ;;  %s1393_s11 = sphi %s1418_s11, %s12_s11   ;;  %s1389_s10 = sphi %s1416_s10, %s1629_s10   ;;  %s1385_s9 = sphi %s1414_s9, %s1628_s9  }
   0x3   : > { %p26_p1 = scmp.ge.s32.totalorder %s24_s12, 2  ;;  %p143_p2 = scmp.lt.s32.totalorder %s1393_s11, 3 }
   0x5   : > { %s1631_s12 = smov (%p26_p1, %s24_s12), 0  ;;  %p144_p3 = pnand %p1092_p0, %p143_p2 }
   0x6   : > { %p179_p4 = scmp.lt.s32.totalorder (!%p144_p3), %s1385_s9, 1  ;;  %vm213_vm0 = vcmask (!%p144_p3), 130048   ;;  %s1395_s21 = smov (!%p144_p3), 112   ;;  %vm980_vm2 = vcmask (!%p144_p3), 261120  }
   0x7   : > { %147 = sbr.rel (%p144_p3) target bundleno = 1156 (0x484), region = 28  ;;  %vm1446_vm1 = vmpackc.low (!%p144_p3), %vm213_vm0, %vm213_vm0  ;;  %s1396_s22 = smov (!%p144_p3), 96  }
   0x8   : > { %s1397_s23 = smov (!%p144_p3), 80   ;;  %s1398_s24 = smov (!%p144_p3), 16  }
   0xe   : > { %s1633_s9 = smov (!%p179_p4, %s1385_s9), 1 }
   0xf   : > { %s1137_s13 = sshll.u32 %s1633_s9, 6  ;;  %s1138_s14 = sshll.u32 %s1633_s9, 4 }
  0x10   : > { %s186_s17 = scalar_lea.vmem %s1623_s0, %s1137_s13  ;;  %s192_s20 = scalar_lea.vmem %s1624_s1, %s1138_s14 }
  0x11   : > { %v211_v1 = vld [vmem:[%s192_s20] sm:$0xff]  ;;  %v212_v2 = vld [vmem:[%s192_s20 + $0x8] sm:$0xff]  ;;  %v205_v6 = vld [vmem:[%s186_s17 + $0x10] sm:$0xff]  ;;  %s1580_s27 = scalar_lea.vmem %s1625_s2, %s1137_s13 }
  0x12   : > { %v203_v3 = vld [vmem:[%s186_s17] sm:$0xff]  ;;  %v1244_v4 = vpack.c.bf16 %v212_v2, %v211_v1  ;;  %v204_v5 = vld [vmem:[%s186_s17 + $0x8] sm:$0xff]  ;;  %v206_v7 = vld [vmem:[%s186_s17 + $0x18] sm:$0xff]  ;;  %v1470_v28 = vpack.i.bf16 %v212_v2, %v211_v1 }
  0x13   : > { %1184 = vmatprep.mubr.msk.f32.mxu0 %vm213_vm0, %v203_v3  ;;  %v207_v8 = vld [vmem:[%s186_s17 + $0x20] sm:$0xff]  ;;  %v208_v9 = vld [vmem:[%s186_s17 + $0x28] sm:$0xff]  ;;  %v209_v10 = vld [vmem:[%s186_s17 + $0x30] sm:$0xff] }
  0x14   : > { %1246 = vmatprep.subr.msk.bf16.mxu0 %vm1446_vm1, %v1244_v4  ;;  %v210_v11 = vld [vmem:[%s186_s17 + $0x38] sm:$0xff] }
  0x15   : > { %1249 = vmatpush3.bf16.xpose.msk.msra.mxu0 %vm1446_vm1, %v1244_v4 }
  0x1c   : > { %1185 = vmatmul.mubr.msk.f32.vlgmr.msra.gmra.mrb[0].mxu0 %vm213_vm0, %v204_v5 }
  0x1d   : > { %1187 = vmatprep.mubr.msk.f32.mxu0 %vm213_vm0, %v205_v6 }
  0x20   : > { %1188 = vmatmul.mubr.msk.f32.gmra.mrb[2].mxu0 %vm213_vm0, %v206_v7 }
  0x21   : > { %1190 = vmatprep.mubr.msk.f32.mxu0 %vm213_vm0, %v207_v8 }
  0x24   : > { %1191 = vmatmul.mubr.msk.f32.gmra.mrb[4].mxu0 %vm213_vm0, %v208_v9 }
  0x25   : > { %1193 = vmatprep.mubr.msk.f32.mxu0 %vm213_vm0, %v209_v10 }
  0x28   : > { %1194 = vmatmul.mubr.msk.f32.gmra.mrb[6].mxu0 %vm213_vm0, %v210_v11 }
  0xef   : > { %v1186_v12 = vpop.f32.mrb[0].mxu0 }
  0xf0   : > { %v310_v13 = vpop.f32.mrb[1].mxu0  ;;  %v352_v14 = vsel %vm213_vm0, %v1186_v12, -inf }
  0xf1   : > { %353 = vmax.xlane.f32.xlu0 %v352_v14  ;;  %v349_v17 = vsel %vm213_vm0, %v310_v13, -inf }
  0xf3   : > { %v1189_v15 = vpop.f32.mrb[2].mxu0 }
  0xf4   : > { %v320_v16 = vpop.f32.mrb[3].mxu0  ;;  %v358_v18 = vsel %vm213_vm0, %v1189_v15, -inf }
  0xf5   : > { %350 = vmax.xlane.f32.xlu0 %v349_v17  ;;  %359 = vmax.xlane.f32.xlu1 %v358_v18  ;;  %v355_v21 = vsel %vm213_vm0, %v320_v16, -inf }
  0xf7   : > { %v1192_v19 = vpop.f32.mrb[4].mxu0 }
  0xf8   : > { %v330_v20 = vpop.f32.mrb[5].mxu0  ;;  %v364_v25 = vsel %vm213_vm0, %v1192_v19, -inf }
  0xf9   : > { %356 = vmax.xlane.f32.xlu1 %v355_v21  ;;  %v361_v22 = vsel %vm213_vm0, %v330_v20, -inf }
  0xfa   : > { %362 = vmax.xlane.f32.xlu0 %v361_v22 }
  0xfb   : > { %v1195_v23 = vpop.f32.mrb[6].mxu0 }
  0xfc   : > { %v340_v24 = vpop.f32.mrb[7].mxu0  ;;  %v370_v27 = vsel %vm213_vm0, %v1195_v23, -inf }
  0xfd   : > { %365 = vmax.xlane.f32.xlu1 %v364_v25  ;;  %v367_v26 = vsel %vm213_vm0, %v340_v24, -inf }
  0xfe   : > { %368 = vmax.xlane.f32.xlu0 %v367_v26 }
 0x101   : > { %371 = vmax.xlane.f32.xlu1 %v370_v27 }
 0x112   : > { %1298 = vrot.lane.b32.xlu1 %v1470_v28, %s1395_s21 }
 0x114   : > { %1293 = vrot.lane.b32.xlu0 %v1470_v28, %s1396_s22 }
 0x116   : > { %572 = vrot.lane.b32.xlu1 %v203_v3, %s1395_s21 }
 0x118   : > { %576 = vrot.lane.b32.xlu0 %v205_v6, %s1395_s21 }
 0x11a   : > { %574 = vrot.lane.b32.xlu1 %v204_v5, %s1395_s21 }
 0x11c   : > { %580 = vrot.lane.b32.xlu0 %v207_v8, %s1395_s21 }
 0x11e   : > { %578 = vrot.lane.b32.xlu1 %v206_v7, %s1395_s21 }
 0x120   : > { %584 = vrot.lane.b32.xlu0 %v209_v10, %s1395_s21 }
 0x122   : > { %582 = vrot.lane.b32.xlu1 %v208_v9, %s1395_s21 }
 0x126   : > { %586 = vrot.lane.b32.xlu1 %v210_v11, %s1395_s21 }
 0x17e   : > { %v354_v29 = vpop.xlane.xlu0 %353 }
 0x17f   : > { %v374_v33 = vsub.f32 %v1186_v12, %v354_v29 }
 0x181   : > { %v383_v38 = vmul.f32 1.442695, %v374_v33 }
 0x182   : > { %v351_v30 = vpop.xlane.xlu0 %350  ;;  %v360_v31 = vpop.xlane.xlu1 %359 }
 0x183   : > { %v373_v32 = vsub.f32 %v310_v13, %v351_v30  ;;  %v376_v39 = vsub.f32 %v1189_v15, %v360_v31 }
 0x185   : > { %v381_v34 = vmul.f32 1.442695, %v373_v32  ;;  %v387_v44 = vmul.f32 1.442695, %v376_v39 }
 0x186   : > { %v357_v35 = vpop.xlane.xlu1 %356 }
 0x187   : > { %1307 = vpow2.f32 %v381_v34  ;;  %v375_v36 = vsub.f32 %v320_v16, %v357_v35  ;;  %v363_v37 = vpop.xlane.xlu0 %362 }
 0x188   : > { %v377_v41 = vsub.f32 %v330_v20, %v363_v37  ;;  %1309 = vpow2.f32 %v383_v38 }
 0x189   : > { %v385_v40 = vmul.f32 1.442695, %v375_v36 }
 0x18a   : > { %v366_v42 = vpop.xlane.xlu1 %365  ;;  %v389_v46 = vmul.f32 1.442695, %v377_v41 }
 0x18b   : > { %v369_v43 = vpop.xlane.xlu0 %368  ;;  %v378_v45 = vsub.f32 %v1192_v19, %v366_v42  ;;  %1311 = vpow2.f32 %v385_v40 }
 0x18c   : > { %v379_v47 = vsub.f32 %v340_v24, %v369_v43  ;;  %1313 = vpow2.f32 %v387_v44 }
 0x18d   : > { %v391_v53 = vmul.f32 1.442695, %v378_v45  ;;  %1315 = vpow2.f32 %v389_v46 }
 0x18e   : > { %v372_v48 = vpop.xlane.xlu1 %371  ;;  %v393_v55 = vmul.f32 1.442695, %v379_v47 }
 0x18f   : > { %v1294_v49 = vpop.permute.xlu0 %1293  ;;  %v380_v54 = vsub.f32 %v1195_v23, %v372_v48  ;;  %1317 = vpow2.f32 %v391_v53 }
 0x190   : > { %v1296_v50 = vunpack.i.h.bf16 %v1294_v49  ;;  %v1295_v51 = vunpack.i.l.bf16 %v1294_v49  ;;  %1319 = vpow2.f32 %v393_v55 }
 0x191   : > { %v1474_v52 = vpop.eup %1307  ;;  %v395_v60 = vmul.f32 1.442695, %v380_v54 }
 0x192   : > { %1200 = vmatprep.mubr.msk.f32.mxu1 %vm213_vm0, %v1474_v52  ;;  %v1250_v56 = vpack.c.bf16 %v1296_v50, %v1295_v51  ;;  %v1299_v57 = vpop.permute.xlu1 %1298  ;;  %v1478_v62 = vpop.eup %1309 }
 0x193   : > { %v1301_v58 = vunpack.i.h.bf16 %v1299_v57  ;;  %v1300_v59 = vunpack.i.l.bf16 %v1299_v57  ;;  %1321 = vpow2.f32 %v395_v60  ;;  %v577_v7 = vpop.permute.xlu0 %576 }
 0x194   : > { %1251 = vmatprep.subr.bf16.mxu1 %v1250_v56 }
 0x195   : > { %1253 = vmatpush3.bf16.msra.mxu1 %v1250_v56  ;;  %v1254_v61 = vpack.c.bf16 %v1301_v58, %v1300_v59  ;;  %v1482_v63 = vpop.eup %1311 }
 0x196   : > { %v573_v1 = vpop.permute.xlu1 %572  ;;  %v1488_v2 = vpop.eup %1313 }
 0x197   : > { %1256 = vmatprep.subr.msk.bf16.mxu1 %vm1446_vm1, %v1254_v61  ;;  %v1490_v3 = vpop.eup %1315  ;;  %v581_v9 = vpop.permute.xlu0 %580 }
 0x198   : > { %1201 = vmatmul.mubr.msk.f32.vlgmr.msra.gmra.mrb[0].mxu1 %vm213_vm0, %v1478_v62 }
 0x199   : > { %1203 = vmatprep.mubr.msk.f32.mxu1 %vm213_vm0, %v1482_v63  ;;  %v1498_v4 = vpop.eup %1317 }
 0x19a   : > { %v575_v5 = vpop.permute.xlu1 %574  ;;  %v1500_v6 = vpop.eup %1319 }
 0x19b   : > { %v585_v11 = vpop.permute.xlu0 %584 }
 0x19c   : > { %1204 = vmatmul.mubr.msk.f32.gmra.mrb[2].mxu1 %vm213_vm0, %v1488_v2 }
 0x19d   : > { %1206 = vmatprep.mubr.msk.f32.mxu1 %vm213_vm0, %v1490_v3  ;;  %v1506_v8 = vpop.eup %1321 }
 0x19e   : > { %1259 = vmatpush3.bf16.xpose.msk.msra.mxu1 %vm1446_vm1, %v1254_v61  ;;  %v579_v0 = vpop.permute.xlu1 %578 }
 0x1a0   : > { %1207 = vmatmul.mubr.msk.f32.gmra.mrb[4].mxu1 %vm213_vm0, %v1498_v4 }
 0x1a1   : > { %1209 = vmatprep.mubr.msk.f32.mxu1 %vm213_vm0, %v1500_v6 }
 0x1a2   : > { %v583_v10 = vpop.permute.xlu1 %582 }
 0x1a4   : > { %1210 = vmatmul.mubr.msk.f32.gmra.mrb[6].mxu1 %vm213_vm0, %v1506_v8 }
 0x1a5   : > { %1216 = vmatprep.mubr.msk.f32.mxu1 %vm213_vm0, %v573_v1 }
 0x1a6   : > { %v587_v12 = vpop.permute.xlu1 %586 }
 0x1a8   : > { %1217 = vmatmul.mubr.msk.f32.vlgmr.msra.gmra.mrb[8].mxu1 %vm213_vm0, %v575_v5 }
 0x1a9   : > { %1219 = vmatprep.mubr.msk.f32.mxu1 %vm213_vm0, %v577_v7 }
 0x1ac   : > { %1220 = vmatmul.mubr.msk.f32.gmra.mrb[10].mxu1 %vm213_vm0, %v579_v0 }
 0x1ad   : > { %1222 = vmatprep.mubr.msk.f32.mxu1 %vm213_vm0, %v581_v9 }
 0x1b0   : > { %1223 = vmatmul.mubr.msk.f32.gmra.mrb[12].mxu1 %vm213_vm0, %v583_v10 }
 0x1b1   : > { %1225 = vmatprep.mubr.msk.f32.mxu1 %vm213_vm0, %v585_v11 }
 0x1b4   : > { %1226 = vmatmul.mubr.msk.f32.gmra.mrb[14].mxu1 %vm213_vm0, %v587_v12 }
 0x26b   : > { %v1518_v13 = vpop.f32.mrb[0].mxu1 }
 0x26c   : > { %v1520_v14 = vpop.f32.mrb[1].mxu1 }
 0x26f   : > { %v1522_v15 = vpop.f32.mrb[2].mxu1 }
 0x270   : > { %v1524_v16 = vpop.f32.mrb[3].mxu1 }
 0x273   : > { %v1526_v17 = vpop.f32.mrb[4].mxu1 }
 0x274   : > { %v1528_v18 = vpop.f32.mrb[5].mxu1 }
 0x277   : > { %v1530_v19 = vpop.f32.mrb[6].mxu1 }
 0x278   : > { %v1532_v20 = vpop.f32.mrb[7].mxu1 }
 0x27b   : > { %v1218_v21 = vpop.f32.mrb[8].mxu1 }
 0x27c   : > { %v678_v22 = vpop.f32.mrb[9].mxu1  ;;  %v720_v23 = vsel %vm213_vm0, %v1218_v21, -inf }
 0x27d   : > { %721 = vmax.xlane.f32.xlu1 %v720_v23  ;;  %v717_v24 = vsel %vm213_vm0, %v678_v22, -inf }
 0x27e   : > { %718 = vmax.xlane.f32.xlu0 %v717_v24 }
 0x27f   : > { %v1221_v25 = vpop.f32.mrb[10].mxu1 }
 0x280   : > { %v688_v26 = vpop.f32.mrb[11].mxu1  ;;  %v726_v27 = vsel %vm213_vm0, %v1221_v25, -inf }
 0x281   : > { %v723_v32 = vsel %vm213_vm0, %v688_v26, -inf }
 0x282   : > { %727 = vmax.xlane.f32.xlu0 %v726_v27 }
 0x283   : > { %v1224_v29 = vpop.f32.mrb[12].mxu1 }
 0x284   : > { %v732_v30 = vsel %vm213_vm0, %v1224_v29, -inf  ;;  %v698_v31 = vpop.f32.mrb[13].mxu1 }
 0x285   : > { %733 = vmax.xlane.f32.xlu1 %v732_v30  ;;  %v729_v34 = vsel %vm213_vm0, %v698_v31, -inf }
 0x286   : > { %724 = vmax.xlane.f32.xlu0 %v723_v32 }
 0x287   : > { %v1227_v33 = vpop.f32.mrb[14].mxu1 }
 0x288   : > { %v738_v35 = vsel %vm213_vm0, %v1227_v33, -inf  ;;  %v708_v36 = vpop.f32.mrb[15].mxu1 }
 0x289   : > { %739 = vmax.xlane.f32.xlu1 %v738_v35  ;;  %v735_v37 = vsel %vm213_vm0, %v708_v36, -inf  ;;  %v397_v35 = vsel %vm213_vm0, %v1474_v52, 0.0  ;;  %v412_v52 = vsel %vm213_vm0, %v1498_v4, 0.0 }
 0x28a   : > { %730 = vmax.xlane.f32.xlu0 %v729_v34 }
 0x28e   : > { %736 = vmax.xlane.f32.xlu0 %v735_v37  ;;  %v406_v37 = vsel %vm213_vm0, %v1488_v2, 0.0 }
 0x2a4   : > { %1303 = vrot.lane.b32.xlu0 %v1470_v28, %s1397_s23 }
 0x30a   : > { %v722_v38 = vpop.xlane.xlu1 %721 }
 0x30b   : > { %v742_v39 = vsub.f32 %v1218_v21, %v722_v38  ;;  %v719_v40 = vpop.xlane.xlu0 %718  ;;  %v409_v38 = vsel %vm213_vm0, %v1490_v3, 0.0 }
 0x30c   : > { %v741_v41 = vsub.f32 %v678_v22, %v719_v40 }
 0x30d   : > { %v751_v42 = vmul.f32 1.442695, %v742_v39 }
 0x30e   : > { %v749_v43 = vmul.f32 1.442695, %v741_v41 }
 0x30f   : > { %1323 = vpow2.f32 %v751_v42  ;;  %v728_v44 = vpop.xlane.xlu0 %727 }
 0x310   : > { %1325 = vpow2.f32 %v749_v43  ;;  %v744_v45 = vsub.f32 %v1221_v25, %v728_v44 }
 0x312   : > { %v755_v46 = vmul.f32 1.442695, %v744_v45  ;;  %v734_v47 = vpop.xlane.xlu1 %733 }
 0x313   : > { %v725_v48 = vpop.xlane.xlu0 %724  ;;  %v746_v50 = vsub.f32 %v1224_v29, %v734_v47 }
 0x314   : > { %v743_v49 = vsub.f32 %v688_v26, %v725_v48  ;;  %1327 = vpow2.f32 %v755_v46 }
 0x315   : > { %v759_v28 = vmul.f32 1.442695, %v746_v50 }
 0x316   : > { %v753_v51 = vmul.f32 1.442695, %v743_v49  ;;  %v740_v57 = vpop.xlane.xlu1 %739 }
 0x317   : > { %v731_v53 = vpop.xlane.xlu0 %730  ;;  %v748_v61 = vsub.f32 %v1227_v33, %v740_v57  ;;  %v418_v33 = vsel %vm213_vm0, %v1506_v8, 0.0  ;;  %v403_v8 = vsel %vm213_vm0, %v1482_v63, 0.0 }
 0x318   : > { %1329 = vpow2.f32 %v753_v51  ;;  %v745_v55 = vsub.f32 %v698_v31, %v731_v53 }
 0x319   : > { %v1324_v54 = vpop.eup %1323  ;;  %1331 = vpow2.f32 %v759_v28  ;;  %v763_v12 = vmul.f32 1.442695, %v748_v61 }
 0x31a   : > { %v1326_v56 = vpop.eup %1325  ;;  %v768_v58 = vsel %vm213_vm0, %v1324_v54, 0.0  ;;  %v757_v1 = vmul.f32 1.442695, %v745_v55 }
 0x31b   : > { %1232 = vmatprep.mubr.msk.f32.mxu0 %vm213_vm0, %v1326_v56  ;;  %769 = vadd.xlane.f32.xlu1 %v768_v58  ;;  %v737_v59 = vpop.xlane.xlu0 %736  ;;  %v765_v7 = vsel %vm213_vm0, %v1326_v56, 0.0 }
 0x31c   : > { %v747_v60 = vsub.f32 %v708_v36, %v737_v59  ;;  %v400_v36 = vsel %vm213_vm0, %v1478_v62, 0.0  ;;  %v415_v62 = vsel %vm213_vm0, %v1500_v6, 0.0 }
 0x31e   : > { %v761_v5 = vmul.f32 1.442695, %v747_v60  ;;  %v1328_v0 = vpop.eup %1327 }
 0x31f   : > { %766 = vadd.xlane.f32.xlu1 %v765_v7  ;;  %v1304_v9 = vpop.permute.xlu0 %1303  ;;  %v774_v22 = vsel %vm213_vm0, %v1328_v0, 0.0 }
 0x320   : > { %1333 = vpow2.f32 %v761_v5  ;;  %v1306_v10 = vunpack.i.h.bf16 %v1304_v9  ;;  %v1305_v11 = vunpack.i.l.bf16 %v1304_v9 }
 0x321   : > { %1335 = vpow2.f32 %v757_v1 }
 0x322   : > { %v1260_v21 = vpack.c.bf16 %v1306_v10, %v1305_v11  ;;  %v1330_v23 = vpop.eup %1329  ;;  %1337 = vpow2.f32 %v763_v12 }
 0x323   : > { %775 = vadd.xlane.f32.xlu1 %v774_v22  ;;  %v771_v24 = vsel %vm213_vm0, %v1330_v23, 0.0  ;;  %v1332_v25 = vpop.eup %1331 }
 0x324   : > { %1261 = vmatprep.subr.bf16.mxu0 %v1260_v21  ;;  %v780_v27 = vsel %vm213_vm0, %v1332_v25, 0.0 }
 0x325   : > { %1263 = vmatpush3.bf16.msra.mxu0 %v1260_v21 }
 0x327   : > { %772 = vadd.xlane.f32.xlu1 %v771_v24 }
 0x328   : > { %1233 = vmatmul.mubr.msk.f32.vlgmr.msra.gmra.mrb[8].mxu0 %vm213_vm0, %v1324_v54 }
 0x329   : > { %1235 = vmatprep.mubr.msk.f32.mxu0 %vm213_vm0, %v1330_v23 }
 0x32a   : > { %v1334_v26 = vpop.eup %1333 }
 0x32b   : > { %v1336_v29 = vpop.eup %1335  ;;  %781 = vadd.xlane.f32.xlu1 %v780_v27  ;;  %v783_v30 = vsel %vm213_vm0, %v1334_v26, 0.0 }
 0x32c   : > { %784 = vadd.xlane.f32.xlu0 %v783_v30  ;;  %1236 = vmatmul.mubr.msk.f32.gmra.mrb[10].mxu0 %vm213_vm0, %v1328_v0  ;;  %v777_v31 = vsel %vm213_vm0, %v1336_v29, 0.0  ;;  %v1338_v32 = vpop.eup %1337 }
 0x32d   : > { %1238 = vmatprep.mubr.msk.f32.mxu0 %vm213_vm0, %v1336_v29  ;;  %v786_v34 = vsel %vm213_vm0, %v1338_v32, 0.0 }
 0x32f   : > { %778 = vadd.xlane.f32.xlu1 %v777_v31 }
 0x330   : > { %419 = vadd.xlane.f32.xlu0 %v418_v33  ;;  %1239 = vmatmul.mubr.msk.f32.gmra.mrb[12].mxu0 %vm213_vm0, %v1332_v25 }
 0x331   : > { %1241 = vmatprep.mubr.msk.f32.mxu0 %vm213_vm0, %v1334_v26 }
 0x333   : > { %787 = vadd.xlane.f32.xlu1 %v786_v34 }
 0x334   : > { %1242 = vmatmul.mubr.msk.f32.gmra.mrb[14].mxu0 %vm213_vm0, %v1338_v32 }
 0x337   : > { %398 = vadd.xlane.f32.xlu1 %v397_v35 }
 0x33b   : > { %401 = vadd.xlane.f32.xlu1 %v400_v36 }
 0x33f   : > { %404 = vadd.xlane.f32.xlu1 %v403_v8 }
 0x343   : > { %407 = vadd.xlane.f32.xlu1 %v406_v37 }
 0x347   : > { %410 = vadd.xlane.f32.xlu1 %v409_v38 }
 0x34b   : > { %413 = vadd.xlane.f32.xlu1 %v412_v52 }
 0x34f   : > { %416 = vadd.xlane.f32.xlu1 %v415_v62 }
 0x3a8   : > { %v770_v39 = vpop.xlane.xlu1 %769 }
 0x3a9   : > { %1339 = vrcp.f32 %v770_v39 }
 0x3ac   : > { %v767_v40 = vpop.xlane.xlu1 %766 }
 0x3ad   : > { %1341 = vrcp.f32 %v767_v40 }
 0x3b0   : > { %v776_v63 = vpop.xlane.xlu1 %775 }
 0x3b1   : > { %1343 = vrcp.f32 %v776_v63 }
 0x3b3   : > { %v1340_v3 = vpop.eup %1339 }
 0x3b4   : > { %v773_v41 = vpop.xlane.xlu1 %772 }
 0x3b5   : > { %1345 = vrcp.f32 %v773_v41 }
 0x3b7   : > { %v1342_v4 = vpop.eup %1341 }
 0x3b8   : > { %v782_v42 = vpop.xlane.xlu1 %781 }
 0x3b9   : > { %v785_v43 = vpop.xlane.xlu0 %784 }
 0x3bb   : > { %v1344_v47 = vpop.eup %1343 }
 0x3bc   : > { %v779_v2 = vpop.xlane.xlu1 %778 }
 0x3bd   : > { %1347 = vrcp.f32 %v779_v2  ;;  %v420_v24 = vpop.xlane.xlu0 %419 }
 0x3be   : > { %1349 = vrcp.f32 %v782_v42 }
 0x3bf   : > { %1351 = vrcp.f32 %v785_v43  ;;  %v1346_v53 = vpop.eup %1345 }
 0x3c0   : > { %v788_v48 = vpop.xlane.xlu1 %787 }
 0x3c1   : > { %1353 = vrcp.f32 %v788_v48 }
 0x3c4   : > { %v399_v9 = vpop.xlane.xlu1 %398 }
 0x3c7   : > { %v1348_v28 = vpop.eup %1347 }
 0x3c8   : > { %v1350_v58 = vpop.eup %1349  ;;  %v402_v10 = vpop.xlane.xlu1 %401 }
 0x3c9   : > { %v1352_v60 = vpop.eup %1351  ;;  %1355 = vrcp.f32 %v402_v10 }
 0x3ca   : > { %1357 = vrcp.f32 %v399_v9 }
 0x3cb   : > { %v1354_v7 = vpop.eup %1353 }
 0x3cc   : > { %v405_v11 = vpop.xlane.xlu1 %404 }
 0x3d0   : > { %v408_v12 = vpop.xlane.xlu1 %407 }
 0x3d1   : > { %1359 = vrcp.f32 %v408_v12 }
 0x3d2   : > { %1361 = vrcp.f32 %v405_v11 }
 0x3d3   : > { %v1356_v23 = vpop.eup %1355 }
 0x3d4   : > { %v411_v21 = vpop.xlane.xlu1 %410  ;;  %v1358_v26 = vpop.eup %1357  ;;  %v565_v27 = vmul.f32 %v1356_v23, %v1518_v13 }
 0x3d5   : > { %1363 = vrcp.f32 %v411_v21  ;;  %v564_v30 = vmul.f32 %v1358_v26, %v1520_v14 }
 0x3d8   : > { %v414_v22 = vpop.xlane.xlu1 %413 }
 0x3d9   : > { %1365 = vrcp.f32 %v414_v22 }
 0x3db   : > { %v1360_v31 = vpop.eup %1359 }
 0x3dc   : > { %v417_v25 = vpop.xlane.xlu1 %416  ;;  %v1362_v35 = vpop.eup %1361  ;;  %v567_v13 = vmul.f32 %v1360_v31, %v1522_v15 }
 0x3dd   : > { %1367 = vrcp.f32 %v417_v25  ;;  %v566_v38 = vmul.f32 %v1362_v35, %v1524_v16 }
 0x3de   : > { %1369 = vrcp.f32 %v420_v24 }
 0x3df   : > { %v1364_v36 = vpop.eup %1363 }
 0x3e0   : > { %v568_v52 = vmul.f32 %v1364_v36, %v1528_v18 }
 0x3e3   : > { %v1366_v37 = vpop.eup %1365 }
 0x3e4   : > { %v569_v41 = vmul.f32 %v1366_v37, %v1526_v17 }
 0x3e7   : > { %v1368_v62 = vpop.eup %1367 }
 0x3e8   : > { %v570_v16 = vmul.f32 %v1368_v62, %v1532_v20  ;;  %v1370_v42 = vpop.eup %1369 }
 0x3fb   : > { %v1234_v44 = vpop.f32.mrb[8].mxu0 }
 0x3fc   : > { %v933_v45 = vmul.f32 %v1340_v3, %v1234_v44  ;;  %v893_v46 = vpop.f32.mrb[9].mxu0  ;;  %v571_v44 = vmul.f32 %v1370_v42, %v1530_v19 }
 0x3fd   : > { %v932_v6 = vmul.f32 %v1342_v4, %v893_v46 }
 0x3fe   : > { %950 = vrot.lane.b32.xlu0 %v933_v45, %s1398_s24 }
 0x3ff   : > { %948 = vrot.lane.b32.xlu1 %v932_v6, %s1398_s24  ;;  %v1237_v49 = vpop.f32.mrb[10].mxu0 }
 0x400   : > { %v935_v50 = vmul.f32 %v1344_v47, %v1237_v49  ;;  %v903_v51 = vpop.f32.mrb[11].mxu0 }
 0x401   : > { %v934_v56 = vmul.f32 %v1346_v53, %v903_v51 }
 0x403   : > { %954 = vrot.lane.b32.xlu1 %v935_v50, %s1398_s24  ;;  %v1240_v54 = vpop.f32.mrb[12].mxu0 }
 0x404   : > { %v913_v55 = vpop.f32.mrb[13].mxu0  ;;  %v937_v1 = vmul.f32 %v1350_v58, %v1240_v54 }
 0x405   : > { %v936_v57 = vmul.f32 %v1348_v28, %v913_v55 }
 0x407   : > { %952 = vrot.lane.b32.xlu1 %v934_v56, %s1398_s24  ;;  %956 = vrot.lane.b32.xlu0 %v936_v57, %s1398_s24  ;;  %v1243_v59 = vpop.f32.mrb[14].mxu0 }
 0x408   : > { %v923_v61 = vpop.f32.mrb[15].mxu0  ;;  %v939_v0 = vmul.f32 %v1354_v7, %v1243_v59 }
 0x409   : > { %v938_v5 = vmul.f32 %v1352_v60, %v923_v61 }
 0x40b   : > { %958 = vrot.lane.b32.xlu1 %v937_v1, %s1398_s24  ;;  %960 = vrot.lane.b32.xlu0 %v938_v5, %s1398_s24 }
 0x40f   : > { %962 = vrot.lane.b32.xlu1 %v939_v0, %s1398_s24 }
 0x470   : > { %v951_v29 = vpop.permute.xlu0 %950 }
 0x471   : > { %v973_v32 = vsel %vm213_vm0, %v565_v27, %v951_v29  ;;  %v949_v33 = vpop.permute.xlu1 %948 }
 0x472   : > { %982 = vst.msk [vmem:[%s1580_s27 + $0x8] sm:$0xff] %vm980_vm2, %v973_v32  ;;  %v972_v34 = vsel %vm213_vm0, %v564_v30, %v949_v33 }
 0x473   : > { %981 = vst.msk [vmem:[%s1580_s27] sm:$0xff] %vm980_vm2, %v972_v34 }
 0x475   : > { %v955_v8 = vpop.permute.xlu1 %954 }
 0x476   : > { %v975_v14 = vsel %vm213_vm0, %v567_v13, %v955_v8 }
 0x477   : > { %984 = vst.msk [vmem:[%s1580_s27 + $0x18] sm:$0xff] %vm980_vm2, %v975_v14 }
 0x479   : > { %v953_v39 = vpop.permute.xlu1 %952  ;;  %v957_v40 = vpop.permute.xlu0 %956 }
 0x47a   : > { %v974_v63 = vsel %vm213_vm0, %v566_v38, %v953_v39  ;;  %v976_v15 = vsel %vm213_vm0, %v568_v52, %v957_v40 }
 0x47b   : > { %983 = vst.msk [vmem:[%s1580_s27 + $0x10] sm:$0xff] %vm980_vm2, %v974_v63  ;;  %985 = vst.msk [vmem:[%s1580_s27 + $0x20] sm:$0xff] %vm980_vm2, %v976_v15 }
 0x47d   : > { %v959_v2 = vpop.permute.xlu1 %958  ;;  %v961_v18 = vpop.permute.xlu0 %960 }
 0x47e   : > { %v977_v3 = vsel %vm213_vm0, %v569_v41, %v959_v2  ;;  %v978_v43 = vsel %vm213_vm0, %v570_v16, %v961_v18 }
 0x47f   : > { %986 = vst.msk [vmem:[%s1580_s27 + $0x28] sm:$0xff] %vm980_vm2, %v977_v3  ;;  %987 = vst.msk [vmem:[%s1580_s27 + $0x30] sm:$0xff] %vm980_vm2, %v978_v43 }
 0x481   : > { %v963_v4 = vpop.permute.xlu1 %962 }
 0x482   : > { %v979_v45 = vsel %vm213_vm0, %v571_v44, %v963_v4 }
 0x483   : > { %988 = vst.msk [vmem:[%s1580_s27 + $0x38] sm:$0xff] %vm980_vm2, %v979_v45 }
 0x484 PF: > { %s12_s11 = sadd.s32 1, %s1393_s11   ;;  %s1628_s9 = smov %s1389_s10 }
 0x485   : > { %p9_p5 = scmp.ge.s32.totalorder %s12_s11, 4   ;;  %s1629_s10 = smov %s1631_s12 }
 0x487   :  { %11 = sbr.rel (!%p9_p5) target bundleno = 2 (0x2), region = 61 }

// kernel: mix_transformer_stage_forward.29
= control target key start
LH: loop header
LB: loop body
LE: loop exit
PB: predicated region body
PF: predicated region fallthrough
CT: control target
= control target key end

     0   :  { %vm36_vm0 = vcmask 261120   ;;  %vm496_vm1 = vcmask 523264   ;;  %s999_s0 = inlined_call_operand.vmem [shape: f32[128,32], index: 0, kind: input, shape index: {}]   ;;  %s1000_s1 = inlined_call_operand.vmem [shape: f32[32,64], index: 1, kind: input, shape index: {}]   ;;  %s1001_s3 = inlined_call_operand.vmem [shape: f32[1,32], index: 3, kind: input, shape index: {}]   ;;  %s1002_s4 = inlined_call_operand.vmem [shape: f32[1,32], index: 4, kind: input, shape index: {}]   ;;  %s1003_s2 = inlined_call_operand.vmem [shape: f32[1,64], index: 2, kind: input, shape index: {}]   ;;  %s1004_s5 = inlined_call_operand.vmem [shape: f32[128,64], index: 5, kind: output, shape index: {}]  }
   0x1   :  { %v20_v0 = vld [vmem:[%s999_s0] sm:$0xff]  ;;  %v21_v1 = vld [vmem:[%s999_s0 + $0x8] sm:$0xff]  ;;  %v22_v8 = vld [vmem:[%s999_s0 + $0x10] sm:$0xff] }
   0x2   :  { %v28_v2 = vld [vmem:[%s999_s0 + $0x40] sm:$0xff]  ;;  %v37_v3 = vsel %vm36_vm0, %v20_v0, 0.0  ;;  %v40_v4 = vsel %vm36_vm0, %v21_v1, 0.0  ;;  %v29_v5 = vld [vmem:[%s999_s0 + $0x48] sm:$0xff]  ;;  %v30_v9 = vld [vmem:[%s999_s0 + $0x50] sm:$0xff]  ;;  %v43_v10 = vsel %vm36_vm0, %v22_v8, 0.0 }
   0x3   :  { %38 = vadd.xlane.f32.xlu0 %v37_v3  ;;  %41 = vadd.xlane.f32.xlu1 %v40_v4  ;;  %v61_v6 = vsel %vm36_vm0, %v28_v2, 0.0  ;;  %v64_v7 = vsel %vm36_vm0, %v29_v5, 0.0  ;;  %v67_v11 = vsel %vm36_vm0, %v30_v9, 0.0  ;;  %v689_v12 = vld [vmem:[%s999_s0 + $0x18] sm:$0xff]  ;;  %v703_v16 = vld [vmem:[%s999_s0 + $0x20] sm:$0xff]  ;;  %v717_v20 = vld [vmem:[%s999_s0 + $0x28] sm:$0xff] }
   0x4   :  { %v694_v13 = vld [vmem:[%s999_s0 + $0x58] sm:$0xff]  ;;  %v46_v14 = vsel %vm36_vm0, %v689_v12, 0.0  ;;  %v708_v17 = vld [vmem:[%s999_s0 + $0x60] sm:$0xff]  ;;  %v49_v18 = vsel %vm36_vm0, %v703_v16, 0.0  ;;  %v722_v21 = vld [vmem:[%s999_s0 + $0x68] sm:$0xff]  ;;  %v52_v22 = vsel %vm36_vm0, %v717_v20, 0.0 }
   0x5   :  { %v70_v15 = vsel %vm36_vm0, %v694_v13, 0.0  ;;  %v73_v19 = vsel %vm36_vm0, %v708_v17, 0.0  ;;  %v76_v23 = vsel %vm36_vm0, %v722_v21, 0.0  ;;  %v731_v24 = vld [vmem:[%s999_s0 + $0x30] sm:$0xff]  ;;  %v745_v28 = vld [vmem:[%s999_s0 + $0x38] sm:$0xff] }
   0x6   :  { %v736_v25 = vld [vmem:[%s999_s0 + $0x70] sm:$0xff]  ;;  %v55_v26 = vsel %vm36_vm0, %v731_v24, 0.0  ;;  %v750_v29 = vld [vmem:[%s999_s0 + $0x78] sm:$0xff]  ;;  %v58_v30 = vsel %vm36_vm0, %v745_v28, 0.0 }
   0x7   :  { %62 = vadd.xlane.f32.xlu0 %v61_v6  ;;  %65 = vadd.xlane.f32.xlu1 %v64_v7  ;;  %v79_v27 = vsel %vm36_vm0, %v736_v25, 0.0  ;;  %v82_v31 = vsel %vm36_vm0, %v750_v29, 0.0 }
   0xb   :  { %44 = vadd.xlane.f32.xlu0 %v43_v10  ;;  %68 = vadd.xlane.f32.xlu1 %v67_v11 }
   0xf   :  { %47 = vadd.xlane.f32.xlu0 %v46_v14  ;;  %71 = vadd.xlane.f32.xlu1 %v70_v15 }
  0x13   :  { %50 = vadd.xlane.f32.xlu0 %v49_v18  ;;  %74 = vadd.xlane.f32.xlu1 %v73_v19 }
  0x17   :  { %53 = vadd.xlane.f32.xlu0 %v52_v22  ;;  %77 = vadd.xlane.f32.xlu1 %v76_v23 }
  0x1b   :  { %56 = vadd.xlane.f32.xlu0 %v55_v26  ;;  %80 = vadd.xlane.f32.xlu1 %v79_v27 }
  0x1f   :  { %59 = vadd.xlane.f32.xlu0 %v58_v30  ;;  %83 = vadd.xlane.f32.xlu1 %v82_v31 }
  0x90   :  { %v39_v32 = vpop.xlane.xlu0 %38  ;;  %v42_v33 = vpop.xlane.xlu1 %41 }
  0x91   :  { %v86_v34 = vmul.f32 0.03125, %v39_v32  ;;  %v87_v35 = vmul.f32 0.03125, %v42_v33 }
  0x93   :  { %v756_v36 = vsub.f32 %v20_v0, %v86_v34  ;;  %v758_v37 = vsub.f32 %v21_v1, %v87_v35 }
  0x94   :  { %v63_v38 = vpop.xlane.xlu0 %62  ;;  %v66_v39 = vpop.xlane.xlu1 %65 }
  0x95   :  { %v94_v40 = vmul.f32 0.03125, %v63_v38  ;;  %v95_v41 = vmul.f32 0.03125, %v66_v39  ;;  %v118_v42 = vmul.f32 %v756_v36, %v756_v36  ;;  %v119_v43 = vmul.f32 %v758_v37, %v758_v37 }
  0x97   :  { %v764_v44 = vsub.f32 %v28_v2, %v94_v40  ;;  %v766_v45 = vsub.f32 %v29_v5, %v95_v41  ;;  %v134_v46 = vsel %vm36_vm0, %v118_v42, 0.0  ;;  %v137_v49 = vsel %vm36_vm0, %v119_v43, 0.0 }
  0x98   :  { %135 = vadd.xlane.f32.xlu0 %v134_v46  ;;  %v45_v47 = vpop.xlane.xlu0 %44  ;;  %v69_v48 = vpop.xlane.xlu1 %68 }
  0x99   :  { %v88_v50 = vmul.f32 0.03125, %v45_v47  ;;  %v96_v51 = vmul.f32 0.03125, %v69_v48  ;;  %v126_v52 = vmul.f32 %v764_v44, %v764_v44  ;;  %v127_v53 = vmul.f32 %v766_v45, %v766_v45 }
  0x9b   :  { %v774_v54 = vsub.f32 %v22_v8, %v88_v50  ;;  %v776_v55 = vsub.f32 %v30_v9, %v96_v51  ;;  %v158_v56 = vsel %vm36_vm0, %v126_v52, 0.0  ;;  %v161_v59 = vsel %vm36_vm0, %v127_v53, 0.0  ;;  %v293_v53 = vld [vmem:[%s1000_s1 + $0x8] sm:$0xff] }
  0x9c   :  { %138 = vadd.xlane.f32.xlu0 %v137_v49  ;;  %159 = vadd.xlane.f32.xlu1 %v158_v56  ;;  %v48_v57 = vpop.xlane.xlu0 %47  ;;  %v72_v58 = vpop.xlane.xlu1 %71 }
  0x9d   :  { %v89_v60 = vmul.f32 0.03125, %v48_v57  ;;  %v97_v61 = vmul.f32 0.03125, %v72_v58  ;;  %v120_v62 = vmul.f32 %v774_v54, %v774_v54  ;;  %v128_v63 = vmul.f32 %v776_v55, %v776_v55  ;;  %v294_v57 = vld [vmem:[%s1000_s1 + $0x10] sm:$0xff]  ;;  %v295_v58 = vld [vmem:[%s1000_s1 + $0x18] sm:$0xff] }
  0x9f   :  { %v785_v0 = vsub.f32 %v689_v12, %v89_v60  ;;  %v788_v1 = vsub.f32 %v694_v13, %v97_v61  ;;  %v140_v2 = vsel %vm36_vm0, %v120_v62, 0.0  ;;  %v164_v5 = vsel %vm36_vm0, %v128_v63, 0.0 }
  0xa0   :  { %162 = vadd.xlane.f32.xlu1 %v161_v59  ;;  %141 = vadd.xlane.f32.xlu0 %v140_v2  ;;  %v51_v3 = vpop.xlane.xlu0 %50  ;;  %v75_v4 = vpop.xlane.xlu1 %74  ;;  %v592_v59 = vpack.c.bf16 %v295_v58, %v294_v57 }
  0xa1   :  { %v90_v6 = vmul.f32 0.03125, %v51_v3  ;;  %v98_v7 = vmul.f32 0.03125, %v75_v4  ;;  %v121_v8 = vmul.f32 %v785_v0, %v785_v0  ;;  %v129_v9 = vmul.f32 %v788_v1, %v788_v1 }
  0xa3   :  { %v797_v10 = vsub.f32 %v703_v16, %v90_v6  ;;  %v800_v11 = vsub.f32 %v708_v17, %v98_v7  ;;  %v143_v12 = vsel %vm36_vm0, %v121_v8, 0.0  ;;  %v167_v15 = vsel %vm36_vm0, %v129_v9, 0.0 }
  0xa4   :  { %165 = vadd.xlane.f32.xlu1 %v164_v5  ;;  %144 = vadd.xlane.f32.xlu0 %v143_v12  ;;  %v54_v13 = vpop.xlane.xlu0 %53  ;;  %v78_v14 = vpop.xlane.xlu1 %77 }
  0xa5   :  { %v91_v18 = vmul.f32 0.03125, %v54_v13  ;;  %v99_v19 = vmul.f32 0.03125, %v78_v14  ;;  %v122_v22 = vmul.f32 %v797_v10, %v797_v10  ;;  %v130_v16 = vmul.f32 %v800_v11, %v800_v11 }
  0xa7   :  { %v809_v23 = vsub.f32 %v717_v20, %v91_v18  ;;  %v812_v17 = vsub.f32 %v722_v21, %v99_v19  ;;  %v146_v26 = vsel %vm36_vm0, %v122_v22, 0.0  ;;  %v170_v31 = vsel %vm36_vm0, %v130_v16, 0.0 }
  0xa8   :  { %168 = vadd.xlane.f32.xlu1 %v167_v15  ;;  %147 = vadd.xlane.f32.xlu0 %v146_v26  ;;  %v57_v27 = vpop.xlane.xlu0 %56  ;;  %v81_v30 = vpop.xlane.xlu1 %80 }
  0xa9   :  { %v92_v32 = vmul.f32 0.03125, %v57_v27  ;;  %v100_v33 = vmul.f32 0.03125, %v81_v30  ;;  %v123_v34 = vmul.f32 %v809_v23, %v809_v23  ;;  %v131_v20 = vmul.f32 %v812_v17, %v812_v17  ;;  %v861_v30 = vld [vmem:[%s1001_s3] ss:$0 sm:$0xff] }
  0xab   :  { %v821_v35 = vsub.f32 %v731_v24, %v92_v32  ;;  %v824_v21 = vsub.f32 %v736_v25, %v100_v33  ;;  %v149_v38 = vsel %vm36_vm0, %v123_v34, 0.0  ;;  %v173_v41 = vsel %vm36_vm0, %v131_v20, 0.0 }
  0xac   :  { %171 = vadd.xlane.f32.xlu1 %v170_v31  ;;  %150 = vadd.xlane.f32.xlu0 %v149_v38  ;;  %v60_v39 = vpop.xlane.xlu0 %59  ;;  %v84_v40 = vpop.xlane.xlu1 %83  ;;  %v867_v38 = vld [vmem:[%s1002_s4] ss:$0 sm:$0xff] }
  0xad   :  { %v93_v42 = vmul.f32 0.03125, %v60_v39  ;;  %v101_v43 = vmul.f32 0.03125, %v84_v40  ;;  %v124_v46 = vmul.f32 %v821_v35, %v821_v35  ;;  %v132_v24 = vmul.f32 %v824_v21, %v824_v21 }
  0xaf   :  { %v833_v47 = vsub.f32 %v745_v28, %v93_v42  ;;  %v836_v25 = vsub.f32 %v750_v29, %v101_v43  ;;  %v152_v48 = vsel %vm36_vm0, %v124_v46, 0.0  ;;  %v176_v49 = vsel %vm36_vm0, %v132_v24, 0.0  ;;  %v292_v29 = vld [vmem:[%s1000_s1] sm:$0xff] }
  0xb0   :  { %174 = vadd.xlane.f32.xlu1 %v173_v41  ;;  %153 = vadd.xlane.f32.xlu0 %v152_v48  ;;  %v588_v56 = vpack.c.bf16 %v293_v53, %v292_v29 }
  0xb1   :  { %v125_v50 = vmul.f32 %v833_v47, %v833_v47  ;;  %v133_v51 = vmul.f32 %v836_v25, %v836_v25 }
  0xb2   :  { %589 = vmatprep.subr.bf16.mxu0 %v588_v56  ;;  %596 = vmatprep.subr.bf16.mxu1 %v588_v56 }
  0xb3   :  { %v155_v52 = vsel %vm36_vm0, %v125_v50, 0.0  ;;  %v179_v28 = vsel %vm36_vm0, %v133_v51, 0.0  ;;  %591 = vmatpush3.bf16.msra.mxu0 %v588_v56  ;;  %598 = vmatpush3.bf16.msra.mxu1 %v588_v56 }
  0xb4   :  { %177 = vadd.xlane.f32.xlu1 %v176_v49  ;;  %156 = vadd.xlane.f32.xlu0 %v155_v52 }
  0xb5   :  { %593 = vmatprep.subr.bf16.mxu0 %v592_v59  ;;  %597 = vmatprep.subr.bf16.mxu1 %v592_v59 }
  0xb7   :  { %595 = vmatpush3.bf16.msra.mxu0 %v592_v59  ;;  %599 = vmatpush3.bf16.msra.mxu1 %v592_v59 }
  0xb8   :  { %180 = vadd.xlane.f32.xlu1 %v179_v28 }
 0x125   :  { %v136_v60 = vpop.xlane.xlu0 %135 }
 0x126   :  { %v182_v61 = vmul.f32 0.03125, %v136_v60 }
 0x128   :  { %v198_v62 = vadd.f32 1e-06, %v182_v61 }
 0x129   :  { %v160_v63 = vpop.xlane.xlu1 %159  ;;  %v139_v2 = vpop.xlane.xlu0 %138 }
 0x12a   :  { %600 = vrsqrt.f32 %v198_v62  ;;  %v190_v3 = vmul.f32 0.03125, %v160_v63  ;;  %v183_v4 = vmul.f32 0.03125, %v139_v2 }
 0x12c   :  { %v206_v5 = vadd.f32 1e-06, %v190_v3  ;;  %v199_v6 = vadd.f32 1e-06, %v183_v4 }
 0x12d   :  { %v163_v7 = vpop.xlane.xlu1 %162  ;;  %v142_v8 = vpop.xlane.xlu0 %141 }
 0x12e   :  { %602 = vrsqrt.f32 %v206_v5  ;;  %v191_v9 = vmul.f32 0.03125, %v163_v7  ;;  %v184_v12 = vmul.f32 0.03125, %v142_v8 }
 0x12f   :  { %604 = vrsqrt.f32 %v199_v6 }
 0x130   :  { %v207_v13 = vadd.f32 1e-06, %v191_v9  ;;  %v200_v14 = vadd.f32 1e-06, %v184_v12 }
 0x131   :  { %v166_v15 = vpop.xlane.xlu1 %165  ;;  %v145_v18 = vpop.xlane.xlu0 %144 }
 0x132   :  { %606 = vrsqrt.f32 %v207_v13  ;;  %v192_v19 = vmul.f32 0.03125, %v166_v15  ;;  %v185_v22 = vmul.f32 0.03125, %v145_v18 }
 0x133   :  { %608 = vrsqrt.f32 %v200_v14 }
 0x134   :  { %v601_v16 = vpop.eup %600  ;;  %v208_v26 = vadd.f32 1e-06, %v192_v19  ;;  %v201_v27 = vadd.f32 1e-06, %v185_v22 }
 0x135   :  { %v169_v31 = vpop.xlane.xlu1 %168  ;;  %v148_v32 = vpop.xlane.xlu0 %147  ;;  %v230_v33 = vmul.f32 %v601_v16, %v756_v36 }
 0x136   :  { %610 = vrsqrt.f32 %v208_v26  ;;  %v193_v34 = vmul.f32 0.03125, %v169_v31  ;;  %v186_v20 = vmul.f32 0.03125, %v148_v32 }
 0x137   :  { %612 = vrsqrt.f32 %v201_v27  ;;  %v253_v39 = vmul.f32 %v861_v30, %v230_v33 }
 0x138   :  { %v603_v40 = vpop.eup %602  ;;  %v209_v41 = vadd.f32 1e-06, %v193_v34  ;;  %v202_v42 = vadd.f32 1e-06, %v186_v20 }
 0x139   :  { %v605_v43 = vpop.eup %604  ;;  %v172_v46 = vpop.xlane.xlu1 %171  ;;  %v276_v48 = vadd.f32 %v867_v38, %v253_v39  ;;  %v238_v36 = vmul.f32 %v603_v40, %v764_v44 }
 0x13a   :  { %v151_v24 = vpop.xlane.xlu0 %150  ;;  %614 = vrsqrt.f32 %v209_v41  ;;  %v194_v49 = vmul.f32 0.03125, %v172_v46  ;;  %v231_v51 = vmul.f32 %v605_v43, %v758_v37 }
 0x13b   :  { %v187_v50 = vmul.f32 0.03125, %v151_v24  ;;  %616 = vrsqrt.f32 %v202_v42  ;;  %564 = vmatprep.mubr.msk.f32.mxu0 %vm36_vm0, %v276_v48  ;;  %v261_v52 = vmul.f32 %v861_v30, %v238_v36 }
 0x13c   :  { %v607_v28 = vpop.eup %606  ;;  %v210_v29 = vadd.f32 1e-06, %v194_v49  ;;  %v254_v56 = vmul.f32 %v861_v30, %v231_v51 }
 0x13d   :  { %v203_v53 = vadd.f32 1e-06, %v187_v50  ;;  %v609_v57 = vpop.eup %608  ;;  %v175_v58 = vpop.xlane.xlu1 %174  ;;  %v284_v44 = vadd.f32 %v867_v38, %v261_v52  ;;  %v239_v60 = vmul.f32 %v607_v28, %v766_v45 }
 0x13e   :  { %v154_v59 = vpop.xlane.xlu0 %153  ;;  %618 = vrsqrt.f32 %v210_v29  ;;  %v195_v61 = vmul.f32 0.03125, %v175_v58  ;;  %v277_v62 = vadd.f32 %v867_v38, %v254_v56  ;;  %v232_v63 = vmul.f32 %v609_v57, %v774_v54 }
 0x13f   :  { %v188_v37 = vmul.f32 0.03125, %v154_v59  ;;  %620 = vrsqrt.f32 %v203_v53  ;;  %576 = vmatprep.mubr.msk.f32.mxu1 %vm36_vm0, %v284_v44  ;;  %v262_v2 = vmul.f32 %v861_v30, %v239_v60 }
 0x140   :  { %v611_v3 = vpop.eup %610  ;;  %v211_v4 = vadd.f32 1e-06, %v195_v61  ;;  %565 = vmatmul.mubr.msk.f32.vlgmr.msra.gmra.mrb[0].mxu0 %vm36_vm0, %v277_v62  ;;  %v255_v8 = vmul.f32 %v861_v30, %v232_v63  ;;  %v519_v62 = vld [vmem:[%s1003_s2] ss:$0 sm:$0xff] }
 0x141   :  { %v204_v5 = vadd.f32 1e-06, %v188_v37  ;;  %v613_v6 = vpop.eup %612  ;;  %v178_v7 = vpop.xlane.xlu1 %177  ;;  %v285_v9 = vadd.f32 %v867_v38, %v262_v2  ;;  %v240_v12 = vmul.f32 %v611_v3, %v776_v55 }
 0x142   :  { %v157_v45 = vpop.xlane.xlu0 %156  ;;  %622 = vrsqrt.f32 %v211_v4  ;;  %v196_v13 = vmul.f32 0.03125, %v178_v7  ;;  %v233_v54 = vmul.f32 %v613_v6, %v785_v0  ;;  %v278_v15 = vadd.f32 %v867_v38, %v255_v8 }
 0x143   :  { %v189_v14 = vmul.f32 0.03125, %v157_v45  ;;  %624 = vrsqrt.f32 %v204_v5  ;;  %577 = vmatmul.mubr.msk.f32.vlgmr.msra.gmra.mrb[0].mxu1 %vm36_vm0, %v285_v9  ;;  %v263_v18 = vmul.f32 %v861_v30, %v240_v12 }
 0x144   :  { %v615_v19 = vpop.eup %614  ;;  %v212_v22 = vadd.f32 1e-06, %v196_v13  ;;  %v256_v26 = vmul.f32 %v861_v30, %v233_v54  ;;  %567 = vmatprep.mubr.msk.f32.mxu0 %vm36_vm0, %v278_v15 }
 0x145   :  { %v205_v16 = vadd.f32 1e-06, %v189_v14  ;;  %v617_v27 = vpop.eup %616  ;;  %v181_v55 = vpop.xlane.xlu1 %180  ;;  %v286_v31 = vadd.f32 %v867_v38, %v263_v18  ;;  %v241_v0 = vmul.f32 %v615_v19, %v788_v1 }
 0x146   :  { %626 = vrsqrt.f32 %v212_v22  ;;  %v197_v32 = vmul.f32 0.03125, %v181_v55  ;;  %v279_v33 = vadd.f32 %v867_v38, %v256_v26  ;;  %v234_v34 = vmul.f32 %v617_v27, %v797_v10 }
 0x147   :  { %628 = vrsqrt.f32 %v205_v16  ;;  %579 = vmatprep.mubr.msk.f32.mxu1 %vm36_vm0, %v286_v31  ;;  %v264_v20 = vmul.f32 %v861_v30, %v241_v0 }
 0x148   :  { %v619_v39 = vpop.eup %618  ;;  %v213_v40 = vadd.f32 1e-06, %v197_v32  ;;  %568 = vmatmul.mubr.msk.f32.gmra.mrb[2].mxu0 %vm36_vm0, %v279_v33  ;;  %v257_v41 = vmul.f32 %v861_v30, %v234_v34 }
 0x149   :  { %v621_v42 = vpop.eup %620  ;;  %v287_v1 = vadd.f32 %v867_v38, %v264_v20  ;;  %v242_v43 = vmul.f32 %v619_v39, %v800_v11 }
 0x14a   :  { %630 = vrsqrt.f32 %v213_v40  ;;  %v280_v46 = vadd.f32 %v867_v38, %v257_v41  ;;  %v235_v10 = vmul.f32 %v621_v42, %v809_v23 }
 0x14b   :  { %580 = vmatmul.mubr.msk.f32.gmra.mrb[2].mxu1 %vm36_vm0, %v287_v1  ;;  %v265_v24 = vmul.f32 %v861_v30, %v242_v43 }
 0x14c   :  { %v623_v48 = vpop.eup %622  ;;  %570 = vmatprep.mubr.msk.f32.mxu0 %vm36_vm0, %v280_v46  ;;  %v258_v36 = vmul.f32 %v861_v30, %v235_v10 }
 0x14d   :  { %v625_v49 = vpop.eup %624  ;;  %v288_v50 = vadd.f32 %v867_v38, %v265_v24  ;;  %v243_v51 = vmul.f32 %v623_v48, %v812_v17 }
 0x14e   :  { %v281_v11 = vadd.f32 %v867_v38, %v258_v36  ;;  %v236_v52 = vmul.f32 %v625_v49, %v821_v35 }
 0x14f   :  { %582 = vmatprep.mubr.msk.f32.mxu1 %vm36_vm0, %v288_v50  ;;  %v266_v23 = vmul.f32 %v861_v30, %v243_v51 }
 0x150   :  { %v627_v28 = vpop.eup %626  ;;  %571 = vmatmul.mubr.msk.f32.gmra.mrb[4].mxu0 %vm36_vm0, %v281_v11  ;;  %v259_v29 = vmul.f32 %v861_v30, %v236_v52 }
 0x151   :  { %v629_v53 = vpop.eup %628  ;;  %v289_v56 = vadd.f32 %v867_v38, %v266_v23  ;;  %v244_v57 = vmul.f32 %v627_v28, %v824_v21 }
 0x152   :  { %v282_v17 = vadd.f32 %v867_v38, %v259_v29  ;;  %v237_v58 = vmul.f32 %v629_v53, %v833_v47 }
 0x153   :  { %583 = vmatmul.mubr.msk.f32.gmra.mrb[4].mxu1 %vm36_vm0, %v289_v56  ;;  %v267_v35 = vmul.f32 %v861_v30, %v244_v57 }
 0x154   :  { %v631_v59 = vpop.eup %630  ;;  %573 = vmatprep.mubr.msk.f32.mxu0 %vm36_vm0, %v282_v17  ;;  %v260_v44 = vmul.f32 %v861_v30, %v237_v58 }
 0x155   :  { %v290_v60 = vadd.f32 %v867_v38, %v267_v35  ;;  %v245_v61 = vmul.f32 %v631_v59, %v836_v25 }
 0x156   :  { %v283_v37 = vadd.f32 %v867_v38, %v260_v44 }
 0x157   :  { %585 = vmatprep.mubr.msk.f32.mxu1 %vm36_vm0, %v290_v60  ;;  %v268_v21 = vmul.f32 %v861_v30, %v245_v61 }
 0x158   :  { %574 = vmatmul.mubr.msk.f32.gmra.mrb[6].mxu0 %vm36_vm0, %v283_v37 }
 0x159   :  { %v291_v47 = vadd.f32 %v867_v38, %v268_v21 }
 0x15b   :  { %586 = vmatmul.mubr.msk.f32.gmra.mrb[6].mxu1 %vm36_vm0, %v291_v47 }
 0x213   :  { %v566_v63 = vpop.f32.mrb[0].mxu0 }
 0x214   :  { %v423_v2 = vadd.f32 %v566_v63, %v519_v62  ;;  %v417_v25 = vpop.f32.mrb[1].mxu0 }
 0x215   :  { %v418_v3 = vadd.f32 %v519_v62, %v417_v25 }
 0x216   :  { %498 = vst.msk [vmem:[%s1004_s5 + $0x8] sm:$0xff] %vm496_vm1, %v423_v2  ;;  %v578_v30 = vpop.f32.mrb[0].mxu1 }
 0x217   :  { %497 = vst.msk [vmem:[%s1004_s5] sm:$0xff] %vm496_vm1, %v418_v3  ;;  %v463_v38 = vadd.f32 %v578_v30, %v519_v62  ;;  %v457_v4 = vpop.f32.mrb[1].mxu1 }
 0x218   :  { %v458_v5 = vadd.f32 %v519_v62, %v457_v4 }
 0x219   :  { %506 = vst.msk [vmem:[%s1004_s5 + $0x48] sm:$0xff] %vm496_vm1, %v463_v38 }
 0x21a   :  { %505 = vst.msk [vmem:[%s1004_s5 + $0x40] sm:$0xff] %vm496_vm1, %v458_v5 }
 0x21b   :  { %v569_v6 = vpop.f32.mrb[2].mxu0 }
 0x21c   :  { %v433_v7 = vadd.f32 %v569_v6, %v519_v62  ;;  %v427_v45 = vpop.f32.mrb[3].mxu0 }
 0x21d   :  { %v428_v8 = vadd.f32 %v519_v62, %v427_v45 }
 0x21e   :  { %500 = vst.msk [vmem:[%s1004_s5 + $0x18] sm:$0xff] %vm496_vm1, %v433_v7  ;;  %v581_v9 = vpop.f32.mrb[2].mxu1 }
 0x21f   :  { %499 = vst.msk [vmem:[%s1004_s5 + $0x10] sm:$0xff] %vm496_vm1, %v428_v8  ;;  %v473_v12 = vadd.f32 %v581_v9, %v519_v62  ;;  %v467_v13 = vpop.f32.mrb[3].mxu1 }
 0x220   :  { %v468_v14 = vadd.f32 %v519_v62, %v467_v13 }
 0x221   :  { %508 = vst.msk [vmem:[%s1004_s5 + $0x58] sm:$0xff] %vm496_vm1, %v473_v12 }
 0x222   :  { %507 = vst.msk [vmem:[%s1004_s5 + $0x50] sm:$0xff] %vm496_vm1, %v468_v14 }
 0x223   :  { %v572_v54 = vpop.f32.mrb[4].mxu0 }
 0x224   :  { %v443_v15 = vadd.f32 %v572_v54, %v519_v62  ;;  %v437_v18 = vpop.f32.mrb[5].mxu0 }
 0x225   :  { %v438_v19 = vadd.f32 %v519_v62, %v437_v18 }
 0x226   :  { %502 = vst.msk [vmem:[%s1004_s5 + $0x28] sm:$0xff] %vm496_vm1, %v443_v15  ;;  %v584_v22 = vpop.f32.mrb[4].mxu1 }
 0x227   :  { %501 = vst.msk [vmem:[%s1004_s5 + $0x20] sm:$0xff] %vm496_vm1, %v438_v19  ;;  %v483_v16 = vadd.f32 %v584_v22, %v519_v62  ;;  %v477_v26 = vpop.f32.mrb[5].mxu1 }
 0x228   :  { %v478_v27 = vadd.f32 %v519_v62, %v477_v26 }
 0x229   :  { %510 = vst.msk [vmem:[%s1004_s5 + $0x68] sm:$0xff] %vm496_vm1, %v483_v16 }
 0x22a   :  { %509 = vst.msk [vmem:[%s1004_s5 + $0x60] sm:$0xff] %vm496_vm1, %v478_v27 }
 0x22b   :  { %v575_v55 = vpop.f32.mrb[6].mxu0 }
 0x22c   :  { %v453_v31 = vadd.f32 %v575_v55, %v519_v62  ;;  %v447_v0 = vpop.f32.mrb[7].mxu0 }
 0x22d   :  { %v448_v32 = vadd.f32 %v519_v62, %v447_v0 }
 0x22e   :  { %504 = vst.msk [vmem:[%s1004_s5 + $0x38] sm:$0xff] %vm496_vm1, %v453_v31  ;;  %v587_v33 = vpop.f32.mrb[6].mxu1 }
 0x22f   :  { %503 = vst.msk [vmem:[%s1004_s5 + $0x30] sm:$0xff] %vm496_vm1, %v448_v32  ;;  %v493_v34 = vadd.f32 %v587_v33, %v519_v62  ;;  %v487_v20 = vpop.f32.mrb[7].mxu1 }
 0x230   :  { %v488_v39 = vadd.f32 %v519_v62, %v487_v20 }
 0x231   :  { %512 = vst.msk [vmem:[%s1004_s5 + $0x78] sm:$0xff] %vm496_vm1, %v493_v34 }
 0x232   :  { %511 = vst.msk [vmem:[%s1004_s5 + $0x70] sm:$0xff] %vm496_vm1, %v488_v39 }

// kernel: mix_transformer_stage_forward.30
= control target key start
LH: loop header
LB: loop body
LE: loop exit
PB: predicated region body
PF: predicated region fallthrough
CT: control target
= control target key end

     0   :  { %s992_s12 = smov 0   ;;  %s994_s13 = smov 0   ;;  %s1391_s0 = inlined_call_operand.vmem [shape: f32[2,10,10,64], index: 0, kind: input, shape index: {}]   ;;  %s1392_s1 = inlined_call_operand.vmem [shape: f32[3,3,64], index: 1, kind: input, shape index: {}]   ;;  %s1393_s2 = inlined_call_operand.vmem [shape: f32[1,1,64], index: 2, kind: input, shape index: {}]   ;;  %s1394_s3 = inlined_call_operand.vmem [shape: f32[2,8,8,64], index: 3, kind: output, shape index: {}]  }
   0x1   :  { %s996_s14 = smov 0  }
   0x2 LB: > { %s25_s15 = sadd.s32 1, %s966_s13  ;;  %p915_p0 = scmp.ge.s32.totalorder %s970_s14, 1  ;;  %s970_s14 = sphi %s996_s14, %s13_s14   ;;  %s966_s13 = sphi %s994_s13, %s1396_s13   ;;  %s962_s12 = sphi %s992_s12, %s1395_s12  }
   0x3   : > { %p27_p1 = scmp.ge.s32.totalorder %s25_s15, 2  ;;  %p173_p2 = scmp.lt.s32.totalorder %s970_s14, 3 }
   0x5   : > { %s1398_s15 = smov (%p27_p1, %s25_s15), 0  ;;  %p174_p3 = pnand %p915_p0, %p173_p2 }
   0x6   : > { %p210_p4 = scmp.lt.s32.totalorder (!%p174_p3), %s962_s12, 1  ;;  %v256_v0 = vlaneseq (!%p174_p3)  ;;  %v253_v2 = vld [vmem:[%s1392_s1] sm:$0x7] (!%p174_p3)  ;;  %v254_v3 = vld [vmem:[%s1392_s1 + $0x4] sm:$0x7] (!%p174_p3)  ;;  %vm312_vm0 = vcmask (!%p174_p3), 1046528  }
   0x7   : > { %177 = sbr.rel (%p174_p3) target bundleno = 115 (0x73), region = 32  ;;  %v255_v4 = vld [vmem:[%s1392_s1 + $0x8] sm:$0x7] (!%p174_p3)  ;;  %vm389_vm1 = vcmask (!%p174_p3), 1045504   ;;  %vm789_vm2 = vcmask (!%p174_p3), 523264  }
   0x8   : > { %v257_v1 = vshrl.u32 (!%p174_p3), %v256_v0, 7 }
   0xa   : > { %v258_v5 = vsub.s32 (!%p174_p3), 0, %v257_v1  ;;  %v278_v6 = vsub.s32 (!%p174_p3), 1, %v257_v1  ;;  %v355_v7 = vsub.s32 (!%p174_p3), 2, %v257_v1 }
   0xc   : > { %v1027_v8 = vrot.slane (!%p174_p3), %v253_v2, %v258_v5  ;;  %v1029_v9 = vrot.slane (!%p174_p3), %v253_v2, %v278_v6  ;;  %v1031_v10 = vrot.slane (!%p174_p3), %v253_v2, %v355_v7  ;;  %v1033_v11 = vrot.slane (!%p174_p3), %v254_v3, %v258_v5 }
   0xd   : > { %v1037_v14 = vrot.slane (!%p174_p3), %v254_v3, %v278_v6  ;;  %v1039_v15 = vrot.slane (!%p174_p3), %v254_v3, %v355_v7  ;;  %v1041_v16 = vrot.slane (!%p174_p3), %v255_v4, %v258_v5  ;;  %v1043_v17 = vrot.slane (!%p174_p3), %v255_v4, %v278_v6 }
   0xe   : > { %s1400_s12 = smov (!%p210_p4, %s962_s12), 1  ;;  %v1072_v48 = vrot.slane %v255_v4, %v355_v7 }
   0xf   : > { %s923_s20 = smul.u32 160, %s1400_s12  ;;  %s922_s26 = sshll.u32 %s1400_s12, 6 }
  0x10   : > { %s1131_s4 = scalar_lea.vmem %s1394_s3, %s922_s26 }
  0x11   : > { %s1025_s25 = scalar_lea.vmem %s1391_s0, %s923_s20 }
  0x12   : > { %v233_v12 = vld [vmem:[%s1025_s25] sm:$0xff]  ;;  %v234_v13 = vld [vmem:[%s1025_s25 + $0x8] sm:$0x3]  ;;  %v235_v18 = vld [vmem:[%s1025_s25 + $0x10] sm:$0xff] }
  0x13   : > { %v236_v19 = vld [vmem:[%s1025_s25 + $0x18] sm:$0x3]  ;;  %v260_v20 = vmul.f32 %v1027_v8, %v233_v12  ;;  %v280_v21 = vmul.f32 %v1029_v9, %v233_v12  ;;  %v281_v22 = vmul.f32 %v1029_v9, %v234_v13  ;;  %v357_v23 = vmul.f32 %v1031_v10, %v233_v12  ;;  %v1057_v32 = vld [vmem:[%s1025_s25 + $0x20] sm:$0xff]  ;;  %v1066_v41 = vld [vmem:[%s1025_s25 + $0x28] sm:$0x3] }
  0x14   : > { %v358_v24 = vmul.f32 %v1031_v10, %v234_v13  ;;  %v434_v25 = vmul.f32 %v1033_v11, %v235_v18  ;;  %v454_v26 = vmul.f32 %v1037_v14, %v235_v18  ;;  %v455_v27 = vmul.f32 %v1037_v14, %v236_v19 }
  0x15   : > { %v313_v28 = vrot.slane %v280_v21, 1  ;;  %v314_v29 = vrot.slane %v281_v22, 1  ;;  %v390_v30 = vrot.slane %v357_v23, 2  ;;  %v530_v31 = vmul.f32 %v1039_v15, %v235_v18 }
  0x16   : > { %v391_v33 = vrot.slane %v358_v24, 2  ;;  %v486_v34 = vrot.slane %v454_v26, 1  ;;  %v487_v35 = vrot.slane %v455_v27, 1  ;;  %v531_v36 = vmul.f32 %v1039_v15, %v236_v19 }
  0x17   : > { %v315_v37 = vsel %vm312_vm0, %v313_v28, %v314_v29  ;;  %v562_v38 = vrot.slane %v530_v31, 2  ;;  %v606_v39 = vmul.f32 %v1041_v16, %v1057_v32  ;;  %v626_v40 = vmul.f32 %v1043_v17, %v1057_v32  ;;  %v1104_v28 = vld [vmem:[%s1025_s25 + $0x38] sm:$0x3] }
  0x18   : > { %v345_v42 = vadd.f32 %v315_v37, %v260_v20  ;;  %v392_v43 = vsel %vm389_vm1, %v390_v30, %v391_v33  ;;  %v488_v44 = vsel %vm312_vm0, %v486_v34, %v487_v35  ;;  %v563_v45 = vrot.slane %v531_v36, 2 }
  0x19   : > { %v627_v46 = vmul.f32 %v1043_v17, %v1066_v41  ;;  %v658_v47 = vrot.slane %v626_v40, 1  ;;  %v261_v49 = vmul.f32 %v1027_v8, %v235_v18  ;;  %v282_v52 = vmul.f32 %v1029_v9, %v235_v18 }
  0x1a   : > { %v422_v50 = vadd.f32 %v392_v43, %v345_v42  ;;  %v564_v51 = vsel %vm389_vm1, %v562_v38, %v563_v45  ;;  %v283_v53 = vmul.f32 %v1029_v9, %v236_v19  ;;  %v702_v55 = vmul.f32 %v1072_v48, %v1057_v32  ;;  %v1120_v42 = vld [vmem:[%s1393_s2] ss:$0 sm:$0xff] }
  0x1b   : > { %v659_v54 = vrot.slane %v627_v46, 1  ;;  %v703_v56 = vmul.f32 %v1072_v48, %v1066_v41  ;;  %v359_v57 = vmul.f32 %v1031_v10, %v235_v18  ;;  %v316_v59 = vrot.slane %v282_v52, 1 }
  0x1c   : > { %v442_v58 = vadd.f32 %v434_v25, %v422_v50  ;;  %v317_v60 = vrot.slane %v283_v53, 1  ;;  %v360_v61 = vmul.f32 %v1031_v10, %v236_v19  ;;  %v734_v63 = vrot.slane %v702_v55, 2  ;;  %v1094_v19 = vld [vmem:[%s1025_s25 + $0x30] sm:$0xff] }
  0x1d   : > { %v660_v62 = vsel %vm312_vm0, %v658_v47, %v659_v54  ;;  %v735_v0 = vrot.slane %v703_v56, 2  ;;  %v393_v1 = vrot.slane %v359_v57, 2  ;;  %v435_v5 = vmul.f32 %v1033_v11, %v1057_v32 }
  0x1e   : > { %v518_v2 = vadd.f32 %v488_v44, %v442_v58  ;;  %v318_v3 = vsel %vm312_vm0, %v316_v59, %v317_v60  ;;  %v394_v4 = vrot.slane %v360_v61, 2  ;;  %v456_v12 = vmul.f32 %v1037_v14, %v1057_v32 }
  0x1f   : > { %v736_v6 = vsel %vm389_vm1, %v734_v63, %v735_v0  ;;  %v346_v7 = vadd.f32 %v318_v3, %v261_v49  ;;  %v457_v13 = vmul.f32 %v1037_v14, %v1066_v41  ;;  %v532_v21 = vmul.f32 %v1039_v15, %v1057_v32  ;;  %v1152_v3 = vld [vmem:[%s1025_s25 + $0x40] sm:$0xff] }
  0x20   : > { %v594_v18 = vadd.f32 %v564_v51, %v518_v2  ;;  %v395_v20 = vsel %vm389_vm1, %v393_v1, %v394_v4  ;;  %v533_v22 = vmul.f32 %v1039_v15, %v1066_v41  ;;  %v489_v24 = vrot.slane %v456_v12, 1 }
  0x21   : > { %v423_v23 = vadd.f32 %v395_v20, %v346_v7  ;;  %v490_v25 = vrot.slane %v457_v13, 1  ;;  %v607_v26 = vmul.f32 %v1041_v16, %v1094_v19  ;;  %v565_v29 = vrot.slane %v532_v21, 2  ;;  %v1160_v21 = vld [vmem:[%s1025_s25 + $0x48] sm:$0x3] }
  0x22   : > { %v614_v27 = vadd.f32 %v606_v39, %v594_v18  ;;  %v566_v30 = vrot.slane %v533_v22, 2  ;;  %v628_v31 = vmul.f32 %v1043_v17, %v1094_v19  ;;  %v629_v35 = vmul.f32 %v1043_v17, %v1104_v28 }
  0x23   : > { %v443_v33 = vadd.f32 %v435_v5, %v423_v23  ;;  %v491_v34 = vsel %vm312_vm0, %v489_v24, %v490_v25  ;;  %v704_v36 = vmul.f32 %v1072_v48, %v1094_v19  ;;  %v705_v40 = vmul.f32 %v1072_v48, %v1104_v28 }
  0x24   : > { %v690_v37 = vadd.f32 %v660_v62, %v614_v27  ;;  %v567_v38 = vsel %vm389_vm1, %v565_v29, %v566_v30  ;;  %v661_v39 = vrot.slane %v628_v31, 1  ;;  %v662_v44 = vrot.slane %v629_v35, 1 }
  0x25   : > { %v519_v43 = vadd.f32 %v491_v34, %v443_v33  ;;  %v737_v45 = vrot.slane %v704_v36, 2  ;;  %v262_v46 = vmul.f32 %v1027_v8, %v1057_v32  ;;  %v738_v49 = vrot.slane %v705_v40, 2 }
  0x26   : > { %v766_v47 = vadd.f32 %v736_v6, %v690_v37  ;;  %v284_v50 = vmul.f32 %v1029_v9, %v1057_v32  ;;  %v285_v51 = vmul.f32 %v1029_v9, %v1066_v41  ;;  %v663_v53 = vsel %vm312_vm0, %v661_v39, %v662_v44 }
  0x27   : > { %v595_v52 = vadd.f32 %v567_v38, %v519_v43  ;;  %v361_v54 = vmul.f32 %v1031_v10, %v1057_v32  ;;  %v362_v55 = vmul.f32 %v1031_v10, %v1066_v41  ;;  %v739_v57 = vsel %vm389_vm1, %v737_v45, %v738_v49 }
  0x28   : > { %v781_v56 = vadd.f32 %v1120_v42, %v766_v47  ;;  %v319_v58 = vrot.slane %v284_v50, 1  ;;  %v320_v59 = vrot.slane %v285_v51, 1  ;;  %v436_v63 = vmul.f32 %v1033_v11, %v1094_v19 }
  0x29   : > { %v615_v60 = vadd.f32 %v607_v26, %v595_v52  ;;  %v396_v61 = vrot.slane %v361_v54, 2  ;;  %v397_v62 = vrot.slane %v362_v55, 2  ;;  %v458_v41 = vmul.f32 %v1037_v14, %v1094_v19  ;;  %v1190_v54 = vld [vmem:[%s1025_s25 + $0x50] sm:$0xff] }
  0x2a   : > { %790 = vst.msk [vmem:[%s1131_s4] sm:$0xff] %vm789_vm2, %v781_v56  ;;  %v321_v32 = vsel %vm312_vm0, %v319_v58, %v320_v59  ;;  %v459_v0 = vmul.f32 %v1037_v14, %v1104_v28  ;;  %v534_v1 = vmul.f32 %v1039_v15, %v1094_v19  ;;  %v535_v6 = vmul.f32 %v1039_v15, %v1104_v28 }
  0x2b   : > { %v691_v2 = vadd.f32 %v663_v53, %v615_v60  ;;  %v347_v4 = vadd.f32 %v321_v32, %v262_v46  ;;  %v398_v5 = vsel %vm389_vm1, %v396_v61, %v397_v62  ;;  %v492_v7 = vrot.slane %v458_v41, 1 }
  0x2c   : > { %v493_v12 = vrot.slane %v459_v0, 1  ;;  %v568_v13 = vrot.slane %v534_v1, 2  ;;  %v608_v18 = vmul.f32 %v1041_v16, %v1152_v3  ;;  %v569_v23 = vrot.slane %v535_v6, 2  ;;  %v1205_v0 = vld [vmem:[%s1025_s25 + $0x58] sm:$0x3] }
  0x2d   : > { %v767_v20 = vadd.f32 %v739_v57, %v691_v2  ;;  %v424_v22 = vadd.f32 %v398_v5, %v347_v4  ;;  %v630_v24 = vmul.f32 %v1043_v17, %v1152_v3  ;;  %v631_v26 = vmul.f32 %v1043_v17, %v1160_v21 }
  0x2e   : > { %v494_v25 = vsel %vm312_vm0, %v492_v7, %v493_v12  ;;  %v706_v27 = vmul.f32 %v1072_v48, %v1152_v3  ;;  %v707_v29 = vmul.f32 %v1072_v48, %v1160_v21  ;;  %v570_v33 = vsel %vm389_vm1, %v568_v13, %v569_v23 }
  0x2f   : > { %v782_v30 = vadd.f32 %v1120_v42, %v767_v20  ;;  %v444_v31 = vadd.f32 %v436_v63, %v424_v22  ;;  %v664_v34 = vrot.slane %v630_v24, 1  ;;  %v665_v35 = vrot.slane %v631_v26, 1 }
  0x30   : > { %v740_v36 = vrot.slane %v706_v27, 2  ;;  %v741_v37 = vrot.slane %v707_v29, 2  ;;  %v263_v38 = vmul.f32 %v1027_v8, %v1094_v19  ;;  %v286_v40 = vmul.f32 %v1029_v9, %v1094_v19 }
  0x31   : > { %791 = vst.msk [vmem:[%s1131_s4 + $0x8] sm:$0xff] %vm789_vm2, %v782_v30  ;;  %v520_v39 = vadd.f32 %v494_v25, %v444_v31  ;;  %v287_v43 = vmul.f32 %v1029_v9, %v1104_v28  ;;  %v363_v44 = vmul.f32 %v1031_v10, %v1094_v19  ;;  %v666_v45 = vsel %vm312_vm0, %v664_v34, %v665_v35 }
  0x32   : > { %v742_v46 = vsel %vm389_vm1, %v740_v36, %v741_v37  ;;  %v364_v47 = vmul.f32 %v1031_v10, %v1104_v28  ;;  %v437_v49 = vmul.f32 %v1033_v11, %v1152_v3  ;;  %v322_v51 = vrot.slane %v286_v40, 1 }
  0x33   : > { %v596_v50 = vadd.f32 %v570_v33, %v520_v39  ;;  %v323_v52 = vrot.slane %v287_v43, 1  ;;  %v399_v53 = vrot.slane %v363_v44, 2  ;;  %v460_v19 = vmul.f32 %v1037_v14, %v1152_v3 }
  0x34   : > { %v400_v55 = vrot.slane %v364_v47, 2  ;;  %v461_v56 = vmul.f32 %v1037_v14, %v1160_v21  ;;  %v536_v28 = vmul.f32 %v1039_v15, %v1152_v3  ;;  %v537_v59 = vmul.f32 %v1039_v15, %v1160_v21 }
  0x35   : > { %v616_v57 = vadd.f32 %v608_v18, %v596_v50  ;;  %v324_v58 = vsel %vm312_vm0, %v322_v51, %v323_v52  ;;  %v609_v60 = vmul.f32 %v1041_v16, %v1190_v54  ;;  %v495_v63 = vrot.slane %v460_v19, 1  ;;  %v1244_v51 = vld [vmem:[%s1025_s25 + $0x60] sm:$0xff]  ;;  %v1248_v19 = vld [vmem:[%s1025_s25 + $0x68] sm:$0x3] }
  0x36   : > { %v348_v61 = vadd.f32 %v324_v58, %v263_v38  ;;  %v401_v62 = vsel %vm389_vm1, %v399_v53, %v400_v55  ;;  %v496_v32 = vrot.slane %v461_v56, 1  ;;  %v571_v1 = vrot.slane %v536_v28, 2 }
  0x37   : > { %v692_v41 = vadd.f32 %v666_v45, %v616_v57  ;;  %v572_v2 = vrot.slane %v537_v59, 2  ;;  %v632_v4 = vmul.f32 %v1043_v17, %v1190_v54  ;;  %v633_v7 = vmul.f32 %v1043_v17, %v1205_v0 }
  0x38   : > { %v425_v5 = vadd.f32 %v401_v62, %v348_v61  ;;  %v497_v6 = vsel %vm312_vm0, %v495_v63, %v496_v32  ;;  %v708_v12 = vmul.f32 %v1072_v48, %v1190_v54  ;;  %v709_v22 = vmul.f32 %v1072_v48, %v1205_v0 }
  0x39   : > { %v768_v13 = vadd.f32 %v742_v46, %v692_v41  ;;  %v573_v18 = vsel %vm389_vm1, %v571_v1, %v572_v2  ;;  %v667_v20 = vrot.slane %v632_v4, 1  ;;  %v668_v24 = vrot.slane %v633_v7, 1 }
  0x3a   : > { %v445_v23 = vadd.f32 %v437_v49, %v425_v5  ;;  %v743_v25 = vrot.slane %v708_v12, 2  ;;  %v264_v26 = vmul.f32 %v1027_v8, %v1152_v3  ;;  %v744_v29 = vrot.slane %v709_v22, 2 }
  0x3b   : > { %v783_v27 = vadd.f32 %v1120_v42, %v768_v13  ;;  %v288_v30 = vmul.f32 %v1029_v9, %v1152_v3  ;;  %v289_v31 = vmul.f32 %v1029_v9, %v1160_v21  ;;  %v669_v34 = vsel %vm312_vm0, %v667_v20, %v668_v24 }
  0x3c   : > { %v521_v33 = vadd.f32 %v497_v6, %v445_v23  ;;  %v365_v35 = vmul.f32 %v1031_v10, %v1152_v3  ;;  %v366_v36 = vmul.f32 %v1031_v10, %v1160_v21  ;;  %v745_v37 = vsel %vm389_vm1, %v743_v25, %v744_v29 }
  0x3d   : > { %792 = vst.msk [vmem:[%s1131_s4 + $0x10] sm:$0xff] %vm789_vm2, %v783_v27  ;;  %v325_v38 = vrot.slane %v288_v30, 1  ;;  %v326_v39 = vrot.slane %v289_v31, 1  ;;  %v438_v40 = vmul.f32 %v1033_v11, %v1190_v54  ;;  %v462_v3 = vmul.f32 %v1037_v14, %v1190_v54 }
  0x3e   : > { %v597_v43 = vadd.f32 %v573_v18, %v521_v33  ;;  %v402_v44 = vrot.slane %v365_v35, 2  ;;  %v403_v45 = vrot.slane %v366_v36, 2  ;;  %v463_v21 = vmul.f32 %v1037_v14, %v1205_v0 }
  0x3f   : > { %v327_v46 = vsel %vm312_vm0, %v325_v38, %v326_v39  ;;  %v538_v47 = vmul.f32 %v1039_v15, %v1190_v54  ;;  %v539_v49 = vmul.f32 %v1039_v15, %v1205_v0  ;;  %v498_v55 = vrot.slane %v462_v3, 1 }
  0x40   : > { %v617_v50 = vadd.f32 %v609_v60, %v597_v43  ;;  %v349_v52 = vadd.f32 %v327_v46, %v264_v26  ;;  %v404_v53 = vsel %vm389_vm1, %v402_v44, %v403_v45  ;;  %v499_v56 = vrot.slane %v463_v21, 1  ;;  %v1289_v43 = vld [vmem:[%s1025_s25 + $0x70] sm:$0xff] }
  0x41   : > { %v574_v28 = vrot.slane %v538_v47, 2  ;;  %v575_v57 = vrot.slane %v539_v49, 2  ;;  %v610_v58 = vmul.f32 %v1041_v16, %v1244_v51  ;;  %v634_v62 = vmul.f32 %v1043_v17, %v1244_v51  ;;  %v1293_v47 = vld [vmem:[%s1025_s25 + $0x78] sm:$0x3] }
  0x42   : > { %v693_v59 = vadd.f32 %v669_v34, %v617_v50  ;;  %v426_v61 = vadd.f32 %v404_v53, %v349_v52  ;;  %v635_v60 = vmul.f32 %v1043_v17, %v1248_v19  ;;  %v500_v63 = vsel %vm312_vm0, %v498_v55, %v499_v56 }
  0x43   : > { %v576_v32 = vsel %vm389_vm1, %v574_v28, %v575_v57  ;;  %v710_v41 = vmul.f32 %v1072_v48, %v1244_v51  ;;  %v711_v1 = vmul.f32 %v1072_v48, %v1248_v19  ;;  %v670_v5 = vrot.slane %v634_v62, 1 }
  0x44   : > { %v769_v2 = vadd.f32 %v745_v37, %v693_v59  ;;  %v446_v4 = vadd.f32 %v438_v40, %v426_v61  ;;  %v671_v6 = vrot.slane %v635_v60, 1  ;;  %v265_v13 = vmul.f32 %v1027_v8, %v1190_v54 }
  0x45   : > { %v746_v7 = vrot.slane %v710_v41, 2  ;;  %v747_v12 = vrot.slane %v711_v1, 2  ;;  %v290_v18 = vmul.f32 %v1029_v9, %v1190_v54  ;;  %v291_v24 = vmul.f32 %v1029_v9, %v1205_v0 }
  0x46   : > { %v784_v20 = vadd.f32 %v1120_v42, %v769_v2  ;;  %v522_v22 = vadd.f32 %v500_v63, %v446_v4  ;;  %v672_v23 = vsel %vm312_vm0, %v670_v5, %v671_v6  ;;  %v367_v27 = vmul.f32 %v1031_v10, %v1190_v54 }
  0x47   : > { %v748_v25 = vsel %vm389_vm1, %v746_v7, %v747_v12  ;;  %v328_v26 = vrot.slane %v290_v18, 1  ;;  %v368_v29 = vmul.f32 %v1031_v10, %v1205_v0  ;;  %v329_v31 = vrot.slane %v291_v24, 1 }
  0x48   : > { %793 = vst.msk [vmem:[%s1131_s4 + $0x18] sm:$0xff] %vm789_vm2, %v784_v20  ;;  %v598_v30 = vadd.f32 %v576_v32, %v522_v22  ;;  %v439_v33 = vmul.f32 %v1033_v11, %v1244_v51  ;;  %v464_v34 = vmul.f32 %v1037_v14, %v1244_v51  ;;  %v405_v35 = vrot.slane %v367_v27, 2 }
  0x49   : > { %v406_v36 = vrot.slane %v368_v29, 2  ;;  %v465_v37 = vmul.f32 %v1037_v14, %v1248_v19  ;;  %v540_v54 = vmul.f32 %v1039_v15, %v1244_v51  ;;  %v330_v38 = vsel %vm312_vm0, %v328_v26, %v329_v31 }
  0x4a   : > { %v618_v0 = vadd.f32 %v610_v58, %v598_v30  ;;  %v501_v39 = vrot.slane %v464_v34, 1  ;;  %v541_v40 = vmul.f32 %v1039_v15, %v1248_v19  ;;  %v350_v44 = vadd.f32 %v330_v38, %v265_v13 }
  0x4b   : > { %v407_v45 = vsel %vm389_vm1, %v405_v35, %v406_v36  ;;  %v502_v3 = vrot.slane %v465_v37, 1  ;;  %v577_v46 = vrot.slane %v540_v54, 2  ;;  %v636_v50 = vmul.f32 %v1043_v17, %v1289_v43  ;;  %v249_v35 = vld [vmem:[%s1025_s25 + $0x80] sm:$0xff]  ;;  %v250_v36 = vld [vmem:[%s1025_s25 + $0x88] sm:$0x3] }
  0x4c   : > { %v694_v21 = vadd.f32 %v672_v23, %v618_v0  ;;  %v578_v49 = vrot.slane %v541_v40, 2  ;;  %v427_v52 = vadd.f32 %v407_v45, %v350_v44  ;;  %v611_v53 = vmul.f32 %v1041_v16, %v1289_v43 }
  0x4d   : > { %v637_v55 = vmul.f32 %v1043_v17, %v1293_v47  ;;  %v712_v56 = vmul.f32 %v1072_v48, %v1289_v43  ;;  %v503_v57 = vsel %vm312_vm0, %v501_v39, %v502_v3  ;;  %v673_v58 = vrot.slane %v636_v50, 1 }
  0x4e   : > { %v770_v28 = vadd.f32 %v748_v25, %v694_v21  ;;  %v713_v59 = vmul.f32 %v1072_v48, %v1293_v47  ;;  %v447_v61 = vadd.f32 %v439_v33, %v427_v52  ;;  %v579_v62 = vsel %vm389_vm1, %v577_v46, %v578_v49 }
  0x4f   : > { %v674_v60 = vrot.slane %v637_v55, 1  ;;  %v749_v63 = vrot.slane %v712_v56, 2  ;;  %v266_v41 = vmul.f32 %v1027_v8, %v1244_v51  ;;  %v292_v1 = vmul.f32 %v1029_v9, %v1244_v51 }
  0x50   : > { %v785_v32 = vadd.f32 %v1120_v42, %v770_v28  ;;  %v293_v2 = vmul.f32 %v1029_v9, %v1248_v19  ;;  %v523_v4 = vadd.f32 %v503_v57, %v447_v61  ;;  %v750_v5 = vrot.slane %v713_v59, 2 }
  0x51   : > { %v369_v6 = vmul.f32 %v1031_v10, %v1244_v51  ;;  %v370_v7 = vmul.f32 %v1031_v10, %v1248_v19  ;;  %v675_v12 = vsel %vm312_vm0, %v673_v58, %v674_v60  ;;  %v331_v13 = vrot.slane %v292_v1, 1 }
  0x52   : > { %794 = vst.msk [vmem:[%s1131_s4 + $0x20] sm:$0xff] %vm789_vm2, %v785_v32  ;;  %v332_v18 = vrot.slane %v293_v2, 1  ;;  %v440_v20 = vmul.f32 %v1033_v11, %v1289_v43  ;;  %v599_v22 = vadd.f32 %v579_v62, %v523_v4  ;;  %v466_v51 = vmul.f32 %v1037_v14, %v1289_v43 }
  0x53   : > { %v408_v23 = vrot.slane %v369_v6, 2  ;;  %v409_v24 = vrot.slane %v370_v7, 2  ;;  %v467_v19 = vmul.f32 %v1037_v14, %v1293_v47  ;;  %v542_v26 = vmul.f32 %v1039_v15, %v1289_v43 }
  0x54   : > { %v333_v25 = vsel %vm312_vm0, %v331_v13, %v332_v18  ;;  %v543_v27 = vmul.f32 %v1039_v15, %v1293_v47  ;;  %v619_v29 = vadd.f32 %v611_v53, %v599_v22  ;;  %v504_v33 = vrot.slane %v466_v51, 1 }
  0x55   : > { %v351_v30 = vadd.f32 %v333_v25, %v266_v41  ;;  %v410_v31 = vsel %vm389_vm1, %v408_v23, %v409_v24  ;;  %v751_v34 = vsel %vm389_vm1, %v749_v63, %v750_v5  ;;  %v505_v37 = vrot.slane %v467_v19, 1  ;;  %v251_v5 = vld [vmem:[%s1025_s25 + $0x90] sm:$0xff] }
  0x56   : > { %v580_v54 = vrot.slane %v542_v26, 2  ;;  %v581_v0 = vrot.slane %v543_v27, 2  ;;  %v695_v38 = vadd.f32 %v675_v12, %v619_v29  ;;  %v638_v40 = vmul.f32 %v1043_v17, %v249_v35 }
  0x57   : > { %v428_v39 = vadd.f32 %v410_v31, %v351_v30  ;;  %v639_v44 = vmul.f32 %v1043_v17, %v250_v36  ;;  %v506_v45 = vsel %vm312_vm0, %v504_v33, %v505_v37  ;;  %v612_v3 = vmul.f32 %v1041_v16, %v249_v35 }
  0x58   : > { %v714_v46 = vmul.f32 %v1072_v48, %v249_v35  ;;  %v715_v21 = vmul.f32 %v1072_v48, %v250_v36  ;;  %v771_v49 = vadd.f32 %v751_v34, %v695_v38  ;;  %v676_v52 = vrot.slane %v638_v40, 1 }
  0x59   : > { %v448_v50 = vadd.f32 %v440_v20, %v428_v39  ;;  %v677_v53 = vrot.slane %v639_v44, 1  ;;  %v582_v55 = vsel %vm389_vm1, %v580_v54, %v581_v0  ;;  %v294_v57 = vmul.f32 %v1029_v9, %v1289_v43 }
  0x5a   : > { %v752_v56 = vrot.slane %v714_v46, 2  ;;  %v753_v28 = vrot.slane %v715_v21, 2  ;;  %v786_v58 = vadd.f32 %v1120_v42, %v771_v49  ;;  %v267_v61 = vmul.f32 %v1027_v8, %v1289_v43 }
  0x5b   : > { %v524_v59 = vadd.f32 %v506_v45, %v448_v50  ;;  %v295_v62 = vmul.f32 %v1029_v9, %v1293_v47  ;;  %v678_v60 = vsel %vm312_vm0, %v676_v52, %v677_v53  ;;  %v334_v63 = vrot.slane %v294_v57, 1 }
  0x5c   : > { %v371_v32 = vmul.f32 %v1031_v10, %v1289_v43  ;;  %v372_v41 = vmul.f32 %v1031_v10, %v1293_v47  ;;  %795 = vst.msk [vmem:[%s1131_s4 + $0x28] sm:$0xff] %vm789_vm2, %v786_v58  ;;  %v754_v2 = vsel %vm389_vm1, %v752_v56, %v753_v28  ;;  %v468_v8 = vmul.f32 %v1037_v14, %v249_v35  ;;  %v252_v43 = vld [vmem:[%s1025_s25 + $0x98] sm:$0x3] }
  0x5d   : > { %v600_v1 = vadd.f32 %v582_v55, %v524_v59  ;;  %v335_v4 = vrot.slane %v295_v62, 1  ;;  %v469_v7 = vmul.f32 %v1037_v14, %v250_v36  ;;  %v544_v12 = vmul.f32 %v1039_v15, %v249_v35 }
  0x5e   : > { %v411_v9 = vrot.slane %v371_v32, 2  ;;  %v412_v6 = vrot.slane %v372_v41, 2  ;;  %v507_v10 = vrot.slane %v468_v8, 1  ;;  %v545_v47 = vmul.f32 %v1039_v15, %v250_v36 }
  0x5f   : > { %v620_v13 = vadd.f32 %v612_v3, %v600_v1  ;;  %v336_v18 = vsel %vm312_vm0, %v334_v63, %v335_v4  ;;  %v441_v23 = vmul.f32 %v1033_v11, %v249_v35  ;;  %v508_v24 = vrot.slane %v469_v7, 1 }
  0x60   : > { %v352_v20 = vadd.f32 %v336_v18, %v267_v61  ;;  %v413_v22 = vsel %vm389_vm1, %v411_v9, %v412_v6  ;;  %v583_v25 = vrot.slane %v544_v12, 2  ;;  %v584_v19 = vrot.slane %v545_v47, 2 }
  0x61   : > { %v696_v51 = vadd.f32 %v678_v60, %v620_v13  ;;  %v640_v14 = vmul.f32 %v1043_v17, %v251_v5  ;;  %v641_v27 = vmul.f32 %v1043_v17, %v252_v43  ;;  %v509_v30 = vsel %vm312_vm0, %v507_v10, %v508_v24 }
  0x62   : > { %v429_v26 = vadd.f32 %v413_v22, %v352_v20  ;;  %v716_v15 = vmul.f32 %v1072_v48, %v251_v5  ;;  %v717_v31 = vmul.f32 %v1072_v48, %v252_v43  ;;  %v585_v34 = vsel %vm389_vm1, %v583_v25, %v584_v19 }
  0x63   : > { %v772_v29 = vadd.f32 %v754_v2, %v696_v51  ;;  %v679_v35 = vrot.slane %v640_v14, 1  ;;  %v680_v36 = vrot.slane %v641_v27, 1  ;;  %v613_v54 = vmul.f32 %v1041_v16, %v251_v5 }
  0x64   : > { %v449_v33 = vadd.f32 %v441_v23, %v429_v26  ;;  %v755_v17 = vrot.slane %v716_v15, 2  ;;  %v756_v0 = vrot.slane %v717_v31, 2 }
  0x65   : > { %v787_v11 = vadd.f32 %v1120_v42, %v772_v29  ;;  %v681_v39 = vsel %vm312_vm0, %v679_v35, %v680_v36 }
  0x66   : > { %v525_v37 = vadd.f32 %v509_v30, %v449_v33  ;;  %v757_v48 = vsel %vm389_vm1, %v755_v17, %v756_v0 }
  0x67   : > { %796 = vst.msk [vmem:[%s1131_s4 + $0x30] sm:$0xff] %vm789_vm2, %v787_v11 }
  0x68   : > { %v601_v38 = vadd.f32 %v585_v34, %v525_v37 }
  0x6a   : > { %v621_v40 = vadd.f32 %v613_v54, %v601_v38 }
  0x6c   : > { %v697_v44 = vadd.f32 %v681_v39, %v621_v40 }
  0x6e   : > { %v773_v45 = vadd.f32 %v757_v48, %v697_v44 }
  0x70   : > { %v788_v3 = vadd.f32 %v1120_v42, %v773_v45 }
  0x72   : > { %797 = vst.msk [vmem:[%s1131_s4 + $0x38] sm:$0xff] %vm789_vm2, %v788_v3 }
  0x73 PF: > { %s13_s14 = sadd.s32 1, %s970_s14   ;;  %s1395_s12 = smov %s966_s13 }
  0x74   : > { %p10_p5 = scmp.ge.s32.totalorder %s13_s14, 4   ;;  %s1396_s13 = smov %s1398_s15 }
  0x76   :  { %12 = sbr.rel (!%p10_p5) target bundleno = 2 (0x2), region = 68 }

// kernel: mix_transformer_stage_forward.31
= control target key start
LH: loop header
LB: loop body
LE: loop exit
PB: predicated region body
PF: predicated region fallthrough
CT: control target
= control target key end

     0   :  { %vm48_vm0 = vcmask 523264   ;;  %vm274_vm1 = vcmask 261120   ;;  %s646_s1 = inlined_call_operand.vmem [shape: f32[64,32], index: 1, kind: input, shape index: {}]   ;;  %s647_s0 = inlined_call_operand.vmem [shape: f32[128,64], index: 0, kind: input, shape index: {}]   ;;  %s648_s2 = inlined_call_operand.vmem [shape: f32[1,32], index: 2, kind: input, shape index: {}]   ;;  %s649_s3 = inlined_call_operand.vmem [shape: f32[128,32], index: 3, kind: input, shape index: {}]   ;;  %s650_s4 = inlined_call_operand.vmem [shape: f32[128,32], index: 4, kind: output, shape index: {}]  }
   0x1   :  { %v33_v0 = vld [vmem:[%s646_s1] sm:$0xff]  ;;  %v34_v1 = vld [vmem:[%s646_s1 + $0x8] sm:$0xff]  ;;  %v35_v2 = vld [vmem:[%s646_s1 + $0x10] sm:$0xff] }
   0x2   :  { %v376_v3 = vpack.c.bf16 %v34_v1, %v33_v0  ;;  %v36_v4 = vld [vmem:[%s646_s1 + $0x18] sm:$0xff]  ;;  %v37_v6 = vld [vmem:[%s646_s1 + $0x20] sm:$0xff]  ;;  %v38_v7 = vld [vmem:[%s646_s1 + $0x28] sm:$0xff] }
   0x3   :  { %v380_v5 = vpack.c.bf16 %v36_v4, %v35_v2  ;;  %v17_v8 = vld [vmem:[%s647_s0] sm:$0xff]  ;;  %v384_v10 = vpack.c.bf16 %v38_v7, %v37_v6  ;;  %v39_v11 = vld [vmem:[%s646_s1 + $0x30] sm:$0xff]  ;;  %v40_v12 = vld [vmem:[%s646_s1 + $0x38] sm:$0xff] }
   0x4   :  { %377 = vmatprep.subr.bf16.mxu0 %v376_v3  ;;  %392 = vmatprep.subr.bf16.mxu1 %v376_v3  ;;  %v25_v9 = vld [vmem:[%s647_s0 + $0x40] sm:$0xff]  ;;  %v388_v13 = vpack.c.bf16 %v40_v12, %v39_v11  ;;  %v18_v14 = vld [vmem:[%s647_s0 + $0x8] sm:$0xff]  ;;  %v19_v16 = vld [vmem:[%s647_s0 + $0x10] sm:$0xff] }
   0x5   :  { %379 = vmatpush3.bf16.msra.mxu0 %v376_v3  ;;  %396 = vmatpush3.bf16.msra.mxu1 %v376_v3  ;;  %v26_v15 = vld [vmem:[%s647_s0 + $0x48] sm:$0xff]  ;;  %v27_v17 = vld [vmem:[%s647_s0 + $0x50] sm:$0xff]  ;;  %v20_v18 = vld [vmem:[%s647_s0 + $0x18] sm:$0xff] }
   0x6   :  { %381 = vmatprep.subr.bf16.mxu0 %v380_v5  ;;  %393 = vmatprep.subr.bf16.mxu1 %v380_v5  ;;  %v28_v19 = vld [vmem:[%s647_s0 + $0x58] sm:$0xff]  ;;  %v21_v20 = vld [vmem:[%s647_s0 + $0x20] sm:$0xff]  ;;  %v22_v22 = vld [vmem:[%s647_s0 + $0x28] sm:$0xff] }
   0x7   :  { %352 = vmatprep.mubr.msk.f32.mxu0 %vm48_vm0, %v17_v8  ;;  %364 = vmatprep.mubr.msk.f32.mxu1 %vm48_vm0, %v25_v9  ;;  %v29_v21 = vld [vmem:[%s647_s0 + $0x60] sm:$0xff]  ;;  %v30_v23 = vld [vmem:[%s647_s0 + $0x68] sm:$0xff]  ;;  %v23_v24 = vld [vmem:[%s647_s0 + $0x30] sm:$0xff] }
   0x8   :  { %v31_v25 = vld [vmem:[%s647_s0 + $0x70] sm:$0xff]  ;;  %v24_v26 = vld [vmem:[%s647_s0 + $0x38] sm:$0xff]  ;;  %v516_v28 = vld [vmem:[%s648_s2] ss:$0 sm:$0xff] }
   0x9   :  { %383 = vmatpush3.bf16.msra.mxu0 %v380_v5  ;;  %397 = vmatpush3.bf16.msra.mxu1 %v380_v5  ;;  %v32_v27 = vld [vmem:[%s647_s0 + $0x78] sm:$0xff]  ;;  %v243_v30 = vld [vmem:[%s649_s3 + $0x8] sm:$0xff]  ;;  %v242_v36 = vld [vmem:[%s649_s3] sm:$0xff] }
   0xa   :  { %385 = vmatprep.subr.bf16.mxu0 %v384_v10  ;;  %394 = vmatprep.subr.bf16.mxu1 %v384_v10  ;;  %v251_v32 = vld [vmem:[%s649_s3 + $0x48] sm:$0xff]  ;;  %v250_v38 = vld [vmem:[%s649_s3 + $0x40] sm:$0xff]  ;;  %v245_v46 = vld [vmem:[%s649_s3 + $0x18] sm:$0xff] }
   0xb   :  { %v253_v48 = vld [vmem:[%s649_s3 + $0x58] sm:$0xff]  ;;  %v244_v52 = vld [vmem:[%s649_s3 + $0x10] sm:$0xff]  ;;  %v247_v62 = vld [vmem:[%s649_s3 + $0x28] sm:$0xff] }
   0xc   :  { %v252_v54 = vld [vmem:[%s649_s3 + $0x50] sm:$0xff]  ;;  %v255_v0 = vld [vmem:[%s649_s3 + $0x68] sm:$0xff]  ;;  %v246_v4 = vld [vmem:[%s649_s3 + $0x20] sm:$0xff] }
   0xd   :  { %387 = vmatpush3.bf16.msra.mxu0 %v384_v10  ;;  %398 = vmatpush3.bf16.msra.mxu1 %v384_v10  ;;  %v254_v6 = vld [vmem:[%s649_s3 + $0x60] sm:$0xff] }
   0xe   :  { %389 = vmatprep.subr.bf16.mxu0 %v388_v13  ;;  %395 = vmatprep.subr.bf16.mxu1 %v388_v13 }
  0x11   :  { %391 = vmatpush3.bf16.msra.mxu0 %v388_v13  ;;  %399 = vmatpush3.bf16.msra.mxu1 %v388_v13 }
  0x14   :  { %353 = vmatmul.mubr.msk.f32.vlgmr.msra.gmra.mrb[0].mxu0 %vm48_vm0, %v18_v14  ;;  %365 = vmatmul.mubr.msk.f32.vlgmr.msra.gmra.mrb[0].mxu1 %vm48_vm0, %v26_v15  ;;  %v249_v14 = vld [vmem:[%s649_s3 + $0x38] sm:$0xff] }
  0x15   :  { %355 = vmatprep.mubr.msk.f32.mxu0 %vm48_vm0, %v19_v16  ;;  %367 = vmatprep.mubr.msk.f32.mxu1 %vm48_vm0, %v27_v17  ;;  %v257_v16 = vld [vmem:[%s649_s3 + $0x78] sm:$0xff] }
  0x18   :  { %356 = vmatmul.mubr.msk.f32.gmra.mrb[2].mxu0 %vm48_vm0, %v20_v18  ;;  %368 = vmatmul.mubr.msk.f32.gmra.mrb[2].mxu1 %vm48_vm0, %v28_v19 }
  0x19   :  { %358 = vmatprep.mubr.msk.f32.mxu0 %vm48_vm0, %v21_v20  ;;  %370 = vmatprep.mubr.msk.f32.mxu1 %vm48_vm0, %v29_v21  ;;  %v248_v20 = vld [vmem:[%s649_s3 + $0x30] sm:$0xff] }
  0x1c   :  { %359 = vmatmul.mubr.msk.f32.gmra.mrb[4].mxu0 %vm48_vm0, %v22_v22  ;;  %371 = vmatmul.mubr.msk.f32.gmra.mrb[4].mxu1 %vm48_vm0, %v30_v23  ;;  %v256_v22 = vld [vmem:[%s649_s3 + $0x70] sm:$0xff] }
  0x1d   :  { %361 = vmatprep.mubr.msk.f32.mxu0 %vm48_vm0, %v23_v24  ;;  %373 = vmatprep.mubr.msk.f32.mxu1 %vm48_vm0, %v31_v25 }
  0x20   :  { %362 = vmatmul.mubr.msk.f32.gmra.mrb[6].mxu0 %vm48_vm0, %v24_v26  ;;  %374 = vmatmul.mubr.msk.f32.gmra.mrb[6].mxu1 %vm48_vm0, %v32_v27 }
  0xe7   :  { %v354_v29 = vpop.f32.mrb[0].mxu0  ;;  %v366_v31 = vpop.f32.mrb[0].mxu1 }
  0xe8   :  { %v169_v33 = vadd.f32 %v354_v29, %v516_v28  ;;  %v209_v34 = vadd.f32 %v366_v31, %v516_v28  ;;  %v163_v35 = vpop.f32.mrb[1].mxu0  ;;  %v203_v37 = vpop.f32.mrb[1].mxu1 }
  0xe9   :  { %v164_v39 = vadd.f32 %v516_v28, %v163_v35  ;;  %v204_v40 = vadd.f32 %v516_v28, %v203_v37 }
  0xea   :  { %v259_v41 = vadd.f32 %v243_v30, %v169_v33  ;;  %v267_v42 = vadd.f32 %v251_v32, %v209_v34 }
  0xeb   :  { %v258_v43 = vadd.f32 %v242_v36, %v164_v39  ;;  %v266_v44 = vadd.f32 %v250_v38, %v204_v40  ;;  %v357_v45 = vpop.f32.mrb[2].mxu0  ;;  %v369_v47 = vpop.f32.mrb[2].mxu1 }
  0xec   :  { %276 = vst.msk [vmem:[%s650_s4 + $0x8] sm:$0xff] %vm274_vm1, %v259_v41  ;;  %284 = vst.msk [vmem:[%s650_s4 + $0x48] sm:$0xff] %vm274_vm1, %v267_v42  ;;  %v179_v49 = vadd.f32 %v357_v45, %v516_v28  ;;  %v219_v50 = vadd.f32 %v369_v47, %v516_v28  ;;  %v173_v51 = vpop.f32.mrb[3].mxu0  ;;  %v213_v53 = vpop.f32.mrb[3].mxu1 }
  0xed   :  { %275 = vst.msk [vmem:[%s650_s4] sm:$0xff] %vm274_vm1, %v258_v43  ;;  %283 = vst.msk [vmem:[%s650_s4 + $0x40] sm:$0xff] %vm274_vm1, %v266_v44  ;;  %v174_v55 = vadd.f32 %v516_v28, %v173_v51  ;;  %v214_v56 = vadd.f32 %v516_v28, %v213_v53 }
  0xee   :  { %v261_v57 = vadd.f32 %v245_v46, %v179_v49  ;;  %v269_v58 = vadd.f32 %v253_v48, %v219_v50 }
  0xef   :  { %v260_v59 = vadd.f32 %v244_v52, %v174_v55  ;;  %v268_v60 = vadd.f32 %v252_v54, %v214_v56  ;;  %v360_v61 = vpop.f32.mrb[4].mxu0  ;;  %v372_v63 = vpop.f32.mrb[4].mxu1 }
  0xf0   :  { %278 = vst.msk [vmem:[%s650_s4 + $0x18] sm:$0xff] %vm274_vm1, %v261_v57  ;;  %286 = vst.msk [vmem:[%s650_s4 + $0x58] sm:$0xff] %vm274_vm1, %v269_v58  ;;  %v189_v1 = vadd.f32 %v360_v61, %v516_v28  ;;  %v229_v2 = vadd.f32 %v372_v63, %v516_v28  ;;  %v183_v3 = vpop.f32.mrb[5].mxu0  ;;  %v223_v5 = vpop.f32.mrb[5].mxu1 }
  0xf1   :  { %277 = vst.msk [vmem:[%s650_s4 + $0x10] sm:$0xff] %vm274_vm1, %v260_v59  ;;  %285 = vst.msk [vmem:[%s650_s4 + $0x50] sm:$0xff] %vm274_vm1, %v268_v60  ;;  %v184_v7 = vadd.f32 %v516_v28, %v183_v3  ;;  %v224_v8 = vadd.f32 %v516_v28, %v223_v5 }
  0xf2   :  { %v263_v9 = vadd.f32 %v247_v62, %v189_v1  ;;  %v271_v10 = vadd.f32 %v255_v0, %v229_v2 }
  0xf3   :  { %v262_v11 = vadd.f32 %v246_v4, %v184_v7  ;;  %v270_v12 = vadd.f32 %v254_v6, %v224_v8  ;;  %v363_v13 = vpop.f32.mrb[6].mxu0  ;;  %v375_v15 = vpop.f32.mrb[6].mxu1 }
  0xf4   :  { %280 = vst.msk [vmem:[%s650_s4 + $0x28] sm:$0xff] %vm274_vm1, %v263_v9  ;;  %288 = vst.msk [vmem:[%s650_s4 + $0x68] sm:$0xff] %vm274_vm1, %v271_v10  ;;  %v199_v17 = vadd.f32 %v363_v13, %v516_v28  ;;  %v239_v18 = vadd.f32 %v375_v15, %v516_v28  ;;  %v193_v19 = vpop.f32.mrb[7].mxu0  ;;  %v233_v21 = vpop.f32.mrb[7].mxu1 }
  0xf5   :  { %279 = vst.msk [vmem:[%s650_s4 + $0x20] sm:$0xff] %vm274_vm1, %v262_v11  ;;  %287 = vst.msk [vmem:[%s650_s4 + $0x60] sm:$0xff] %vm274_vm1, %v270_v12  ;;  %v194_v23 = vadd.f32 %v516_v28, %v193_v19  ;;  %v234_v24 = vadd.f32 %v516_v28, %v233_v21 }
  0xf6   :  { %v265_v25 = vadd.f32 %v249_v14, %v199_v17  ;;  %v273_v26 = vadd.f32 %v257_v16, %v239_v18 }
  0xf7   :  { %v264_v27 = vadd.f32 %v248_v20, %v194_v23  ;;  %v272_v29 = vadd.f32 %v256_v22, %v234_v24 }
  0xf8   :  { %282 = vst.msk [vmem:[%s650_s4 + $0x38] sm:$0xff] %vm274_vm1, %v265_v25  ;;  %290 = vst.msk [vmem:[%s650_s4 + $0x78] sm:$0xff] %vm274_vm1, %v273_v26 }
  0xf9   :  { %281 = vst.msk [vmem:[%s650_s4 + $0x30] sm:$0xff] %vm274_vm1, %v264_v27  ;;  %289 = vst.msk [vmem:[%s650_s4 + $0x70] sm:$0xff] %vm274_vm1, %v272_v29 }

// kernel: mix_transformer_stage_forward.41
= control target key start
LH: loop header
LB: loop body
LE: loop exit
PB: predicated region body
PF: predicated region fallthrough
CT: control target
= control target key end

     0   :  { %vm31_vm0 = vcmask 261120   ;;  %s673_s0 = inlined_call_operand.vmem [shape: f32[128,32], index: 0, kind: input, shape index: {}]   ;;  %s674_s1 = inlined_call_operand.vmem [shape: f32[1,32], index: 1, kind: input, shape index: {}]   ;;  %s675_s2 = inlined_call_operand.vmem [shape: f32[1,32], index: 2, kind: input, shape index: {}]   ;;  %s676_s3 = inlined_call_operand.hbm [shape: f32[128,32], index: 3, kind: output, shape index: {}]  }
   0x1   :  { %v15_v0 = vld [vmem:[%s673_s0] sm:$0xff]  ;;  %v17_v1 = vld [vmem:[%s673_s0 + $0x10] sm:$0xff]  ;;  %v16_v2 = vld [vmem:[%s673_s0 + $0x8] sm:$0xff] }
   0x2   :  { %v32_v3 = vsel %vm31_vm0, %v15_v0, 0.0  ;;  %v38_v4 = vsel %vm31_vm0, %v17_v1, 0.0  ;;  %v18_v5 = vld [vmem:[%s673_s0 + $0x18] sm:$0xff]  ;;  %v35_v6 = vsel %vm31_vm0, %v16_v2, 0.0  ;;  %v19_v8 = vld [vmem:[%s673_s0 + $0x20] sm:$0xff]  ;;  %v20_v9 = vld [vmem:[%s673_s0 + $0x28] sm:$0xff] }
   0x3   :  { %33 = vadd.xlane.f32.xlu0 %v32_v3  ;;  %39 = vadd.xlane.f32.xlu1 %v38_v4  ;;  %v41_v7 = vsel %vm31_vm0, %v18_v5, 0.0 }
   0x4   :  { %8 = vsyncpa [#allocation3], 0  ;;  %v44_v10 = vsel %vm31_vm0, %v19_v8, 0.0  ;;  %v47_v11 = vsel %vm31_vm0, %v20_v9, 0.0  ;;  %v430_v12 = vld [vmem:[%s673_s0 + $0x30] sm:$0xff]  ;;  %v435_v13 = vld [vmem:[%s673_s0 + $0x38] sm:$0xff] }
   0x5   :  { %v50_v14 = vsel %vm31_vm0, %v430_v12, 0.0  ;;  %v53_v15 = vsel %vm31_vm0, %v435_v13, 0.0  ;;  %v444_v16 = vld [vmem:[%s673_s0 + $0x40] sm:$0xff]  ;;  %v449_v17 = vld [vmem:[%s673_s0 + $0x48] sm:$0xff]  ;;  %v458_v20 = vld [vmem:[%s673_s0 + $0x50] sm:$0xff] }
   0x6   :  { %v56_v18 = vsel %vm31_vm0, %v444_v16, 0.0  ;;  %v59_v19 = vsel %vm31_vm0, %v449_v17, 0.0  ;;  %v463_v21 = vld [vmem:[%s673_s0 + $0x58] sm:$0xff]  ;;  %v62_v22 = vsel %vm31_vm0, %v458_v20, 0.0  ;;  %v472_v24 = vld [vmem:[%s673_s0 + $0x60] sm:$0xff]  ;;  %v477_v25 = vld [vmem:[%s673_s0 + $0x68] sm:$0xff] }
   0x7   :  { %36 = vadd.xlane.f32.xlu0 %v35_v6  ;;  %42 = vadd.xlane.f32.xlu1 %v41_v7  ;;  %v65_v23 = vsel %vm31_vm0, %v463_v21, 0.0  ;;  %v68_v26 = vsel %vm31_vm0, %v472_v24, 0.0  ;;  %v71_v27 = vsel %vm31_vm0, %v477_v25, 0.0  ;;  %v486_v28 = vld [vmem:[%s673_s0 + $0x70] sm:$0xff]  ;;  %v491_v29 = vld [vmem:[%s673_s0 + $0x78] sm:$0xff] }
   0x8   :  { %v74_v30 = vsel %vm31_vm0, %v486_v28, 0.0  ;;  %v77_v31 = vsel %vm31_vm0, %v491_v29, 0.0 }
   0xb   :  { %45 = vadd.xlane.f32.xlu0 %v44_v10  ;;  %48 = vadd.xlane.f32.xlu1 %v47_v11 }
   0xf   :  { %51 = vadd.xlane.f32.xlu0 %v50_v14  ;;  %54 = vadd.xlane.f32.xlu1 %v53_v15 }
  0x13   :  { %57 = vadd.xlane.f32.xlu0 %v56_v18  ;;  %60 = vadd.xlane.f32.xlu1 %v59_v19 }
  0x17   :  { %63 = vadd.xlane.f32.xlu0 %v62_v22  ;;  %66 = vadd.xlane.f32.xlu1 %v65_v23 }
  0x1b   :  { %69 = vadd.xlane.f32.xlu0 %v68_v26  ;;  %72 = vadd.xlane.f32.xlu1 %v71_v27 }
  0x1f   :  { %75 = vadd.xlane.f32.xlu0 %v74_v30  ;;  %78 = vadd.xlane.f32.xlu1 %v77_v31 }
  0x90   :  { %v34_v32 = vpop.xlane.xlu0 %33  ;;  %v40_v33 = vpop.xlane.xlu1 %39 }
  0x91   :  { %v81_v34 = vmul.f32 0.03125, %v34_v32  ;;  %v83_v35 = vmul.f32 0.03125, %v40_v33 }
  0x93   :  { %v497_v36 = vsub.f32 %v15_v0, %v81_v34  ;;  %v499_v37 = vsub.f32 %v17_v1, %v83_v35 }
  0x94   :  { %v37_v38 = vpop.xlane.xlu0 %36  ;;  %v43_v39 = vpop.xlane.xlu1 %42 }
  0x95   :  { %v82_v40 = vmul.f32 0.03125, %v37_v38  ;;  %v84_v41 = vmul.f32 0.03125, %v43_v39  ;;  %v113_v42 = vmul.f32 %v497_v36, %v497_v36  ;;  %v115_v43 = vmul.f32 %v499_v37, %v499_v37 }
  0x97   :  { %v505_v44 = vsub.f32 %v16_v2, %v82_v40  ;;  %v507_v45 = vsub.f32 %v18_v5, %v84_v41  ;;  %v129_v46 = vsel %vm31_vm0, %v113_v42, 0.0  ;;  %v135_v49 = vsel %vm31_vm0, %v115_v43, 0.0 }
  0x98   :  { %130 = vadd.xlane.f32.xlu0 %v129_v46  ;;  %v46_v47 = vpop.xlane.xlu0 %45  ;;  %v49_v48 = vpop.xlane.xlu1 %48 }
  0x99   :  { %v85_v50 = vmul.f32 0.03125, %v46_v47  ;;  %v86_v51 = vmul.f32 0.03125, %v49_v48  ;;  %v114_v52 = vmul.f32 %v505_v44, %v505_v44  ;;  %v116_v53 = vmul.f32 %v507_v45, %v507_v45 }
  0x9b   :  { %v515_v54 = vsub.f32 %v19_v8, %v85_v50  ;;  %v517_v55 = vsub.f32 %v20_v9, %v86_v51  ;;  %v132_v56 = vsel %vm31_vm0, %v114_v52, 0.0  ;;  %v138_v59 = vsel %vm31_vm0, %v116_v53, 0.0 }
  0x9c   :  { %136 = vadd.xlane.f32.xlu0 %v135_v49  ;;  %133 = vadd.xlane.f32.xlu1 %v132_v56  ;;  %v52_v57 = vpop.xlane.xlu0 %51  ;;  %v55_v58 = vpop.xlane.xlu1 %54 }
  0x9d   :  { %v87_v60 = vmul.f32 0.03125, %v52_v57  ;;  %v88_v61 = vmul.f32 0.03125, %v55_v58  ;;  %v117_v62 = vmul.f32 %v515_v54, %v515_v54  ;;  %v118_v63 = vmul.f32 %v517_v55, %v517_v55 }
  0x9f   :  { %v526_v0 = vsub.f32 %v430_v12, %v87_v60  ;;  %v529_v1 = vsub.f32 %v435_v13, %v88_v61  ;;  %v141_v2 = vsel %vm31_vm0, %v117_v62, 0.0  ;;  %v144_v5 = vsel %vm31_vm0, %v118_v63, 0.0 }
  0xa0   :  { %139 = vadd.xlane.f32.xlu1 %v138_v59  ;;  %142 = vadd.xlane.f32.xlu0 %v141_v2  ;;  %v58_v3 = vpop.xlane.xlu0 %57  ;;  %v61_v4 = vpop.xlane.xlu1 %60 }
  0xa1   :  { %v89_v6 = vmul.f32 0.03125, %v58_v3  ;;  %v90_v7 = vmul.f32 0.03125, %v61_v4  ;;  %v119_v8 = vmul.f32 %v526_v0, %v526_v0  ;;  %v120_v9 = vmul.f32 %v529_v1, %v529_v1 }
  0xa3   :  { %v538_v10 = vsub.f32 %v444_v16, %v89_v6  ;;  %v541_v11 = vsub.f32 %v449_v17, %v90_v7  ;;  %v147_v12 = vsel %vm31_vm0, %v119_v8, 0.0  ;;  %v150_v15 = vsel %vm31_vm0, %v120_v9, 0.0 }
  0xa4   :  { %145 = vadd.xlane.f32.xlu1 %v144_v5  ;;  %148 = vadd.xlane.f32.xlu0 %v147_v12  ;;  %v64_v13 = vpop.xlane.xlu0 %63  ;;  %v67_v14 = vpop.xlane.xlu1 %66 }
  0xa5   :  { %v91_v18 = vmul.f32 0.03125, %v64_v13  ;;  %v92_v19 = vmul.f32 0.03125, %v67_v14  ;;  %v121_v22 = vmul.f32 %v538_v10, %v538_v10  ;;  %v122_v16 = vmul.f32 %v541_v11, %v541_v11  ;;  %v590_v14 = vld [vmem:[%s674_s1] ss:$0 sm:$0xff]  ;;  %s380_s1 = smov [#allocation2]  }
  0xa7   :  { %v550_v23 = vsub.f32 %v458_v20, %v91_v18  ;;  %v553_v17 = vsub.f32 %v463_v21, %v92_v19  ;;  %v153_v26 = vsel %vm31_vm0, %v121_v22, 0.0  ;;  %v156_v31 = vsel %vm31_vm0, %v122_v16, 0.0 }
  0xa8   :  { %151 = vadd.xlane.f32.xlu1 %v150_v15  ;;  %154 = vadd.xlane.f32.xlu0 %v153_v26  ;;  %v70_v27 = vpop.xlane.xlu0 %69  ;;  %v73_v30 = vpop.xlane.xlu1 %72  ;;  %v596_v26 = vld [vmem:[%s675_s2] ss:$0 sm:$0xff]  ;;  %s308_s2 = sshll.u32 %s380_s1, 4  ;;  %s309_s2 = int_to_ptr.vmem [resolvable:$true] %s308_s2 }
  0xa9   :  { %v93_v32 = vmul.f32 0.03125, %v70_v27  ;;  %v94_v33 = vmul.f32 0.03125, %v73_v30  ;;  %v123_v34 = vmul.f32 %v550_v23, %v550_v23  ;;  %v124_v20 = vmul.f32 %v553_v17, %v553_v17  ;;  %s356_s20 = scalar_lea.vmem %s309_s2, 2048  ;;  %p361_p1 = scmp.lt.s32.totalorder %s309_s2, %s309_s2 }
  0xaa   :  { %p357_p0 = scmp.ne.s32.totalorder %s309_s2, %s356_s20  ;;  %p362_p2 = scmp.lt.s32.totalorder %s356_s20, %s356_s20 }
  0xab   :  { %v562_v35 = vsub.f32 %v472_v24, %v93_v32  ;;  %v565_v21 = vsub.f32 %v477_v25, %v94_v33  ;;  %v159_v38 = vsel %vm31_vm0, %v123_v34, 0.0  ;;  %v162_v41 = vsel %vm31_vm0, %v124_v20, 0.0 }
  0xac   :  { %157 = vadd.xlane.f32.xlu1 %v156_v31  ;;  %160 = vadd.xlane.f32.xlu0 %v159_v38  ;;  %v76_v39 = vpop.xlane.xlu0 %75  ;;  %v79_v40 = vpop.xlane.xlu1 %78  ;;  %p363_p3 = por %p362_p2, %p361_p1 }
  0xad   :  { %v95_v42 = vmul.f32 0.03125, %v76_v39  ;;  %v96_v43 = vmul.f32 0.03125, %v79_v40  ;;  %v125_v46 = vmul.f32 %v562_v35, %v562_v35  ;;  %v126_v24 = vmul.f32 %v565_v21, %v565_v21 }
  0xae   :  { %p364_p4 = pnand %p363_p3, %p357_p0 }
  0xaf   :  { %v574_v47 = vsub.f32 %v486_v28, %v95_v42  ;;  %v577_v25 = vsub.f32 %v491_v29, %v96_v43  ;;  %v165_v48 = vsel %vm31_vm0, %v125_v46, 0.0  ;;  %v168_v49 = vsel %vm31_vm0, %v126_v24, 0.0 }
  0xb0   :  { %163 = vadd.xlane.f32.xlu1 %v162_v41  ;;  %166 = vadd.xlane.f32.xlu0 %v165_v48 }
  0xb1   :  { %v127_v50 = vmul.f32 %v574_v47, %v574_v47  ;;  %v128_v51 = vmul.f32 %v577_v25, %v577_v25 }
  0xb3   :  { %v171_v52 = vsel %vm31_vm0, %v127_v50, 0.0  ;;  %v174_v28 = vsel %vm31_vm0, %v128_v51, 0.0 }
  0xb4   :  { %169 = vadd.xlane.f32.xlu1 %v168_v49  ;;  %172 = vadd.xlane.f32.xlu0 %v171_v52 }
  0xb8   :  { %175 = vadd.xlane.f32.xlu1 %v174_v28 }
 0x125   :  { %v131_v29 = vpop.xlane.xlu0 %130 }
 0x126   :  { %v177_v53 = vmul.f32 0.03125, %v131_v29 }
 0x128   :  { %v193_v56 = vadd.f32 1e-06, %v177_v53 }
 0x129   :  { %v134_v57 = vpop.xlane.xlu1 %133  ;;  %v137_v58 = vpop.xlane.xlu0 %136 }
 0x12a   :  { %324 = vrsqrt.f32 %v193_v56  ;;  %v178_v59 = vmul.f32 0.03125, %v134_v57  ;;  %v179_v60 = vmul.f32 0.03125, %v137_v58 }
 0x12c   :  { %v194_v61 = vadd.f32 1e-06, %v178_v59  ;;  %v195_v62 = vadd.f32 1e-06, %v179_v60 }
 0x12d   :  { %v140_v63 = vpop.xlane.xlu1 %139  ;;  %v143_v2 = vpop.xlane.xlu0 %142 }
 0x12e   :  { %326 = vrsqrt.f32 %v194_v61  ;;  %v180_v3 = vmul.f32 0.03125, %v140_v63  ;;  %v181_v4 = vmul.f32 0.03125, %v143_v2 }
 0x12f   :  { %328 = vrsqrt.f32 %v195_v62 }
 0x130   :  { %v196_v5 = vadd.f32 1e-06, %v180_v3  ;;  %v197_v6 = vadd.f32 1e-06, %v181_v4 }
 0x131   :  { %v146_v7 = vpop.xlane.xlu1 %145  ;;  %v149_v8 = vpop.xlane.xlu0 %148 }
 0x132   :  { %330 = vrsqrt.f32 %v196_v5  ;;  %v182_v9 = vmul.f32 0.03125, %v146_v7  ;;  %v183_v12 = vmul.f32 0.03125, %v149_v8 }
 0x133   :  { %332 = vrsqrt.f32 %v197_v6 }
 0x134   :  { %v325_v13 = vpop.eup %324  ;;  %v198_v15 = vadd.f32 1e-06, %v182_v9  ;;  %v199_v18 = vadd.f32 1e-06, %v183_v12 }
 0x135   :  { %v225_v19 = vmul.f32 %v325_v13, %v497_v36  ;;  %v152_v22 = vpop.xlane.xlu1 %151  ;;  %v155_v16 = vpop.xlane.xlu0 %154 }
 0x136   :  { %334 = vrsqrt.f32 %v198_v15  ;;  %v184_v27 = vmul.f32 0.03125, %v152_v22  ;;  %v185_v30 = vmul.f32 0.03125, %v155_v16 }
 0x137   :  { %v248_v31 = vmul.f32 %v590_v14, %v225_v19  ;;  %336 = vrsqrt.f32 %v199_v18 }
 0x138   :  { %v327_v32 = vpop.eup %326  ;;  %v200_v33 = vadd.f32 1e-06, %v184_v27  ;;  %v201_v34 = vadd.f32 1e-06, %v185_v30 }
 0x139   :  { %v329_v20 = vpop.eup %328  ;;  %v271_v38 = vadd.f32 %v596_v26, %v248_v31  ;;  %v226_v36 = vmul.f32 %v327_v32, %v505_v44  ;;  %v158_v39 = vpop.xlane.xlu1 %157 }
 0x13a   :  { %v161_v40 = vpop.xlane.xlu0 %160  ;;  %v227_v41 = vmul.f32 %v329_v20, %v499_v37  ;;  %338 = vrsqrt.f32 %v200_v33  ;;  %v186_v42 = vmul.f32 0.03125, %v158_v39 }
 0x13b   :  { %v187_v43 = vmul.f32 0.03125, %v161_v40  ;;  %287 = vst.msk [vmem:[#allocation2] sm:$0xff] %vm31_vm0, %v271_v38  ;;  %v249_v46 = vmul.f32 %v590_v14, %v226_v36  ;;  %340 = vrsqrt.f32 %v201_v34 }
 0x13c   :  { %v331_v24 = vpop.eup %330  ;;  %v250_v48 = vmul.f32 %v590_v14, %v227_v41  ;;  %v202_v49 = vadd.f32 1e-06, %v186_v42 }
 0x13d   :  { %v203_v50 = vadd.f32 1e-06, %v187_v43  ;;  %v333_v51 = vpop.eup %332  ;;  %v272_v44 = vadd.f32 %v596_v26, %v249_v46  ;;  %v228_v52 = vmul.f32 %v331_v24, %v507_v45  ;;  %v164_v28 = vpop.xlane.xlu1 %163 }
 0x13e   :  { %v167_v37 = vpop.xlane.xlu0 %166  ;;  %v273_v29 = vadd.f32 %v596_v26, %v250_v48  ;;  %v229_v53 = vmul.f32 %v333_v51, %v515_v54  ;;  %342 = vrsqrt.f32 %v202_v49  ;;  %v188_v56 = vmul.f32 0.03125, %v164_v28 }
 0x13f   :  { %288 = vst.msk [vmem:[#allocation2 + $0x8] sm:$0xff] %vm31_vm0, %v272_v44  ;;  %v251_v57 = vmul.f32 %v590_v14, %v228_v52  ;;  %344 = vrsqrt.f32 %v203_v50  ;;  %v189_v58 = vmul.f32 0.03125, %v167_v37 }
 0x140   :  { %v335_v59 = vpop.eup %334  ;;  %289 = vst.msk [vmem:[#allocation2 + $0x10] sm:$0xff] %vm31_vm0, %v273_v29  ;;  %v252_v60 = vmul.f32 %v590_v14, %v229_v53  ;;  %v204_v45 = vadd.f32 1e-06, %v188_v56 }
 0x141   :  { %v337_v61 = vpop.eup %336  ;;  %v274_v62 = vadd.f32 %v596_v26, %v251_v57  ;;  %v230_v63 = vmul.f32 %v335_v59, %v517_v55  ;;  %v205_v54 = vadd.f32 1e-06, %v189_v58  ;;  %v170_v2 = vpop.xlane.xlu1 %169 }
 0x142   :  { %v173_v3 = vpop.xlane.xlu0 %172  ;;  %v275_v4 = vadd.f32 %v596_v26, %v252_v60  ;;  %v231_v5 = vmul.f32 %v337_v61, %v526_v0  ;;  %346 = vrsqrt.f32 %v204_v45  ;;  %v190_v6 = vmul.f32 0.03125, %v170_v2 }
 0x143   :  { %290 = vst.msk [vmem:[#allocation2 + $0x18] sm:$0xff] %vm31_vm0, %v274_v62  ;;  %v253_v7 = vmul.f32 %v590_v14, %v230_v63  ;;  %348 = vrsqrt.f32 %v205_v54  ;;  %v191_v8 = vmul.f32 0.03125, %v173_v3 }
 0x144   :  { %v339_v9 = vpop.eup %338  ;;  %291 = vst.msk [vmem:[#allocation2 + $0x20] sm:$0xff] %vm31_vm0, %v275_v4  ;;  %v254_v55 = vmul.f32 %v590_v14, %v231_v5  ;;  %v206_v12 = vadd.f32 1e-06, %v190_v6 }
 0x145   :  { %v341_v13 = vpop.eup %340  ;;  %v276_v15 = vadd.f32 %v596_v26, %v253_v7  ;;  %v232_v18 = vmul.f32 %v339_v9, %v529_v1  ;;  %v207_v0 = vadd.f32 1e-06, %v191_v8  ;;  %v176_v19 = vpop.xlane.xlu1 %175 }
 0x146   :  { %v277_v22 = vadd.f32 %v596_v26, %v254_v55  ;;  %v233_v16 = vmul.f32 %v341_v13, %v538_v10  ;;  %350 = vrsqrt.f32 %v206_v12  ;;  %v192_v27 = vmul.f32 0.03125, %v176_v19 }
 0x147   :  { %292 = vst.msk [vmem:[#allocation2 + $0x28] sm:$0xff] %vm31_vm0, %v276_v15  ;;  %v255_v30 = vmul.f32 %v590_v14, %v232_v18  ;;  %352 = vrsqrt.f32 %v207_v0 }
 0x148   :  { %v343_v31 = vpop.eup %342  ;;  %293 = vst.msk [vmem:[#allocation2 + $0x30] sm:$0xff] %vm31_vm0, %v277_v22  ;;  %v256_v32 = vmul.f32 %v590_v14, %v233_v16  ;;  %v208_v33 = vadd.f32 1e-06, %v192_v27 }
 0x149   :  { %v345_v1 = vpop.eup %344  ;;  %v278_v34 = vadd.f32 %v596_v26, %v255_v30  ;;  %v234_v20 = vmul.f32 %v343_v31, %v541_v11 }
 0x14a   :  { %v279_v10 = vadd.f32 %v596_v26, %v256_v32  ;;  %v235_v38 = vmul.f32 %v345_v1, %v550_v23  ;;  %354 = vrsqrt.f32 %v208_v33 }
 0x14b   :  { %294 = vst.msk [vmem:[#allocation2 + $0x38] sm:$0xff] %vm31_vm0, %v278_v34  ;;  %v257_v36 = vmul.f32 %v590_v14, %v234_v20 }
 0x14c   :  { %v347_v39 = vpop.eup %346  ;;  %295 = vst.msk [vmem:[#allocation2 + $0x40] sm:$0xff] %vm31_vm0, %v279_v10  ;;  %v258_v40 = vmul.f32 %v590_v14, %v235_v38 }
 0x14d   :  { %v349_v41 = vpop.eup %348  ;;  %v280_v42 = vadd.f32 %v596_v26, %v257_v36  ;;  %v236_v43 = vmul.f32 %v347_v39, %v553_v17 }
 0x14e   :  { %v281_v11 = vadd.f32 %v596_v26, %v258_v40  ;;  %v237_v46 = vmul.f32 %v349_v41, %v562_v35 }
 0x14f   :  { %296 = vst.msk [vmem:[#allocation2 + $0x48] sm:$0xff] %vm31_vm0, %v280_v42  ;;  %v259_v23 = vmul.f32 %v590_v14, %v236_v43 }
 0x150   :  { %v351_v24 = vpop.eup %350  ;;  %297 = vst.msk [vmem:[#allocation2 + $0x50] sm:$0xff] %vm31_vm0, %v281_v11  ;;  %v260_v48 = vmul.f32 %v590_v14, %v237_v46 }
 0x151   :  { %v353_v49 = vpop.eup %352  ;;  %v282_v50 = vadd.f32 %v596_v26, %v259_v23  ;;  %v238_v51 = vmul.f32 %v351_v24, %v565_v21 }
 0x152   :  { %v283_v17 = vadd.f32 %v596_v26, %v260_v48  ;;  %v239_v44 = vmul.f32 %v353_v49, %v574_v47 }
 0x153   :  { %298 = vst.msk [vmem:[#allocation2 + $0x58] sm:$0xff] %vm31_vm0, %v282_v50  ;;  %v261_v35 = vmul.f32 %v590_v14, %v238_v51 }
 0x154   :  { %v355_v52 = vpop.eup %354  ;;  %299 = vst.msk [vmem:[#allocation2 + $0x60] sm:$0xff] %vm31_vm0, %v283_v17  ;;  %v262_v28 = vmul.f32 %v590_v14, %v239_v44 }
 0x155   :  { %v284_v37 = vadd.f32 %v596_v26, %v261_v35  ;;  %v240_v29 = vmul.f32 %v355_v52, %v577_v25 }
 0x156   :  { %v285_v53 = vadd.f32 %v596_v26, %v262_v28 }
 0x157   :  { %300 = vst.msk [vmem:[#allocation2 + $0x68] sm:$0xff] %vm31_vm0, %v284_v37  ;;  %v263_v21 = vmul.f32 %v590_v14, %v240_v29 }
 0x158   :  { %301 = vst.msk [vmem:[#allocation2 + $0x70] sm:$0xff] %vm31_vm0, %v285_v53 }
 0x159   :  { %v286_v47 = vadd.f32 %v596_v26, %v263_v21 }
 0x15b   :  { %302 = vst.msk [vmem:[#allocation2 + $0x78] sm:$0xff] %vm31_vm0, %v286_v47 }
 0x15c   :  { %367 = shalt.err (!%p364_p4)
}
 0x15d   :  { %s368_s23 = scalar_lea.hbm %s676_s3, 2048 }
 0x15e   :  { %p369_p5 = scmp.ne.s32.totalorder %s676_s3, %s368_s23  ;;  %p372_p6 = scmp.lt.u32.totalorder %s368_s23, %s676_s3 }
 0x160   :  { %p374_p7 = pnand %p372_p6, %p369_p5 }
 0x162   :  { %377 = shalt.err (!%p374_p7)
}
 0x163   :  { %s381_s28 = smov 128   ;;  %s382_s29 = smov 8  }
 0x164   :  { %314 = dma.vmem_to_hbm [thread:$0]  %s309_s2, 2048, %s676_s3, [#allocation3], %s381_s28, %s381_s28, %s382_s29  }
 0x165   :  { %378 = dma.done.wait [#allocation3], 2048  }
 0x166   :  { %379 = vsyncadd [#allocation3], 4294965248 }
 0x167   :  { %318 = vsyncpa [#allocation3], 1 }

</bundles_post_ra>
